<compile_context>
chip_gen: v5e
topology: v5e:2x2
jax: 0.10.0
libtpu: 0.0.40
codegen_flags: <defaults>
</compile_context>

<pallas_src>
import functools

import jax
import jax.numpy as jnp
from jax.experimental import pallas as pl
from jax.experimental.pallas import tpu as pltpu


LAYER_DIMS = ((1, 16), (16, 32), (32, 16), (16, 1))  # (C_in, C_out) per Conv1d
LANE = 128


# ----------------------------- kernel ---------------------------------------

def denoise_kernel(x_ref, w_ref, b_ref, o_ref, *, seg_len, layers, compute_dtype):
    """x_ref: (1, tb*L) slab of fused batch segments; w_ref/b_ref packed params."""
    N = x_ref.shape[1]
    L = seg_len
    c_max = max(cin for _, cin, _ in layers[1:])          # widest MXU layer (32)

    x = x_ref[...].astype(jnp.float32)                    # (1, N) f32

    # Per-segment boundary masks: batch rows are concatenated along lanes, so
    # Conv1d zero-padding applies at every multiple of L.  Hoisted and
    # pre-broadcast ONCE per grid step (JAX doesn't CSE broadcast_in_dim);
    # layers reuse mask[:Cin] with a multiply.
    pos = jax.lax.broadcasted_iota(jnp.int32, (1, N), 1) % L
    m_l = jnp.broadcast_to((pos >= 1).astype(compute_dtype), (c_max, N))
    m_r = jnp.broadcast_to((pos < (L - 1)).astype(compute_dtype), (c_max, N))

    def shift(h):
        c = h.shape[0]
        hm1 = pltpu.roll(h, shift=1, axis=1) * m_l[:c]        # h(t-1)
        hp1 = pltpu.roll(h, shift=N - 1, axis=1) * m_r[:c]    # h(t+1)
        return hm1, hp1

    # ---- layer 1: Conv1d(1 -> 16).  C_in == 1 => rank-1 outer product; three
    # broadcast FMAs on the VPU in f32 (keeps the MXU / vex slot free).
    r0, _, cout0 = layers[0]
    wl = w_ref[r0:r0 + cout0, 0:1].astype(jnp.float32)                  # tap t-1
    wc0 = w_ref[r0:r0 + cout0, LANE:LANE + 1].astype(jnp.float32)       # tap t
    wr = w_ref[r0:r0 + cout0, 2 * LANE:2 * LANE + 1].astype(jnp.float32)  # tap t+1
    b1 = b_ref[r0:r0 + cout0, 0:1]                                      # (16, 1) f32
    xm1, xp1 = shift(x)
    h = jnp.maximum(wl * xm1 + wc0 * x + wr * xp1 + b1, 0.0)            # (16, N) f32
    h = h.astype(compute_dtype)

    # ---- layers 2..4: three MXU matmuls per layer (one per tap), accumulated
    # in f32.  No tap concat => no extra VMEM store/load traffic; bias-add and
    # ReLU stay f32, activations are cast down once for the next layer.
    n_layers = len(layers)
    for li in range(1, n_layers):
        r0, cin, cout = layers[li]
        wm1 = w_ref[r0:r0 + cout, 0:cin]                      # (Cout, Cin) tap t-1
        wct = w_ref[r0:r0 + cout, LANE:LANE + cin]            # tap t
        wp1 = w_ref[r0:r0 + cout, 2 * LANE:2 * LANE + cin]    # tap t+1
        b = b_ref[r0:r0 + cout, 0:1]                          # (Cout, 1) f32
        hm1, hp1 = shift(h)
        y = (jnp.dot(wm1, hm1, preferred_element_type=jnp.float32)
             + jnp.dot(wct, h, preferred_element_type=jnp.float32)
             + jnp.dot(wp1, hp1, preferred_element_type=jnp.float32)
             + b)
        if li == n_layers - 1:
            h = y                                             # (1, N) f32, no ReLU
        else:
            h = jnp.maximum(y, 0.0).astype(compute_dtype)

    o_ref[...] = h.astype(o_ref.dtype)                        # (1, N)


# ----------------------------- wrapper ---------------------------------------

def _choose_tb(batch, seg_len, target_lanes=32768, max_tb=256):
    """Fuse as many batch rows per grid step as is VMEM-sane (~32K lanes)."""
    padded_batch = 8 * pl.cdiv(batch, 8)
    tb = max(8, min(max_tb, (target_lanes // seg_len) // 8 * 8))
    return min(tb, padded_batch)


def denoising_cnn(x, w_packed, b_packed, layer_meta, *, tb=None,
                  compute_dtype=jnp.float32,
                  vmem_limit_bytes=48 * 1024 * 1024):
    """x: (B, 1, L) float32 -> (B, 1, L)."""
    B, C, L = x.shape
    assert C == 1 and L % 128 == 0
    if tb is None:
        tb = _choose_tb(B, L)
    G = pl.cdiv(B, tb)
    Bp = G * tb
    x2 = x.reshape(B, L)
    if Bp != B:
        x2 = jnp.pad(x2, ((0, Bp - B), (0, 0)))
    N = tb * L
    xg = x2.reshape(G, N)               # lane-dense slab: tb batch rows per row

    # Pre-cast the resident weight block once (outside the kernel), so no
    # per-grid-step f32->bf16 weight casts.  Biases stay f32.
    wq = w_packed.astype(compute_dtype)

    kern = functools.partial(denoise_kernel, seg_len=L, layers=layer_meta,
                             compute_dtype=compute_dtype)

    # NOTE: the (1, N) in/out block is sublane-sparse (1/8) but lane-dense; it
    # is accepted knowingly (activation traffic dominates at these sizes).
    out = pl.pallas_call(
        kern,
        out_shape=jax.ShapeDtypeStruct((G, N), x.dtype),
        grid_spec=pltpu.PrefetchScalarGridSpec(
            num_scalar_prefetch=0,
            grid=(G,),
            in_specs=[
                pl.BlockSpec((1, N), lambda g: (g, 0)),
                pl.BlockSpec(wq.shape, lambda g: (0, 0)),
                pl.BlockSpec(b_packed.shape, lambda g: (0, 0)),
            ],
            out_specs=pl.BlockSpec((1, N), lambda g: (g, 0)),
        ),
        compiler_params=pltpu.CompilerParams(
            dimension_semantics=("parallel",),
            vmem_limit_bytes=vmem_limit_bytes,
        ),
    )(xg, wq, b_packed)

    return out.reshape(Bp, L)[:B].reshape(B, 1, L)


# ----------------- parameter init / packing (deterministic) ------------------

def init_params(key):
    """PyTorch-style Conv1d params: weight (C_out, C_in, 3), bias (C_out,)."""
    torch_params = []
    for (cin, cout) in LAYER_DIMS:
        key, kw, kb = jax.random.split(key, 3)
        bound = (cin * 3.0) ** -0.5
        w = jax.random.uniform(kw, (cout, cin, 3), jnp.float32, -bound, bound)
        b = jax.random.uniform(kb, (cout,), jnp.float32, -bound, bound)
        torch_params.append((w, b))
    return torch_params


def pack_params(torch_params):
    """Weights -> one (R, 3*128) block, tap t at lane group [t*128, t*128+Cin)
    (128-aligned so per-tap MXU LHS slices never cross a lane tile).
    Biases -> separate (R, 128) f32 block (column 0).  Layer row starts stay
    8-aligned (0, 16, 48, 64)."""
    w_blocks, b_blocks, layer_meta, row = [], [], [], 0
    for (w, b) in torch_params:
        cout, cin, k = w.shape
        taps = [jnp.pad(w[:, :, t], ((0, 0), (0, LANE - cin))) for t in range(k)]
        w_blocks.append(jnp.concatenate(taps, axis=1))          # (Cout, 3*128)
        b_blocks.append(jnp.pad(b.reshape(cout, 1), ((0, 0), (0, LANE - 1))))
        layer_meta.append((row, cin, cout))
        row += cout
    wp = jnp.concatenate(w_blocks, axis=0)
    bp = jnp.concatenate(b_blocks, axis=0)
    pad_rows = (-wp.shape[0]) % 8
    if pad_rows:
        wp = jnp.pad(wp, ((0, pad_rows), (0, 0)))
        bp = jnp.pad(bp, ((0, pad_rows), (0, 0)))
    return wp, bp, tuple(layer_meta)


# ---------------- pure-JAX reference (matches PyTorch semantics) -------------

def ref_conv1d(x, w, b):
    # x: (B, C_in, L), w: (C_out, C_in, 3), b: (C_out,)
    L = x.shape[-1]
    xp = jnp.pad(x, ((0, 0), (0, 0), (1, 1)))
    cols = jnp.stack([xp[:, :, k:k + L] for k in range(3)], axis=-1)  # (B,Ci,L,3)
    return jnp.einsum('bclk,ock->bol', cols, w) + b[None, :, None]


def ref_forward(x, torch_params):
    h = jax.nn.relu(ref_conv1d(x, *torch_params[0]))
    h = jax.nn.relu(ref_conv1d(h, *torch_params[1]))
    h = jax.nn.relu(ref_conv1d(h, *torch_params[2]))
    return ref_conv1d(h, *torch_params[3])


# ----------------------------------- main -------------------------------------

if __name__ == "__main__":
    key = jax.random.PRNGKey(0)
    key_x, key_p = jax.random.split(key)

    B, L = 16, 128
    x = jax.random.normal(key_x, (B, 1, L), dtype=jnp.float32)

    torch_params = init_params(key_p)
    wp, bp, meta = pack_params(torch_params)
    y_ref = ref_forward(x, torch_params)

    # f32 path (exact; the recommended path on v5e -- no bf16 VPU there).
    y = jax.block_until_ready(denoising_cnn(x, wp, bp, meta))
    assert y.shape == (B, 1, L)
    assert jnp.allclose(y, y_ref, atol=1e-4, rtol=1e-4), "f32 mismatch vs reference"

    # bf16 activations + weights (v6e/v7x path): f32 MXU accumulate/bias/ReLU.
    y_bf16 = jax.block_until_ready(
        denoising_cnn(x, wp, bp, meta, compute_dtype=jnp.bfloat16))
    assert jnp.allclose(y_bf16, y_ref, atol=5e-2, rtol=5e-2), "bf16 mismatch"

    # Multi-step grid (G=2) exercises the grid/parallel path.
    y_multi = jax.block_until_ready(denoising_cnn(x, wp, bp, meta, tb=8))
    assert jnp.allclose(y_multi, y_ref, atol=1e-4, rtol=1e-4), "multi-step mismatch"

    # Batch not a multiple of the fuse width (exercises the pad/slice path).
    y3 = jax.block_until_ready(denoising_cnn(x[:3], wp, bp, meta))
    assert jnp.allclose(y3, y_ref[:3], atol=1e-4, rtol=1e-4), "padded-batch mismatch"

    print("KERNEL_OK")
</pallas_src>

<mosaic_0001>
module attributes {stable_mosaic.version = 11 : i64} {
  func.func @denoise_kernel(%arg0: i32, %arg1: memref<1x2048xf32, #tpu.memory_space<vmem>>, %arg2: memref<72x384xf32, #tpu.memory_space<vmem>>, %arg3: memref<72x128xf32, #tpu.memory_space<vmem>>, %arg4: memref<1x2048xf32, #tpu.memory_space<vmem>>) attributes {dimension_semantics = [#tpu.dimension_semantics<parallel>], iteration_bounds = array<i64: 1>, scalar_prefetch = 0 : i64, scratch_operands = 0 : i64, tpu.core_type = #tpu.core_type<tc>, window_params = [{transform_indices = @transform_0, window_bounds = array<i64: 1, 2048>}, {pipeline_mode = #tpu.pipeline_mode<synchronous>, transform_indices = @transform_1, window_bounds = array<i64: 72, 384>}, {pipeline_mode = #tpu.pipeline_mode<synchronous>, transform_indices = @transform_2, window_bounds = array<i64: 72, 128>}, {transform_indices = @transform_3, window_bounds = array<i64: 1, 2048>}]} {
    %c0 = arith.constant 0 : index
    %c0_0 = arith.constant 0 : index
    %0 = vector.load %arg1[%c0, %c0_0] : memref<1x2048xf32, #tpu.memory_space<vmem>>, vector<1x2048xf32>
    %1 = tpu.iota {dimensions = array<i32: 1>} : vector<1x2048xi32>
    %c128_i32 = arith.constant 128 : i32
    %c0_i32 = arith.constant 0 : i32
    %2 = arith.cmpi eq, %c128_i32, %c0_i32 : i32
    %c1_i32 = arith.constant 1 : i32
    %3 = arith.select %2, %c1_i32, %c128_i32 : i32
    %4 = vector.broadcast %3 : i32 to vector<1x2048xi32>
    %5 = arith.remsi %1, %4 : vector<1x2048xi32>
    %c0_i32_1 = arith.constant 0 : i32
    %6 = vector.broadcast %c0_i32_1 : i32 to vector<1x2048xi32>
    %7 = arith.cmpi ne, %5, %6 : vector<1x2048xi32>
    %c0_i32_2 = arith.constant 0 : i32
    %8 = vector.broadcast %c0_i32_2 : i32 to vector<1x2048xi32>
    %9 = arith.cmpi slt, %5, %8 : vector<1x2048xi32>
    %c0_i32_3 = arith.constant 0 : i32
    %10 = arith.cmpi slt, %3, %c0_i32_3 : i32
    %11 = vector.broadcast %10 : i1 to vector<1x2048xi1>
    %12 = vector.broadcast %11 : vector<1x2048xi1> to vector<1x2048xi1>
    %13 = arith.xori %9, %12 : vector<1x2048xi1>
    %14 = arith.andi %13, %7 : vector<1x2048xi1>
    %15 = vector.broadcast %3 : i32 to vector<1x2048xi32>
    %16 = arith.addi %5, %15 : vector<1x2048xi32>
    %17 = arith.select %14, %16, %5 : vector<1x2048xi1>, vector<1x2048xi32>
    %c1_i32_4 = arith.constant 1 : i32
    %18 = vector.broadcast %c1_i32_4 : i32 to vector<1x2048xi32>
    %19 = arith.cmpi sge, %17, %18 : vector<1x2048xi32>
    %20 = arith.extui %19 : vector<1x2048xi1> to vector<1x2048xi32>
    %21 = arith.sitofp %20 : vector<1x2048xi32> to vector<1x2048xf32>
    %22 = vector.shape_cast %21 : vector<1x2048xf32> to vector<1x2048xf32>
    %23 = vector.broadcast %22 : vector<1x2048xf32> to vector<32x2048xf32>
    %c127_i32 = arith.constant 127 : i32
    %24 = vector.broadcast %c127_i32 : i32 to vector<1x2048xi32>
    %25 = arith.cmpi slt, %17, %24 : vector<1x2048xi32>
    %26 = arith.extui %25 : vector<1x2048xi1> to vector<1x2048xi32>
    %27 = arith.sitofp %26 : vector<1x2048xi32> to vector<1x2048xf32>
    %28 = vector.shape_cast %27 : vector<1x2048xf32> to vector<1x2048xf32>
    %29 = vector.broadcast %28 : vector<1x2048xf32> to vector<32x2048xf32>
    %c0_5 = arith.constant 0 : index
    %c0_6 = arith.constant 0 : index
    %30 = vector.load %arg2[%c0_5, %c0_6] : memref<72x384xf32, #tpu.memory_space<vmem>>, vector<16x1xf32>
    %c0_7 = arith.constant 0 : index
    %c128 = arith.constant 128 : index
    %31 = vector.load %arg2[%c0_7, %c128] : memref<72x384xf32, #tpu.memory_space<vmem>>, vector<16x1xf32>
    %c0_8 = arith.constant 0 : index
    %c256 = arith.constant 256 : index
    %32 = vector.load %arg2[%c0_8, %c256] : memref<72x384xf32, #tpu.memory_space<vmem>>, vector<16x1xf32>
    %c0_9 = arith.constant 0 : index
    %c0_10 = arith.constant 0 : index
    %33 = vector.load %arg3[%c0_9, %c0_10] : memref<72x128xf32, #tpu.memory_space<vmem>>, vector<16x1xf32>
    %c1_i32_11 = arith.constant 1 : i32
    %34 = tpu.dynamic_rotate %0 by %c1_i32_11 dim 1 : vector<1x2048xf32>, i32 -> vector<1x2048xf32>
    %35 = vector.extract_strided_slice %23 {offsets = [0, 0], sizes = [1, 2048], strides = [1, 1]} : vector<32x2048xf32> to vector<1x2048xf32>
    %36 = arith.mulf %34, %35 : vector<1x2048xf32>
    %c2047_i32 = arith.constant 2047 : i32
    %37 = tpu.dynamic_rotate %0 by %c2047_i32 dim 1 : vector<1x2048xf32>, i32 -> vector<1x2048xf32>
    %38 = vector.extract_strided_slice %29 {offsets = [0, 0], sizes = [1, 2048], strides = [1, 1]} : vector<32x2048xf32> to vector<1x2048xf32>
    %39 = arith.mulf %37, %38 : vector<1x2048xf32>
    %40 = vector.broadcast %30 : vector<16x1xf32> to vector<16x2048xf32>
    %41 = vector.broadcast %36 : vector<1x2048xf32> to vector<16x2048xf32>
    %42 = arith.mulf %40, %41 : vector<16x2048xf32>
    %43 = vector.broadcast %31 : vector<16x1xf32> to vector<16x2048xf32>
    %44 = vector.broadcast %0 : vector<1x2048xf32> to vector<16x2048xf32>
    %45 = arith.mulf %43, %44 : vector<16x2048xf32>
    %46 = arith.addf %42, %45 : vector<16x2048xf32>
    %47 = vector.broadcast %32 : vector<16x1xf32> to vector<16x2048xf32>
    %48 = vector.broadcast %39 : vector<1x2048xf32> to vector<16x2048xf32>
    %49 = arith.mulf %47, %48 : vector<16x2048xf32>
    %50 = arith.addf %46, %49 : vector<16x2048xf32>
    %51 = vector.broadcast %33 : vector<16x1xf32> to vector<16x2048xf32>
    %52 = arith.addf %50, %51 : vector<16x2048xf32>
    %cst = arith.constant 0.000000e+00 : f32
    %53 = vector.broadcast %cst : f32 to vector<16x2048xf32>
    %54 = arith.maximumf %52, %53 : vector<16x2048xf32>
    %c16 = arith.constant 16 : index
    %c0_12 = arith.constant 0 : index
    %55 = vector.load %arg2[%c16, %c0_12] : memref<72x384xf32, #tpu.memory_space<vmem>>, vector<32x16xf32>
    %c16_13 = arith.constant 16 : index
    %c128_14 = arith.constant 128 : index
    %56 = vector.load %arg2[%c16_13, %c128_14] : memref<72x384xf32, #tpu.memory_space<vmem>>, vector<32x16xf32>
    %c16_15 = arith.constant 16 : index
    %c256_16 = arith.constant 256 : index
    %57 = vector.load %arg2[%c16_15, %c256_16] : memref<72x384xf32, #tpu.memory_space<vmem>>, vector<32x16xf32>
    %c16_17 = arith.constant 16 : index
    %c0_18 = arith.constant 0 : index
    %58 = vector.load %arg3[%c16_17, %c0_18] : memref<72x128xf32, #tpu.memory_space<vmem>>, vector<32x1xf32>
    %c1_i32_19 = arith.constant 1 : i32
    %59 = tpu.dynamic_rotate %54 by %c1_i32_19 dim 1 : vector<16x2048xf32>, i32 -> vector<16x2048xf32>
    %60 = vector.extract_strided_slice %23 {offsets = [0, 0], sizes = [16, 2048], strides = [1, 1]} : vector<32x2048xf32> to vector<16x2048xf32>
    %61 = arith.mulf %59, %60 : vector<16x2048xf32>
    %c2047_i32_20 = arith.constant 2047 : i32
    %62 = tpu.dynamic_rotate %54 by %c2047_i32_20 dim 1 : vector<16x2048xf32>, i32 -> vector<16x2048xf32>
    %63 = vector.extract_strided_slice %29 {offsets = [0, 0], sizes = [16, 2048], strides = [1, 1]} : vector<32x2048xf32> to vector<16x2048xf32>
    %64 = arith.mulf %62, %63 : vector<16x2048xf32>
    %cst_21 = arith.constant dense<0.000000e+00> : vector<32x2048xf32>
    %65 = tpu.matmul %55, %61, %cst_21 {dimension_numbers = #tpu.dot_dimension_numbers<[1], [0], [0], [1], [0, 0, 1, 1], [], []>} : vector<32x16xf32>, vector<16x2048xf32>, vector<32x2048xf32> -> vector<32x2048xf32>
    %cst_22 = arith.constant dense<0.000000e+00> : vector<32x2048xf32>
    %66 = tpu.matmul %56, %54, %cst_22 {dimension_numbers = #tpu.dot_dimension_numbers<[1], [0], [0], [1], [0, 0, 1, 1], [], []>} : vector<32x16xf32>, vector<16x2048xf32>, vector<32x2048xf32> -> vector<32x2048xf32>
    %67 = arith.addf %65, %66 : vector<32x2048xf32>
    %cst_23 = arith.constant dense<0.000000e+00> : vector<32x2048xf32>
    %68 = tpu.matmul %57, %64, %cst_23 {dimension_numbers = #tpu.dot_dimension_numbers<[1], [0], [0], [1], [0, 0, 1, 1], [], []>} : vector<32x16xf32>, vector<16x2048xf32>, vector<32x2048xf32> -> vector<32x2048xf32>
    %69 = arith.addf %67, %68 : vector<32x2048xf32>
    %70 = vector.broadcast %58 : vector<32x1xf32> to vector<32x2048xf32>
    %71 = arith.addf %69, %70 : vector<32x2048xf32>
    %cst_24 = arith.constant 0.000000e+00 : f32
    %72 = vector.broadcast %cst_24 : f32 to vector<32x2048xf32>
    %73 = arith.maximumf %71, %72 : vector<32x2048xf32>
    %c48 = arith.constant 48 : index
    %c0_25 = arith.constant 0 : index
    %74 = vector.load %arg2[%c48, %c0_25] : memref<72x384xf32, #tpu.memory_space<vmem>>, vector<16x32xf32>
    %c48_26 = arith.constant 48 : index
    %c128_27 = arith.constant 128 : index
    %75 = vector.load %arg2[%c48_26, %c128_27] : memref<72x384xf32, #tpu.memory_space<vmem>>, vector<16x32xf32>
    %c48_28 = arith.constant 48 : index
    %c256_29 = arith.constant 256 : index
    %76 = vector.load %arg2[%c48_28, %c256_29] : memref<72x384xf32, #tpu.memory_space<vmem>>, vector<16x32xf32>
    %c48_30 = arith.constant 48 : index
    %c0_31 = arith.constant 0 : index
    %77 = vector.load %arg3[%c48_30, %c0_31] : memref<72x128xf32, #tpu.memory_space<vmem>>, vector<16x1xf32>
    %c1_i32_32 = arith.constant 1 : i32
    %78 = tpu.dynamic_rotate %73 by %c1_i32_32 dim 1 : vector<32x2048xf32>, i32 -> vector<32x2048xf32>
    %79 = arith.mulf %78, %23 : vector<32x2048xf32>
    %c2047_i32_33 = arith.constant 2047 : i32
    %80 = tpu.dynamic_rotate %73 by %c2047_i32_33 dim 1 : vector<32x2048xf32>, i32 -> vector<32x2048xf32>
    %81 = arith.mulf %80, %29 : vector<32x2048xf32>
    %cst_34 = arith.constant dense<0.000000e+00> : vector<16x2048xf32>
    %82 = tpu.matmul %74, %79, %cst_34 {dimension_numbers = #tpu.dot_dimension_numbers<[1], [0], [0], [1], [0, 0, 1, 1], [], []>} : vector<16x32xf32>, vector<32x2048xf32>, vector<16x2048xf32> -> vector<16x2048xf32>
    %cst_35 = arith.constant dense<0.000000e+00> : vector<16x2048xf32>
    %83 = tpu.matmul %75, %73, %cst_35 {dimension_numbers = #tpu.dot_dimension_numbers<[1], [0], [0], [1], [0, 0, 1, 1], [], []>} : vector<16x32xf32>, vector<32x2048xf32>, vector<16x2048xf32> -> vector<16x2048xf32>
    %84 = arith.addf %82, %83 : vector<16x2048xf32>
    %cst_36 = arith.constant dense<0.000000e+00> : vector<16x2048xf32>
    %85 = tpu.matmul %76, %81, %cst_36 {dimension_numbers = #tpu.dot_dimension_numbers<[1], [0], [0], [1], [0, 0, 1, 1], [], []>} : vector<16x32xf32>, vector<32x2048xf32>, vector<16x2048xf32> -> vector<16x2048xf32>
    %86 = arith.addf %84, %85 : vector<16x2048xf32>
    %87 = vector.broadcast %77 : vector<16x1xf32> to vector<16x2048xf32>
    %88 = arith.addf %86, %87 : vector<16x2048xf32>
    %cst_37 = arith.constant 0.000000e+00 : f32
    %89 = vector.broadcast %cst_37 : f32 to vector<16x2048xf32>
    %90 = arith.maximumf %88, %89 : vector<16x2048xf32>
    %c64 = arith.constant 64 : index
    %c0_38 = arith.constant 0 : index
    %91 = vector.load %arg2[%c64, %c0_38] : memref<72x384xf32, #tpu.memory_space<vmem>>, vector<1x16xf32>
    %c64_39 = arith.constant 64 : index
    %c128_40 = arith.constant 128 : index
    %92 = vector.load %arg2[%c64_39, %c128_40] : memref<72x384xf32, #tpu.memory_space<vmem>>, vector<1x16xf32>
    %c64_41 = arith.constant 64 : index
    %c256_42 = arith.constant 256 : index
    %93 = vector.load %arg2[%c64_41, %c256_42] : memref<72x384xf32, #tpu.memory_space<vmem>>, vector<1x16xf32>
    %c64_43 = arith.constant 64 : index
    %c0_44 = arith.constant 0 : index
    %94 = vector.load %arg3[%c64_43, %c0_44] : memref<72x128xf32, #tpu.memory_space<vmem>>, vector<1x1xf32>
    %c1_i32_45 = arith.constant 1 : i32
    %95 = tpu.dynamic_rotate %90 by %c1_i32_45 dim 1 : vector<16x2048xf32>, i32 -> vector<16x2048xf32>
    %96 = vector.extract_strided_slice %23 {offsets = [0, 0], sizes = [16, 2048], strides = [1, 1]} : vector<32x2048xf32> to vector<16x2048xf32>
    %97 = arith.mulf %95, %96 : vector<16x2048xf32>
    %c2047_i32_46 = arith.constant 2047 : i32
    %98 = tpu.dynamic_rotate %90 by %c2047_i32_46 dim 1 : vector<16x2048xf32>, i32 -> vector<16x2048xf32>
    %99 = vector.extract_strided_slice %29 {offsets = [0, 0], sizes = [16, 2048], strides = [1, 1]} : vector<32x2048xf32> to vector<16x2048xf32>
    %100 = arith.mulf %98, %99 : vector<16x2048xf32>
    %cst_47 = arith.constant dense<0.000000e+00> : vector<1x2048xf32>
    %101 = tpu.matmul %91, %97, %cst_47 {dimension_numbers = #tpu.dot_dimension_numbers<[1], [0], [0], [1], [0, 0, 1, 1], [], []>} : vector<1x16xf32>, vector<16x2048xf32>, vector<1x2048xf32> -> vector<1x2048xf32>
    %cst_48 = arith.constant dense<0.000000e+00> : vector<1x2048xf32>
    %102 = tpu.matmul %92, %90, %cst_48 {dimension_numbers = #tpu.dot_dimension_numbers<[1], [0], [0], [1], [0, 0, 1, 1], [], []>} : vector<1x16xf32>, vector<16x2048xf32>, vector<1x2048xf32> -> vector<1x2048xf32>
    %103 = arith.addf %101, %102 : vector<1x2048xf32>
    %cst_49 = arith.constant dense<0.000000e+00> : vector<1x2048xf32>
    %104 = tpu.matmul %93, %100, %cst_49 {dimension_numbers = #tpu.dot_dimension_numbers<[1], [0], [0], [1], [0, 0, 1, 1], [], []>} : vector<1x16xf32>, vector<16x2048xf32>, vector<1x2048xf32> -> vector<1x2048xf32>
    %105 = arith.addf %103, %104 : vector<1x2048xf32>
    %106 = vector.broadcast %94 : vector<1x1xf32> to vector<1x2048xf32>
    %107 = arith.addf %105, %106 : vector<1x2048xf32>
    %c0_50 = arith.constant 0 : index
    %c0_51 = arith.constant 0 : index
    %108 = vector.load %arg4[%c0_50, %c0_51] : memref<1x2048xf32, #tpu.memory_space<vmem>>, vector<1x2048xf32>
    tpu.vector_store %arg4[%c0_50, %c0_51], %107 {strides = array<i32>} : memref<1x2048xf32, #tpu.memory_space<vmem>>, vector<1x2048xf32>,
    return
  }
  func.func @transform_0(%arg0: i32) -> (i32, i32) {
    %c0_i32 = arith.constant 0 : i32
    %c0_i32_0 = arith.constant 0 : i32
    return %arg0, %c0_i32 : i32, i32
  }
  func.func @transform_1(%arg0: i32) -> (i32, i32) {
    %c0_i32 = arith.constant 0 : i32
    %c0_i32_0 = arith.constant 0 : i32
    %c0_i32_1 = arith.constant 0 : i32
    return %c0_i32, %c0_i32_0 : i32, i32
  }
  func.func @transform_2(%arg0: i32) -> (i32, i32) {
    %c0_i32 = arith.constant 0 : i32
    %c0_i32_0 = arith.constant 0 : i32
    %c0_i32_1 = arith.constant 0 : i32
    return %c0_i32, %c0_i32_0 : i32, i32
  }
  func.func @transform_3(%arg0: i32) -> (i32, i32) {
    %c0_i32 = arith.constant 0 : i32
    %c0_i32_0 = arith.constant 0 : i32
    return %arg0, %c0_i32 : i32, i32
  }
}

</mosaic_0001>

<bundles_post_ra>
// kernel: tpu_custom_call.1
= control target key start
LH: loop header
LB: loop body
LE: loop exit
PB: predicated region body
PF: predicated region fallthrough
CT: control target
= control target key end

     0   :  { %8 = vsyncpa [#allocation3], 0  ;;  %s10959_s0 = inlined_call_operand.hbm [shape: f32[1,2048], index: 0, kind: input, shape index: {}]   ;;  %s10960_s1 = inlined_call_operand.hbm [shape: f32[72,384], index: 1, kind: input, shape index: {}]   ;;  %s10961_s2 = inlined_call_operand.hbm [shape: f32[72,128], index: 2, kind: input, shape index: {}]   ;;  %s10962_s3 = inlined_call_operand.hbm [shape: f32[1,2048], index: 3, kind: output, shape index: {}]  }
   0x1   :  { %9 = vsyncpa [#allocation6], 0  ;;  %s26_s14 = sshll.u32 %s10960_s1, 4  ;;  %s27_s14 = int_to_ptr.hbm [resolvable:$true] %s26_s14 }
   0x2   :  { %10 = vsyncpa [#allocation4], 0  ;;  %s6322_s15 = smov [#allocation5]   ;;  %s16_s19 = sshll.u32 %s10959_s0, 4  ;;  %s17_s19 = int_to_ptr.hbm [resolvable:$true] %s16_s19 }
   0x3   :  { %s28_s16 = sshll.u32 %s6322_s15, 4  ;;  %s6323_s20 = smov 384   ;;  %s29_s16 = int_to_ptr.vmem [resolvable:$true] %s28_s16 }
   0x4   :  { %s6324_s21 = smov 24   ;;  %s6325_s22 = smov [#allocation2]  }
   0x5   :  { %34 = dma.hbm_to_vmem [thread:$0]  %s27_s14, 3456, %s29_s16, [#allocation6], %s6323_s20, %s6323_s20, %s6324_s21  }
   0x6   :  { %s18_s23 = sshll.u32 %s6325_s22, 4  ;;  %s39_s26 = sshll.u32 %s10961_s2, 4  ;;  %s19_s23 = int_to_ptr.vmem [resolvable:$true] %s18_s23  ;;  %s40_s26 = int_to_ptr.hbm [resolvable:$true] %s39_s26 }
   0x7   :  { %21 = dma.hbm_to_vmem [thread:$0]  %s17_s19, 256, %s19_s23, [#allocation3]  }
   0x8   :  { %s6326_s1 = smov [#allocation7]   ;;  %s6327_s28 = smov 128  }
   0x9   :  { %s41_s27 = sshll.u32 %s6326_s1, 4  ;;  %s6328_s29 = smov 8   ;;  %s42_s27 = int_to_ptr.vmem [resolvable:$true] %s41_s27 }
   0xa   :  { %47 = dma.hbm_to_vmem [thread:$0]  %s40_s26, 1152, %s42_s27, [#allocation6], %s6327_s28, %s6327_s28, %s6328_s29  }
   0xb   :  { %6316 = dma.done.wait [#allocation3], 256  }
   0xc   :  { %6317 = vsyncadd [#allocation3], 4294967040 }
   0xd   :  { %6318 = dma.done.wait [#allocation6], 4608  }
   0xe   :  { %6319 = vsyncadd [#allocation6], 4294962688  ;;  %v6329_v0 = vmov 0   ;;  %v368_v1 = vld [vmem:[#allocation5 + $0x18] sm:$0xff]  ;;  %v60_v2 = vld [vmem:[#allocation2] sm:$0xff]  ;;  %s6330_s0 = smov 127   ;;  %v62_v30 = vlaneseq }
   0xf   :  { %6216 = vset.pattern.permute.xlu2 %v6329_v0  ;;  %6218 = vset.pattern.permute.xlu1 %v6329_v0  ;;  %v6363_v3 = vperm.slane %v60_v2, 3  ;;  %v6365_v4 = vperm.slane %v60_v2, 2  ;;  %s6331_s2 = smov 1   ;;  %v370_v5 = vld [vmem:[#allocation5 + $0x20] sm:$0xff]  ;;  %v6371_v6 = vperm.slane %v60_v2, 4  ;;  %v372_v7 = vld [vmem:[#allocation5 + $0x28] sm:$0xff] }
  0x10   :  { %6217 = vset.pattern.permute.xlu0 %v6329_v0  ;;  %546 = vperm.xlu2 %6216, %v368_v1   ;;  %v369_v8 = vld [vmem:[#allocation5 + $0x8] sm:$0xff]  ;;  %v367_v9 = vld [vmem:[#allocation5] sm:$0xff]  ;;  %v371_v11 = vld [vmem:[#allocation5 + $0x10] sm:$0xff]  ;;  %v6377_v13 = vperm.slane %v60_v2, 1  ;;  %v6379_v14 = vperm.slane %v60_v2, 0  ;;  %v6387_v15 = vperm.slane %v60_v2, 7 }
  0x11   :  { %480 = vrot.lane.b32.xlu1 %v6363_v3, %s6330_s0  ;;  %413 = vrot.lane.b32.xlu0 %v6365_v4, %s6331_s2  ;;  %v374_v10 = vld [vmem:[#allocation7 + $0x8] sm:$0xff]  ;;  %v373_v12 = vld [vmem:[#allocation7] sm:$0xff]  ;;  %v6389_v16 = vperm.slane %v60_v2, 6  ;;  %v6407_v20 = vperm.slane %v60_v2, 5  ;;  %v6465_v31 = vand.u32 127, %v62_v30  ;;  %v10971_v39 = vmov 0.0  }
  0x12   :  { %v61_v17 = vld [vmem:[#allocation2 + $0x8] sm:$0xff]  ;;  %vm1107_vm11 = vcmask 130048   ;;  %s6333_s30 = smov [#allocation8]   ;;  %s5825_s7 = sshll.u32 %s10962_s3, 4  ;;  %s5826_s7 = int_to_ptr.hbm [resolvable:$true] %s5825_s7 }
  0x13   :  { %v6397_v18 = vperm.slane %v61_v17, 0  ;;  %v6399_v19 = vperm.slane %v61_v17, 7  ;;  %v6415_v21 = vperm.slane %v61_v17, 2  ;;  %v6417_v22 = vperm.slane %v61_v17, 3  ;;  %11140 = vst [vmem:[#allocation12_spill] sm:$0xff] %v6465_v31  ;;  %s5823_s4 = sshll.u32 %s6333_s30, 4  ;;  %s5824_s4 = int_to_ptr.vmem [resolvable:$true] %s5823_s4 }
  0x14   :  { %v6425_v23 = vperm.slane %v61_v17, 4  ;;  %v6433_v24 = vperm.slane %v61_v17, 1  ;;  %v6441_v25 = vperm.slane %v61_v17, 6  ;;  %v6451_v27 = vperm.slane %v61_v17, 5 }
  0x15   :  { %v66_v32 = vadd.s32 384, %v6465_v31  ;;  %v65_v37 = vadd.s32 256, %v6465_v31  ;;  %vm441_vm2 = vcmp.lt.s32.totalorder %v6465_v31, 1  ;;  %vm319_vm3 = vcmp.lt.s32.totalorder %v6465_v31, 127 }
  0x16   :  { %v64_v49 = vadd.s32 128, %v6465_v31  ;;  %v6508_v60 = vadd.s32 768, %v6465_v31  ;;  %v70_v61 = vadd.s32 896, %v6465_v31  ;;  %vm271_vm12 = vcmp.ge.s32.totalorder %v6465_v31, 1 }
  0x17   :  { %v104_v36 = vand.u32 127, %v66_v32  ;;  %v97_v46 = vand.u32 127, %v65_v37 }
  0x18   :  { %604 = vperm.xlu2 %6216, %v370_v5   ;;  %v90_v55 = vand.u32 127, %v64_v49  ;;  %v10963_v17 = vand.u32 127, %v6508_v60  ;;  %v132_v30 = vand.u32 127, %v70_v61 }
  0x19   :  { %482 = vrot.lane.b32.xlu1 %v6371_v6, %s6330_s0  ;;  %415 = vrot.lane.b32.xlu0 %v6363_v3, %s6331_s2  ;;  %vm322_vm0 = vcmp.lt.s32.totalorder %v104_v36, 127  ;;  %vm274_vm1 = vcmp.ge.s32.totalorder %v104_v36, 1  ;;  %vm321_vm4 = vcmp.lt.s32.totalorder %v97_v46, 127  ;;  %vm273_vm5 = vcmp.ge.s32.totalorder %v97_v46, 1 }
  0x1a   :  { %v6477_v40 = vsel %vm322_vm0, 1.0, %v10971_v39  ;;  %v6480_v41 = vsel %vm274_vm1, 1.0, %v10971_v39  ;;  %v6512_v62 = vsel %vm321_vm4, 1.0, %v10971_v39  ;;  %vm6529_vm6 = vcmp.ge.s32.totalorder %v90_v55, 1 }
  0x1b   :  { %11141 = vst [vmem:[#allocation13_spill] sm:$0xff] %v6477_v40  ;;  %v6551_v32 = vsel %vm273_vm5, 1.0, %v10971_v39  ;;  %vm277_vm7 = vcmp.ge.s32.totalorder %v10963_v17, 1  ;;  %vm278_vm8 = vcmp.ge.s32.totalorder %v132_v30, 1  ;;  %vm320_vm9 = vcmp.lt.s32.totalorder %v90_v55, 127 }
  0x1c   :  { %11142 = vst [vmem:[#allocation14_spill] sm:$0xff] %v6480_v41  ;;  %vm326_vm10 = vcmp.lt.s32.totalorder %v132_v30, 127  ;;  %v6617_v55 = vsel %vm277_vm7, 1.0, %v10971_v39  ;;  %v6623_v30 = vsel %vm320_vm9, 1.0, %v10971_v39 }
  0x1d   :  { %11144 = vst [vmem:[#allocation16_spill] sm:$0xff] %v6512_v62 }
  0x1e   :  { %11147 = vst [vmem:[#allocation17_spill] sm:$0xff] %v6551_v32 }
  0x1f   :  { %11158 = vst [vmem:[#allocation28_spill] sm:$0xff] %v6617_v55 }
  0x20   :  { %678 = vperm.xlu2 %6216, %v372_v7   ;;  %v6610_v7 = vadd.s32 1280, %v6465_v31  ;;  %11160 = vst [vmem:[#allocation30_spill] sm:$0xff] %v6623_v30 }
  0x21   :  { %599 = vperm.xlu1 %6218, %v369_v8   ;;  %541 = vperm.xlu0 %6217, %v367_v9  }
  0x28   :  { %768 = vperm.xlu2 %6216, %v374_v10  }
  0x29   :  { %673 = vperm.xlu1 %6218, %v371_v11   ;;  %763 = vperm.xlu0 %6217, %v373_v12  }
  0x30   :  { %478 = vrot.lane.b32.xlu2 %v6365_v4, %s6330_s0 }
  0x31   :  { %411 = vrot.lane.b32.xlu1 %v6377_v13, %s6331_s2  ;;  %409 = vrot.lane.b32.xlu0 %v6379_v14, %s6331_s2 }
  0x38   :  { %423 = vrot.lane.b32.xlu2 %v6387_v15, %s6331_s2 }
  0x39   :  { %421 = vrot.lane.b32.xlu1 %v6389_v16, %s6331_s2  ;;  %476 = vrot.lane.b32.xlu0 %v6377_v13, %s6330_s0 }
  0x40   :  { %490 = vrot.lane.b32.xlu2 %v6397_v18, %s6330_s0 }
  0x41   :  { %488 = vrot.lane.b32.xlu1 %v6387_v15, %s6330_s0  ;;  %439 = vrot.lane.b32.xlu0 %v6399_v19, %s6331_s2 }
  0x48   :  { %419 = vrot.lane.b32.xlu2 %v6407_v20, %s6331_s2 }
  0x49   :  { %474 = vrot.lane.b32.xlu1 %v6379_v14, %s6330_s0  ;;  %486 = vrot.lane.b32.xlu0 %v6389_v16, %s6330_s0 }
  0x50   :  { %429 = vrot.lane.b32.xlu2 %v6415_v21, %s6331_s2 }
  0x51   :  { %417 = vrot.lane.b32.xlu1 %v6371_v6, %s6331_s2  ;;  %431 = vrot.lane.b32.xlu0 %v6417_v22, %s6331_s2 }
  0x58   :  { %496 = vrot.lane.b32.xlu2 %v6417_v22, %s6330_s0 }
  0x59   :  { %484 = vrot.lane.b32.xlu1 %v6407_v20, %s6330_s0  ;;  %498 = vrot.lane.b32.xlu0 %v6425_v23, %s6330_s0 }
  0x60   :  { %494 = vrot.lane.b32.xlu2 %v6415_v21, %s6330_s0 }
  0x61   :  { %427 = vrot.lane.b32.xlu1 %v6433_v24, %s6331_s2  ;;  %425 = vrot.lane.b32.xlu0 %v6397_v18, %s6331_s2 }
  0x68   :  { %492 = vrot.lane.b32.xlu2 %v6433_v24, %s6330_s0 }
  0x69   :  { %437 = vrot.lane.b32.xlu1 %v6441_v25, %s6331_s2  ;;  %504 = vrot.lane.b32.xlu0 %v6399_v19, %s6330_s0 }
  0x6a   :  { %v6445_v26 = vpop.permute.xlu2 %546 }
  0x70   :  { %502 = vrot.lane.b32.xlu2 %v6441_v25, %s6330_s0 }
  0x71   :  { %435 = vrot.lane.b32.xlu1 %v6451_v27, %s6331_s2  ;;  %433 = vrot.lane.b32.xlu0 %v6425_v23, %s6331_s2 }
  0x72   :  { %v6455_v28 = vpop.permute.xlu2 %604 }
  0x73   :  { %v626_v52 = vmul.f32 %v6455_v28, %v6363_v3  ;;  %v6519_v0 = vmul.f32 %v6455_v28, %v6365_v4  ;;  %v6523_v2 = vmul.f32 %v6455_v28, %v6377_v13  ;;  %v6527_v5 = vmul.f32 %v6455_v28, %v6387_v15 }
  0x74   :  { %v6535_v8 = vmul.f32 %v6455_v28, %v6417_v22  ;;  %v6539_v9 = vmul.f32 %v6455_v28, %v6389_v16  ;;  %v6543_v10 = vmul.f32 %v6455_v28, %v6379_v14  ;;  %v6558_v37 = vmul.f32 %v6455_v28, %v6415_v21 }
  0x75   :  { %v6566_v46 = vmul.f32 %v6455_v28, %v6397_v18  ;;  %v6583_v49 = vmul.f32 %v6455_v28, %v6371_v6 }
  0x76   :  { %11148 = vst [vmem:[#allocation18_spill] sm:$0xff] %v6558_v37 }
  0x77   :  { %11150 = vst [vmem:[#allocation20_spill] sm:$0xff] %v6566_v46 }
  0x78   :  { %11153 = vst [vmem:[#allocation23_spill] sm:$0xff] %v6583_v49 }
  0x79   :  { %500 = vrot.lane.b32.xlu1 %v6451_v27, %s6330_s0 }
  0x7a   :  { %v6461_v29 = vpop.permute.xlu2 %678 }
  0x82   :  { %v6468_v33 = vpop.permute.xlu2 %768 }
  0x83   :  { %v481_v34 = vpop.permute.xlu1 %480  ;;  %v6470_v35 = vpop.permute.xlu0 %413 }
  0x8a   :  { %v6473_v38 = vpop.permute.xlu2 %478 }
  0x8b   :  { %v6483_v42 = vpop.permute.xlu1 %482  ;;  %v6485_v43 = vpop.permute.xlu0 %415  ;;  %v519_v63 = vsel %vm319_vm3, %v6473_v38, %v481_v34 }
  0x8c   :  { %v518_v44 = vsel %vm319_vm3, %v481_v34, %v6483_v42  ;;  %v454_v45 = vsel %vm441_vm2, %v6470_v35, %v6485_v43  ;;  %v6546_v11 = vmul.f32 %v6512_v62, %v519_v63  ;;  %v6641_v62 = vsel %vm271_vm12, 1.0, %v10971_v39 }
  0x8d   :  { %v526_v47 = vmul.f32 %v6477_v40, %v518_v44  ;;  %v461_v48 = vmul.f32 %v6480_v41, %v454_v45  ;;  %11162 = vst [vmem:[#allocation32_spill] sm:$0xff] %v6641_v62 }
  0x8f   :  { %v684_v50 = vperm.slane %v526_v47, 0  ;;  %v552_v51 = vperm.slane %v461_v48, 0  ;;  %v6570_v47 = vmul.f32 %v6455_v28, %v6433_v24  ;;  %v6574_v48 = vmul.f32 %v6455_v28, %v6407_v20 }
  0x91   :  { %v584_v53 = vmul.f32 %v552_v51, %v6445_v26  ;;  %v716_v56 = vmul.f32 %v684_v50, %v6461_v29  ;;  %11151 = vst [vmem:[#allocation21_spill] sm:$0xff] %v6570_v47 }
  0x92   :  { %v6500_v54 = vpop.permute.xlu2 %423 }
  0x93   :  { %11143 = vst [vmem:[#allocation15_spill] sm:$0xff] %v6500_v54  ;;  %v6503_v57 = vpop.permute.xlu1 %599  ;;  %v6505_v58 = vpop.permute.xlu0 %541  ;;  %v658_v59 = vadd.f32 %v626_v52, %v584_v53  ;;  %v6591_v52 = vmul.f32 %v6455_v28, %v6441_v25  ;;  %v10968_v53 = vperm.slane %v6546_v11, 0 }
  0x94   :  { %v568_v34 = vmul.f32 %v552_v51, %v6505_v58  ;;  %v610_v36 = vmul.f32 %v6503_v57, %v6363_v3  ;;  %v6579_v3 = vsel %vm6529_vm6, 1.0, %v10971_v39  ;;  %v6587_v51 = vmul.f32 %v6455_v28, %v6399_v19 }
  0x95   :  { %v748_v1 = vadd.f32 %v716_v56, %v658_v59  ;;  %11152 = vst [vmem:[#allocation22_spill] sm:$0xff] %v6579_v3  ;;  %v6645_v40 = vmul.f32 %v6503_v57, %v6387_v15  ;;  %v6664_v15 = vmul.f32 %v6503_v57, %v6417_v22  ;;  %v6685_v22 = vadd.s32 1408, %v6465_v31 }
  0x96   :  { %11154 = vst [vmem:[#allocation24_spill] sm:$0xff] %v6587_v51  ;;  %v642_v61 = vadd.f32 %v610_v36, %v568_v34  ;;  %v6628_v34 = vmul.f32 %v10968_v53, %v6461_v29  ;;  %v6631_v36 = vsel %vm326_vm10, 1.0, %v10971_v39  ;;  %v6649_v53 = vmul.f32 %v6503_v57, %v6379_v14  ;;  %v6668_v14 = vld [vmem:[#allocation5 + $0x38] sm:$0xff] }
  0x97   :  { %v790_v12 = vadd.f32 %v6468_v33, %v748_v1  ;;  %11155 = vst [vmem:[#allocation25_spill] sm:$0xff] %v6591_v52  ;;  %v6606_v1 = vmul.f32 %v6455_v28, %v6425_v23  ;;  %v6693_v52 = vmul.f32 %v6503_v57, %v6397_v18  ;;  %v6704_v47 = vmul.f32 %v6503_v57, %v6433_v24 }
  0x98   :  { %11161 = vst [vmem:[#allocation31_spill] sm:$0xff] %v6631_v36  ;;  %v11171_v24 = vand.u32 127, %v6610_v7  ;;  %v11188_v37 = vand.u32 127, %v6685_v22 }
  0x99   :  { %v6562_v45 = vmax.f32 %v790_v12, 0.0  ;;  %11156 = vst [vmem:[#allocation26_spill] sm:$0xff] %v6606_v1  ;;  %v6614_v12 = vmul.f32 %v6455_v28, %v6451_v27  ;;  %v609_v28 = vmul.f32 %v6503_v57, %v6365_v4  ;;  %v6674_v4 = vadd.s32 1152, %v6465_v31 }
  0x9a   :  { %v6560_v44 = vpop.permute.xlu2 %490  ;;  %11164 = vst [vmem:[#allocation34_spill] sm:$0xff] %v6664_v15  ;;  %v6682_v1 = vadd.s32 640, %v6465_v31  ;;  %vm329_vm13 = vcmp.lt.s32.totalorder %v11171_v24, 127  ;;  %v6736_v24 = vmul.f32 %v6503_v57, %v6451_v27  ;;  %v6754_v27 = vld [vmem:[#allocation5 + $0x50] sm:$0xff]  ;;  %vm6784_vm5 = vcmp.ge.s32.totalorder %v11188_v37, 1 }
  0x9b   :  { %11149 = vst [vmem:[#allocation19_spill] sm:$0xff] %v6562_v45  ;;  %v6594_v56 = vpop.permute.xlu1 %673  ;;  %1221 = vmatpush.msra.mxu3 %v6562_v45  ;;  %v6597_v59 = vpop.permute.xlu0 %763  ;;  %865 = vrot.lane.b32.xlu0 %v6562_v45, %s6331_s2  ;;  %v6671_v45 = vadd.s32 1024, %v6465_v31 }
  0x9c   :  { %v700_v63 = vmul.f32 %v684_v50, %v6594_v56  ;;  %11157 = vst [vmem:[#allocation27_spill] sm:$0xff] %v6614_v12  ;;  %v6620_v50 = vsel %vm278_vm8, 1.0, %v10971_v39 }
  0x9d   :  { %11159 = vst [vmem:[#allocation29_spill] sm:$0xff] %v6620_v50 }
  0x9e   :  { %v732_v17 = vadd.f32 %v700_v63, %v642_v61  ;;  %v6637_v61 = vmul.f32 %v6503_v57, %v6377_v13  ;;  %v6656_v13 = vmul.f32 %v6503_v57, %v6389_v16  ;;  %v6677_v16 = vadd.s32 512, %v6465_v31  ;;  %11166 = vst [vmem:[#allocation36_spill] sm:$0xff] %v6693_v52 }
  0x9f   :  { %11167 = vst [vmem:[#allocation37_spill] sm:$0xff] %v6704_v47 }
  0xa0   :  { %v774_v63 = vadd.f32 %v6597_v59, %v732_v17  ;;  %v6660_v17 = vmul.f32 %v6503_v57, %v6407_v20  ;;  %11174 = vst [vmem:[#allocation41_spill] sm:$0xff] %v6736_v24 }
  0xa2   :  { %v6651_v41 = vpop.permute.xlu2 %419  ;;  %11163 = vst [vmem:[#allocation33_spill] sm:$0xff] %v6660_v17  ;;  %v6666_v39 = vmax.f32 %v774_v63, 0.0  ;;  %v6689_v63 = vmul.f32 %v6503_v57, %v6371_v6  ;;  %v6708_v6 = vmul.f32 %v6503_v57, %v6415_v21  ;;  %v10978_v21 = vand.u32 127, %v6671_v45 }
  0xa3   :  { %v412_v12 = vpop.permute.xlu1 %411  ;;  %v6679_v20 = vpop.permute.xlu0 %409 }
  0xa4   :  { %11165 = vst [vmem:[#allocation35_spill] sm:$0xff] %v6689_v63  ;;  %v455_v51 = vsel %vm441_vm2, %v412_v12, %v6470_v35  ;;  %v456_v46 = vsel %vm441_vm2, %v6679_v20, %v412_v12  ;;  %1222 = vmatpush.msra.mxu3 %v6666_v39  ;;  %v6716_v35 = vmul.f32 %v6503_v57, %v6399_v19  ;;  %v118_v19 = vand.u32 127, %v6682_v1 }
  0xa5   :  { %11168 = vst [vmem:[#allocation38_spill] sm:$0xff] %v6708_v6  ;;  %v460_v18 = vmul.f32 %v6551_v32, %v455_v51  ;;  %v459_v52 = vmul.f32 %v6579_v3, %v456_v46  ;;  %5880 = vmatmul.msk.f32.vlgmr.msra.gmra.mxu3 %vm1107_vm11, %v6668_v14  ;;  %v6720_v12 = vmul.f32 %v6503_v57, %v6441_v25  ;;  %v10979_v51 = vand.u32 127, %v6674_v4 }
  0xa6   :  { %11169 = vst [vmem:[#allocation39_spill] sm:$0xff] %v6716_v35  ;;  %v111_v46 = vand.u32 127, %v6677_v16  ;;  %v11172_v3 = vand.u32 127, %v6508_v60  ;;  %v11173_v25 = vperm.slane %v6546_v11, 0  ;;  %v6740_v16 = vmul.f32 %v6503_v57, %v6425_v23 }
  0xa7   :  { %11170 = vst [vmem:[#allocation40_spill] sm:$0xff] %v6720_v12  ;;  %v551_v32 = vperm.slane %v460_v18, 0  ;;  %v550_v6 = vperm.slane %v459_v52, 0  ;;  %v11176_v18 = vmov 0.0   ;;  %vm6761_vm15 = vcmp.lt.s32.totalorder %v10978_v21, 127 }
  0xa8   :  { %vm325_vm14 = vcmp.lt.s32.totalorder %v11172_v3, 127  ;;  %v699_v12 = vmul.f32 %v11173_v25, %v6594_v56  ;;  %11175 = vst [vmem:[#allocation42_spill] sm:$0xff] %v6740_v16  ;;  %v6747_v52 = vsel %vm329_vm13, 1.0, %v11176_v18  ;;  %v6752_v11 = vsel %vm319_vm3, 1.0, %v11176_v18 }
  0xa9   :  { %v567_v60 = vmul.f32 %v551_v32, %v6505_v58  ;;  %v583_v3 = vmul.f32 %v551_v32, %v6445_v26  ;;  %11177 = vst [vmem:[#allocation43_spill] sm:$0xff] %v6747_v52  ;;  %v6757_v25 = vsel %vm325_vm14, 1.0, %v11176_v18  ;;  %vm6767_vm0 = vcmp.lt.s32.totalorder %v10979_v51, 127 }
  0xaa   :  { %v6744_v1 = vpop.permute.xlu2 %429  ;;  %11178 = vst [vmem:[#allocation44_spill] sm:$0xff] %v6752_v11  ;;  %vm6771_vm1 = vcmp.ge.s32.totalorder %v111_v46, 1  ;;  %vm6778_vm4 = vcmp.ge.s32.totalorder %v118_v19, 1  ;;  %v582_v63 = vmul.f32 %v550_v6, %v6445_v26  ;;  %v566_v17 = vmul.f32 %v550_v6, %v6505_v58 }
  0xab   :  { %11179 = vst [vmem:[#allocation45_spill] sm:$0xff] %v6757_v25  ;;  %v422_v35 = vpop.permute.xlu1 %421  ;;  %v6775_v16 = vpop.permute.xlu0 %476  ;;  %v657_v24 = vadd.f32 %v6519_v0, %v583_v3  ;;  %v641_v47 = vadd.f32 %v609_v28, %v567_v60  ;;  %v6826_v6 = vsel %vm6778_vm4, 1.0, %v11176_v18  ;;  %vm6838_vm6 = vcmp.lt.s32.totalorder %v111_v46, 127 }
  0xac   :  { %v450_v15 = vsel %vm441_vm2, %v422_v35, %v6500_v54  ;;  %v451_v0 = vsel %vm441_vm2, %v6651_v41, %v422_v35  ;;  %v520_v28 = vsel %vm319_vm3, %v6775_v16, %v6473_v38  ;;  %v6809_v35 = vsel %vm6761_vm15, 1.0, %v11176_v18  ;;  %11194 = vst [vmem:[#allocation49_spill] sm:$0xff] %v6826_v6 }
  0xad   :  { %v464_v37 = vmul.f32 %v6617_v55, %v451_v0  ;;  %v465_v60 = vmul.f32 %v6620_v50, %v450_v15  ;;  %v524_v3 = vmul.f32 %v6623_v30, %v520_v28  ;;  %5881 = vmatmul.msk.f32.gmra.mxu3 %vm1107_vm11, %v6754_v27  ;;  %v747_v54 = vadd.f32 %v6628_v34, %v657_v24 }
  0xae   :  { %v731_v49 = vadd.f32 %v699_v12, %v641_v47  ;;  %11191 = vst [vmem:[#allocation46_spill] sm:$0xff] %v6809_v35  ;;  %v6814_v38 = vsel %vm6767_vm0, 1.0, %v11176_v18  ;;  %v6821_v47 = vsel %vm6771_vm1, 1.0, %v11176_v18  ;;  %v6831_v12 = vsel %vm6784_vm5, 1.0, %v11176_v18 }
  0xaf   :  { %11192 = vst [vmem:[#allocation47_spill] sm:$0xff] %v6814_v38  ;;  %v555_v15 = vperm.slane %v464_v37, 0  ;;  %v556_v0 = vperm.slane %v465_v60, 0  ;;  %v682_v28 = vperm.slane %v524_v3, 0  ;;  %v789_v30 = vadd.f32 %v6468_v33, %v747_v54  ;;  %v6848_v60 = vld [vmem:[#allocation5 + $0x68] sm:$0xff] }
  0xb0   :  { %v773_v34 = vadd.f32 %v6597_v59, %v731_v49  ;;  %11193 = vst [vmem:[#allocation48_spill] sm:$0xff] %v6821_v47  ;;  %v656_v23 = vadd.f32 %v6523_v2, %v582_v63  ;;  %v640_v63 = vadd.f32 %v6637_v61, %v566_v17  ;;  %vm6855_vm7 = vcmp.lt.s32.totalorder %v118_v19, 127 }
  0xb1   :  { %11195 = vst [vmem:[#allocation50_spill] sm:$0xff] %v6831_v12  ;;  %v572_v24 = vmul.f32 %v556_v0, %v6505_v58  ;;  %v588_v54 = vmul.f32 %v556_v0, %v6445_v26  ;;  %v698_v21 = vmul.f32 %v682_v28, %v6594_v56  ;;  %v714_v32 = vmul.f32 %v682_v28, %v6461_v29 }
  0xb2   :  { %v6835_v49 = vpop.permute.xlu2 %496  ;;  %v6844_v37 = vmax.f32 %v789_v30, 0.0  ;;  %v6846_v51 = vmax.f32 %v773_v34, 0.0  ;;  %v571_v3 = vmul.f32 %v555_v15, %v6505_v58  ;;  %v587_v0 = vmul.f32 %v555_v15, %v6445_v26 }
  0xb3   :  { %v489_v55 = vpop.permute.xlu1 %488  ;;  %v6852_v2 = vpop.permute.xlu0 %439  ;;  %v746_v28 = vadd.f32 %v714_v32, %v656_v23  ;;  %v6872_v61 = vsel %vm6838_vm6, 1.0, %v11176_v18  ;;  %v730_v34 = vadd.f32 %v698_v21, %v640_v63  ;;  %v11201_v50 = vand.u32 127, %v6685_v22 }
  0xb4   :  { %861 = vrot.lane.b32.xlu2 %v6844_v37, %s6331_s2  ;;  %1192 = vmatpush.msra.mxu2 %v6844_v37  ;;  %v514_v30 = vsel %vm319_vm3, %v489_v55, %v6560_v44  ;;  %v457_v15 = vsel %vm441_vm2, %v6852_v2, %v6679_v20  ;;  %11200 = vst [vmem:[#allocation51_spill] sm:$0xff] %v6872_v61  ;;  %v6889_v32 = vsel %vm6855_vm7, 1.0, %v11176_v18  ;;  %v11203_v22 = vand.u32 127, %v6610_v7 }
  0xb5   :  { %v530_v17 = vmul.f32 %v6631_v36, %v514_v30  ;;  %859 = vrot.lane.b32.xlu1 %v6846_v51, %s6331_s2  ;;  %v458_v19 = vmul.f32 %v6641_v62, %v457_v15  ;;  %5882 = vmatmul.msk.f32.gmra.mxu3 %vm1107_vm11, %v6848_v60  ;;  %vm330_vm8 = vcmp.lt.s32.totalorder %v11201_v50, 127  ;;  %v788_v20 = vadd.f32 %v6468_v33, %v746_v28 }
  0xb6   :  { %1193 = vmatpush.msra.mxu2 %v6846_v51  ;;  %v662_v23 = vadd.f32 %v6527_v5, %v588_v54  ;;  %v646_v57 = vadd.f32 %v6645_v40, %v572_v24  ;;  %11202 = vst [vmem:[#allocation52_spill] sm:$0xff] %v6889_v32  ;;  %v772_v50 = vadd.f32 %v6597_v59, %v730_v34  ;;  %vm281_vm9 = vcmp.ge.s32.totalorder %v11203_v22, 1 }
  0xb7   :  { %v688_v30 = vperm.slane %v530_v17, 0  ;;  %v549_v15 = vperm.slane %v458_v19, 0  ;;  %5876 = vmatmul.msk.f32.vlgmr.msra.gmra.mxu2 %vm1107_vm11, %v6668_v14  ;;  %v6896_v21 = vmax.f32 %v788_v20, 0.0  ;;  %v661_v5 = vadd.f32 %v6539_v9, %v587_v0 }
  0xb8   :  { %v6900_v40 = vadd.f32 %v6656_v13, %v571_v3  ;;  %v6903_v24 = vsel %vm330_vm8, 1.0, %v11176_v18  ;;  %v6915_v9 = vmax.f32 %v772_v50, 0.0  ;;  %v6918_v13 = vsel %vm281_vm9, 1.0, %v11176_v18 }
  0xb9   :  { %11204 = vst [vmem:[#allocation53_spill] sm:$0xff] %v6903_v24  ;;  %v704_v54 = vmul.f32 %v688_v30, %v6594_v56  ;;  %v720_v63 = vmul.f32 %v688_v30, %v6461_v29  ;;  %v565_v46 = vmul.f32 %v549_v15, %v6505_v58  ;;  %v581_v28 = vmul.f32 %v549_v15, %v6445_v26  ;;  %v6931_v15 = vld [vmem:[#allocation5 + $0x80] sm:$0xff] }
  0xba   :  { %v495_v7 = vpop.permute.xlu2 %494  ;;  %857 = vrot.lane.b32.xlu0 %v6896_v21, %s6331_s2  ;;  %1163 = vmatpush.msra.mxu1 %v6896_v21  ;;  %11205 = vst [vmem:[#allocation54_spill] sm:$0xff] %v6918_v13  ;;  %v11206_v3 = vand.u32 127, %v6671_v45  ;;  %vm3268_vm7 = vcmask 261120   ;;  %vm5801_vm8 = vcmask 1046534   ;;  %vm5799_vm9 = vcmask 1044484  }
  0xbb   :  { %v511_v17 = vsel %vm319_vm3, %v495_v7, %v6835_v49  ;;  %v6927_v34 = vpop.permute.xlu1 %474  ;;  %v6929_v20 = vpop.permute.xlu0 %486  ;;  %v752_v30 = vadd.f32 %v720_v63, %v662_v23  ;;  %v736_v50 = vadd.f32 %v704_v54, %v646_v57  ;;  %v655_v22 = vadd.f32 %v6543_v10, %v581_v28 }
  0xbc   :  { %vm6922_vm10 = vcmp.ge.s32.totalorder %v11206_v3, 1  ;;  %v533_v19 = vmul.f32 %v6747_v52, %v511_v17  ;;  %863 = vrot.lane.b32.xlu2 %v6666_v39, %s6331_s2  ;;  %v521_v45 = vsel %vm319_vm3, %v6927_v34, %v6775_v16  ;;  %1164 = vmatpush.msra.mxu1 %v6915_v9  ;;  %v515_v17 = vsel %vm319_vm3, %v6929_v20, %v489_v55 }
  0xbd   :  { %v639_v23 = vadd.f32 %v6649_v53, %v565_v46  ;;  %v11209_v57 = vand.u32 127, %v6674_v4  ;;  %v523_v63 = vmul.f32 %v6752_v11, %v521_v45  ;;  %855 = vrot.lane.b32.xlu1 %v6915_v9, %s6331_s2  ;;  %v529_v16 = vmul.f32 %v6757_v25, %v515_v17  ;;  %5872 = vmatmul.msk.f32.vlgmr.msra.gmra.mxu1 %vm1107_vm11, %v6668_v14 }
  0xbe   :  { %v691_v54 = vperm.slane %v533_v19, 0  ;;  %v794_v55 = vadd.f32 %v6468_v33, %v752_v30  ;;  %5883 = vmatmul.msk.f32.gmra.mxu3 %vm1107_vm11, %v6931_v15  ;;  %v778_v53 = vadd.f32 %v6597_v59, %v736_v50  ;;  %v6964_v4 = vsel %vm6922_vm10, 1.0, %v11176_v18 }
  0xbf   :  { %vm6947_vm12 = vcmp.ge.s32.totalorder %v11209_v57, 1  ;;  %11212 = vst [vmem:[#allocation55_spill] sm:$0xff] %v6964_v4  ;;  %v6967_v46 = vadd.s32 1920, %v6465_v31  ;;  %v6970_v28 = vadd.s32 1792, %v6465_v31  ;;  %v681_v19 = vperm.slane %v523_v63, 0  ;;  %5877 = vmatmul.msk.f32.gmra.mxu2 %vm1107_vm11, %v6754_v27 }
  0xc0   :  { %v6973_v3 = vmul.f32 %v691_v54, %v6594_v56  ;;  %v687_v30 = vperm.slane %v529_v16, 0  ;;  %v6980_v0 = vsel %vm6947_vm12, 1.0, %v11176_v18  ;;  %v6983_v50 = vmul.f32 %v691_v54, %v6461_v29 }
  0xc1   :  { %11213 = vst [vmem:[#allocation56_spill] sm:$0xff] %v6980_v0  ;;  %v6985_v45 = vmax.f32 %v794_v55, 0.0  ;;  %v6987_v17 = vmax.f32 %v778_v53, 0.0  ;;  %v10997_v57 = vand.u32 127, %v6967_v46  ;;  %v697_v63 = vmul.f32 %v681_v19, %v6594_v56 }
  0xc2   :  { %v713_v16 = vmul.f32 %v681_v19, %v6461_v29  ;;  %v719_v52 = vmul.f32 %v687_v30, %v6461_v29  ;;  %v493_v25 = vpop.permute.xlu2 %492  ;;  %v703_v36 = vmul.f32 %v687_v30, %v6594_v56  ;;  %vm5803_vm10 = vcmask 1045508  }
  0xc3   :  { %v512_v54 = vsel %vm319_vm3, %v493_v25, %v495_v7  ;;  %v513_v55 = vsel %vm319_vm3, %v6560_v44, %v493_v25  ;;  %1337 = vmatpush.msrb.mxu3 %v6985_v45  ;;  %vm7003_vm13 = vcmp.ge.s32.totalorder %v10997_v57, 1  ;;  %v418_v30 = vpop.permute.xlu1 %417  ;;  %v7009_v11 = vpop.permute.xlu0 %431  ;;  %vm5805_vm12 = vcmask 1043456  }
  0xc4   :  { %v531_v19 = vmul.f32 %v6809_v35, %v513_v55  ;;  %v532_v10 = vmul.f32 %v6814_v38, %v512_v54  ;;  %v751_v7 = vadd.f32 %v719_v52, %v661_v5  ;;  %v745_v62 = vadd.f32 %v713_v16, %v655_v22 }
  0xc5   :  { %1338 = vmatpush.msrb.mxu3 %v6987_v17  ;;  %v452_v44 = vsel %vm441_vm2, %v418_v30, %v6651_v41  ;;  %v453_v25 = vsel %vm441_vm2, %v6485_v43, %v418_v30  ;;  %v446_v54 = vsel %vm441_vm2, %v6744_v1, %v7009_v11  ;;  %v729_v55 = vadd.f32 %v697_v63, %v639_v23 }
  0xc6   :  { %v689_v57 = vperm.slane %v531_v19, 0  ;;  %v690_v35 = vperm.slane %v532_v10, 0  ;;  %v462_v52 = vmul.f32 %v6821_v47, %v453_v25  ;;  %v463_v5 = vmul.f32 %v6826_v6, %v452_v44  ;;  %5873 = vmatmul.msk.f32.gmra.mxu1 %vm1107_vm11, %v6754_v27  ;;  %5896 = vmatmul.msk.f32.vlgmr.msrb.gmra.mxu3 %vm1107_vm11, %v6668_v14 }
  0xc7   :  { %v469_v41 = vmul.f32 %v6831_v12, %v446_v54  ;;  %v793_v22 = vadd.f32 %v6468_v33, %v751_v7  ;;  %v787_v43 = vadd.f32 %v6468_v33, %v745_v62  ;;  %v771_v16 = vadd.f32 %v6597_v59, %v729_v55  ;;  %5878 = vmatmul.msk.f32.gmra.mxu2 %vm1107_vm11, %v6848_v60  ;;  %v11229_v62 = vld [vmem:[#allocation34_spill] sm:$0xff] }
  0xc8   :  { %v7033_v23 = vmul.f32 %v689_v57, %v6594_v56  ;;  %v7036_v63 = vmul.f32 %v690_v35, %v6594_v56  ;;  %v7039_v10 = vmul.f32 %v689_v57, %v6461_v29  ;;  %v11216_v19 = vand.u32 127, %v6970_v28 }
  0xc9   :  { %v553_v30 = vperm.slane %v462_v52, 0  ;;  %v554_v7 = vperm.slane %v463_v5, 0  ;;  %v560_v44 = vperm.slane %v469_v41, 0  ;;  %v7049_v25 = vmax.f32 %v793_v22, 0.0 }
  0xca   :  { %vm7045_vm14 = vcmp.lt.s32.totalorder %v11216_v19, 127  ;;  %v7052_v54 = vmul.f32 %v690_v35, %v6461_v29  ;;  %v7054_v55 = vmax.f32 %v787_v43, 0.0  ;;  %v7056_v57 = vmax.f32 %v771_v16, 0.0 }
  0xcb   :  { %11219 = vst [vmem:[#allocation57_spill] sm:$0xff] %v7049_v25  ;;  %v735_v38 = vadd.f32 %v703_v36, %v6900_v40  ;;  %v569_v12 = vmul.f32 %v553_v30, %v6505_v58  ;;  %v570_v19 = vmul.f32 %v554_v7, %v6505_v58  ;;  %v585_v6 = vmul.f32 %v553_v30, %v6445_v26  ;;  %v485_v36 = vpop.permute.xlu1 %484  ;;  %v7071_v41 = vpop.permute.xlu0 %498 }
  0xcc   :  { %11220 = vst [vmem:[#allocation58_spill] sm:$0xff] %v7056_v57  ;;  %v586_v52 = vmul.f32 %v554_v7, %v6445_v26  ;;  %877 = vrot.lane.b32.xlu1 %v7049_v25, %s6331_s2  ;;  %v576_v35 = vmul.f32 %v560_v44, %v6505_v58  ;;  %v592_v5 = vmul.f32 %v560_v44, %v6445_v26  ;;  %v7076_v22 = vsel %vm7003_vm13, 1.0, %v11176_v18 }
  0xcd   :  { %1308 = vmatpush.msrb.mxu2 %v7049_v25  ;;  %853 = vrot.lane.b32.xlu2 %v7054_v55, %s6331_s2  ;;  %v777_v40 = vadd.f32 %v6597_v59, %v735_v38  ;;  %11221 = vst [vmem:[#allocation59_spill] sm:$0xff] %v7076_v22  ;;  %v516_v43 = vsel %vm319_vm3, %v485_v36, %v6929_v20  ;;  %v11222_v16 = vand.u32 127, %v6967_v46  ;;  %v11225_v46 = vld [vmem:[#allocation23_spill] sm:$0xff] }
  0xce   :  { %1134 = vmatpush.msra.mxu0 %v7054_v55  ;;  %851 = vrot.lane.b32.xlu0 %v7056_v57, %s6331_s2  ;;  %v517_v38 = vsel %vm319_vm3, %v6483_v42, %v485_v36  ;;  %v510_v53 = vsel %vm319_vm3, %v6835_v49, %v7071_v41  ;;  %v666_v7 = vadd.f32 %v6535_v8, %v592_v5  ;;  %v7113_v5 = vsel %vm7045_vm14, 1.0, %v11176_v18  ;;  %v11234_v25 = vld [vmem:[#allocation15_spill] sm:$0xff] }
  0xcf   :  { %vm7093_vm15 = vcmp.lt.s32.totalorder %v11222_v16, 127  ;;  %v527_v44 = vmul.f32 %v6872_v61, %v517_v38  ;;  %v528_v20 = vmul.f32 %v6889_v32, %v516_v43  ;;  %v7100_v47 = vmax.f32 %v777_v40, 0.0  ;;  %5874 = vmatmul.msk.f32.gmra.mxu1 %vm1107_vm11, %v6848_v60  ;;  %5897 = vmatmul.msk.f32.gmra.mxu3 %vm1107_vm11, %v6754_v27  ;;  %11226 = vst [vmem:[#allocation23_spill] sm:$0xff] %v7113_v5  ;;  %v11227_v43 = vld [vmem:[#allocation33_spill] sm:$0xff] }
  0xd0   :  { %v534_v42 = vmul.f32 %v6903_v24, %v510_v53  ;;  %1135 = vmatpush.msra.mxu0 %v7056_v57  ;;  %v660_v49 = vadd.f32 %v6574_v48, %v586_v52  ;;  %v659_v8 = vadd.f32 %v11225_v46, %v585_v6  ;;  %v644_v38 = vadd.f32 %v11227_v43, %v570_v19  ;;  %v11230_v53 = vld [vmem:[#allocation35_spill] sm:$0xff] }
  0xd1   :  { %v685_v36 = vperm.slane %v527_v44, 0  ;;  %v686_v40 = vperm.slane %v528_v20, 0  ;;  %1309 = vmatpush.msrb.mxu2 %v7100_v47  ;;  %5868 = vmatmul.msk.f32.vlgmr.msra.gmra.mxu0 %vm1107_vm11, %v6668_v14  ;;  %v7122_v48 = vsel %vm7093_vm15, 1.0, %v11176_v18  ;;  %v650_v52 = vadd.f32 %v11229_v62, %v576_v35 }
  0xd2   :  { %11228 = vst [vmem:[#allocation33_spill] sm:$0xff] %v7122_v48  ;;  %v692_v6 = vperm.slane %v534_v42, 0  ;;  %5879 = vmatmul.msk.f32.gmra.mxu2 %vm1107_vm11, %v6931_v15  ;;  %v643_v16 = vadd.f32 %v11230_v53, %v569_v12  ;;  %v11231_v44 = vand.u32 127, %v6970_v28  ;;  %v7143_v12 = vadd.s32 1536, %v6465_v31 }
  0xd3   :  { %v701_v19 = vmul.f32 %v685_v36, %v6594_v56  ;;  %v702_v30 = vmul.f32 %v686_v40, %v6594_v56  ;;  %v717_v46 = vmul.f32 %v685_v36, %v6461_v29  ;;  %v718_v42 = vmul.f32 %v686_v40, %v6461_v29  ;;  %v428_v62 = vpop.permute.xlu1 %427  ;;  %v426_v36 = vpop.permute.xlu0 %425 }
  0xd4   :  { %vm7130_vm0 = vcmp.ge.s32.totalorder %v11231_v44, 1  ;;  %v708_v43 = vmul.f32 %v692_v6, %v6594_v56  ;;  %v724_v35 = vmul.f32 %v692_v6, %v6461_v29  ;;  %879 = vrot.lane.b32.xlu1 %v6987_v17, %s6331_s2  ;;  %v7146_v28 = vadd.s32 1664, %v6465_v31 }
  0xd5   :  { %881 = vrot.lane.b32.xlu2 %v6985_v45, %s6331_s2  ;;  %v750_v53 = vadd.f32 %v718_v42, %v660_v49  ;;  %v749_v40 = vadd.f32 %v717_v46, %v659_v8  ;;  %v734_v44 = vadd.f32 %v702_v30, %v644_v38  ;;  %v733_v61 = vadd.f32 %v701_v19, %v643_v16 }
  0xd6   :  { %v756_v32 = vadd.f32 %v724_v35, %v666_v7  ;;  %875 = vrot.lane.b32.xlu0 %v7100_v47, %s6331_s2  ;;  %v447_v6 = vsel %vm441_vm2, %v428_v62, %v6744_v1  ;;  %v448_v24 = vsel %vm441_vm2, %v426_v36, %v428_v62  ;;  %v449_v57 = vsel %vm441_vm2, %v11234_v25, %v426_v36 }
  0xd7   :  { %v468_v49 = vmul.f32 %v6918_v13, %v447_v6  ;;  %v466_v8 = vmul.f32 %v6964_v4, %v449_v57  ;;  %v467_v7 = vmul.f32 %v6980_v0, %v448_v24  ;;  %5875 = vmatmul.msk.f32.gmra.mxu1 %vm1107_vm11, %v6931_v15  ;;  %v792_v38 = vadd.f32 %v6468_v33, %v750_v53  ;;  %v11244_v0 = vld [vmem:[#allocation37_spill] sm:$0xff] }
  0xd8   :  { %v791_v1 = vadd.f32 %v6468_v33, %v749_v40  ;;  %v798_v16 = vadd.f32 %v6468_v33, %v756_v32  ;;  %5898 = vmatmul.msk.f32.gmra.mxu3 %vm1107_vm11, %v6848_v60  ;;  %v776_v25 = vadd.f32 %v6597_v59, %v734_v44  ;;  %v740_v19 = vadd.f32 %v708_v43, %v650_v52  ;;  %v7191_v40 = vpop.permute.xlu2 %502 }
  0xd9   :  { %v559_v30 = vperm.slane %v468_v49, 0  ;;  %v557_v46 = vperm.slane %v466_v8, 0  ;;  %v558_v57 = vperm.slane %v467_v7, 0  ;;  %v7171_v42 = vmax.f32 %v792_v38, 0.0  ;;  %5869 = vmatmul.msk.f32.gmra.mxu0 %vm1107_vm11, %v6754_v27  ;;  %v11236_v7 = vld [vmem:[#allocation18_spill] sm:$0xff] }
  0xda   :  { %5892 = vmatmul.msk.f32.vlgmr.msrb.gmra.mxu2 %vm1107_vm11, %v6668_v14  ;;  %v7177_v24 = vmax.f32 %v791_v1, 0.0  ;;  %v7179_v32 = vmax.f32 %v798_v16, 0.0  ;;  %v7181_v35 = vmax.f32 %v776_v25, 0.0  ;;  %v782_v62 = vadd.f32 %v6597_v59, %v740_v19 }
  0xdb   :  { %v7185_v52 = vmul.f32 %v559_v30, %v6505_v58  ;;  %v591_v43 = vmul.f32 %v559_v30, %v6445_v26  ;;  %v573_v36 = vmul.f32 %v557_v46, %v6505_v58  ;;  %v574_v53 = vmul.f32 %v558_v57, %v6505_v58  ;;  %1279 = vmatpush.msrb.mxu1 %v7171_v42  ;;  %v438_v1 = vpop.permute.xlu1 %437  ;;  %v505_v25 = vpop.permute.xlu0 %504 }
  0xdc   :  { %v589_v44 = vmul.f32 %v557_v46, %v6445_v26  ;;  %v590_v6 = vmul.f32 %v558_v57, %v6445_v26  ;;  %873 = vrot.lane.b32.xlu1 %v7171_v42, %s6331_s2  ;;  %1250 = vmatpush.msrb.mxu0 %v7177_v24  ;;  %v775_v49 = vadd.f32 %v6597_v59, %v733_v61  ;;  %v7202_v8 = vsel %vm7130_vm0, 1.0, %v11176_v18  ;;  %v11237_v61 = vld [vmem:[#allocation21_spill] sm:$0xff] }
  0xdd   :  { %11235 = vst [vmem:[#allocation34_spill] sm:$0xff] %v7202_v8  ;;  %v665_v38 = vadd.f32 %v11236_v7, %v591_v43  ;;  %1453 = vmatpush.msra.mxu3 %v7179_v32  ;;  %1280 = vmatpush.msrb.mxu1 %v7181_v35  ;;  %v7207_v16 = vmax.f32 %v782_v62, 0.0  ;;  %v167_v19 = vand.u32 127, %v7143_v12  ;;  %v442_v20 = vsel %vm441_vm2, %v438_v1, %v6852_v2  ;;  %v11238_v43 = vld [vmem:[#allocation36_spill] sm:$0xff] }
  0xde   :  { %v664_v46 = vadd.f32 %v11237_v61, %v590_v6  ;;  %v507_v57 = vsel %vm319_vm3, %v7191_v40, %v505_v25  ;;  %v647_v7 = vadd.f32 %v11238_v43, %v573_v36  ;;  %v473_v62 = vmul.f32 %v7076_v22, %v442_v20  ;;  %v11239_v43 = vld [vmem:[#allocation20_spill] sm:$0xff] }
  0xdf   :  { %1454 = vmatpush.msra.mxu3 %v7207_v16  ;;  %v522_v12 = vsel %vm319_vm3, %v505_v25, %v6927_v34  ;;  %v537_v6 = vmul.f32 %v7113_v5, %v507_v57  ;;  %v7225_v61 = vmax.f32 %v775_v49, 0.0  ;;  %5888 = vmatmul.msk.f32.vlgmr.msrb.gmra.mxu1 %vm1107_vm11, %v6668_v14  ;;  %v755_v20 = vadd.f32 %v6983_v50, %v665_v38 }
  0xe0   :  { %v538_v2 = vmul.f32 %v7122_v48, %v522_v12  ;;  %5899 = vmatmul.msk.f32.gmra.mxu3 %vm1107_vm11, %v6931_v15  ;;  %v754_v36 = vadd.f32 %v7052_v54, %v664_v46  ;;  %vm283_vm1 = vcmp.ge.s32.totalorder %v167_v19, 1  ;;  %v663_v30 = vadd.f32 %v11239_v43, %v589_v44  ;;  %v11243_v43 = vld [vmem:[#allocation24_spill] sm:$0xff] }
  0xe1   :  { %v564_v34 = vperm.slane %v473_v62, 0  ;;  %v695_v25 = vperm.slane %v537_v6, 0  ;;  %1251 = vmatpush.msrb.mxu0 %v7225_v61  ;;  %v11240_v49 = vand.u32 127, %v7146_v28  ;;  %v797_v54 = vadd.f32 %v6468_v33, %v755_v20 }
  0xe2   :  { %v696_v57 = vperm.slane %v538_v2, 0  ;;  %5893 = vmatmul.msk.f32.gmra.mxu2 %vm1107_vm11, %v6754_v27  ;;  %v796_v12 = vadd.f32 %v6468_v33, %v754_v36  ;;  %v7243_v50 = vsel %vm283_vm1, 1.0, %v11176_v18  ;;  %5870 = vmatmul.msk.f32.gmra.mxu0 %vm1107_vm11, %v6848_v60  ;;  %v753_v48 = vadd.f32 %v7039_v10, %v663_v30 }
  0xe3   :  { %vm284_vm4 = vcmp.ge.s32.totalorder %v11240_v49, 1  ;;  %11241 = vst [vmem:[#allocation35_spill] sm:$0xff] %v7243_v50  ;;  %v7248_v44 = vmul.f32 %v564_v34, %v6505_v58  ;;  %v596_v38 = vmul.f32 %v564_v34, %v6445_v26  ;;  %v7252_v46 = vmul.f32 %v695_v25, %v6594_v56  ;;  %v436_v49 = vpop.permute.xlu1 %435  ;;  %v434_v5 = vpop.permute.xlu0 %433 }
  0xe4   :  { %v7255_v62 = vsel %vm284_vm4, 1.0, %v11176_v18  ;;  %v7258_v6 = vmul.f32 %v695_v25, %v6461_v29  ;;  %v728_v2 = vmul.f32 %v696_v57, %v6461_v29  ;;  %867 = vrot.lane.b32.xlu1 %v7225_v61, %s6331_s2  ;;  %v7263_v36 = vmax.f32 %v796_v12, 0.0 }
  0xe5   :  { %11242 = vst [vmem:[#allocation15_spill] sm:$0xff] %v7255_v62  ;;  %v7265_v20 = vmax.f32 %v797_v54, 0.0  ;;  %v670_v34 = vadd.f32 %v11243_v43, %v596_v38  ;;  %v737_v13 = vadd.f32 %v7033_v23, %v647_v7  ;;  %v648_v25 = vadd.f32 %v11244_v0, %v574_v53 }
  0xe6   :  { %v443_v22 = vsel %vm441_vm2, %v436_v49, %v438_v1  ;;  %1395 = vmatpush.msra.mxu1 %v7263_v36  ;;  %v444_v12 = vsel %vm441_vm2, %v434_v5, %v436_v49  ;;  %v445_v54 = vsel %vm441_vm2, %v7009_v11, %v434_v5  ;;  %vm7285_vm5 = vcmp.lt.s32.totalorder %v167_v19, 127  ;;  %v11247_v11 = vld [vmem:[#allocation38_spill] sm:$0xff] }
  0xe7   :  { %1424 = vmatpush.msra.mxu2 %v7265_v20  ;;  %v472_v10 = vmul.f32 %v7202_v8, %v443_v22  ;;  %v470_v23 = vmul.f32 %v7243_v50, %v445_v54  ;;  %v471_v0 = vmul.f32 %v7255_v62, %v444_v12  ;;  %5889 = vmatmul.msk.f32.gmra.mxu1 %vm1107_vm11, %v6754_v27 }
  0xe8   :  { %v795_v1 = vadd.f32 %v6468_v33, %v753_v48  ;;  %v779_v30 = vadd.f32 %v6597_v59, %v737_v13  ;;  %v738_v7 = vadd.f32 %v7036_v63, %v648_v25  ;;  %v649_v22 = vadd.f32 %v11247_v11, %v7185_v52  ;;  %5912 = vmatmul.msk.f32.vlgmr.msra.gmra.mxu3 %vm1107_vm11, %v6668_v14 }
  0xe9   :  { %v760_v5 = vadd.f32 %v728_v2, %v670_v34  ;;  %v563_v38 = vperm.slane %v472_v10, 0  ;;  %v561_v43 = vperm.slane %v470_v23, 0  ;;  %v562_v49 = vperm.slane %v471_v0, 0  ;;  %v11249_v10 = vld [vmem:[#allocation25_spill] sm:$0xff] }
  0xea   :  { %v7296_v19 = vmax.f32 %v795_v1, 0.0  ;;  %v780_v12 = vadd.f32 %v6597_v59, %v738_v7  ;;  %v739_v48 = vadd.f32 %v6973_v3, %v649_v22  ;;  %5894 = vmatmul.msk.f32.gmra.mxu2 %vm1107_vm11, %v6848_v60  ;;  %v11248_v13 = vand.u32 127, %v7146_v28  ;;  %5871 = vmatmul.msk.f32.gmra.mxu0 %vm1107_vm11, %v6931_v15 }
  0xeb   :  { %v712_v63 = vmul.f32 %v696_v57, %v6594_v56  ;;  %v579_v52 = vmul.f32 %v563_v38, %v6505_v58  ;;  %v595_v2 = vmul.f32 %v563_v38, %v6445_v26  ;;  %v7309_v34 = vmax.f32 %v779_v30, 0.0  ;;  %v501_v1 = vpop.permute.xlu1 %500 }
  0xec   :  { %vm332_vm6 = vcmp.lt.s32.totalorder %v11248_v13, 127  ;;  %v593_v25 = vmul.f32 %v561_v43, %v6445_v26  ;;  %v594_v3 = vmul.f32 %v562_v49, %v6445_v26  ;;  %1366 = vmatpush.msra.mxu0 %v7296_v19  ;;  %v7314_v54 = vmax.f32 %v780_v12, 0.0  ;;  %v11254_v12 = vld [vmem:[#allocation26_spill] sm:$0xff]  ;;  %v11255_v13 = vld [vmem:[#allocation27_spill] sm:$0xff] }
  0xed   :  { %v781_v28 = vadd.f32 %v6597_v59, %v739_v48  ;;  %v669_v23 = vadd.f32 %v11249_v10, %v595_v2  ;;  %v7321_v57 = vsel %vm7285_vm5, 1.0, %v11176_v18  ;;  %v7324_v0 = vsel %vm332_vm6, 1.0, %v11176_v18 }
  0xee   :  { %11250 = vst [vmem:[#allocation18_spill] sm:$0xff] %v7321_v57  ;;  %v802_v30 = vadd.f32 %v6468_v33, %v760_v5  ;;  %v577_v26 = vmul.f32 %v561_v43, %v6505_v58  ;;  %v578_v7 = vmul.f32 %v562_v49, %v6505_v58  ;;  %1367 = vmatpush.msra.mxu0 %v7309_v34  ;;  %v11252_v58 = vld [vmem:[#allocation39_spill] sm:$0xff] }
  0xef   :  { %11251 = vst [vmem:[#allocation21_spill] sm:$0xff] %v7324_v0  ;;  %1396 = vmatpush.msra.mxu1 %v7314_v54  ;;  %v7331_v11 = vmax.f32 %v781_v28, 0.0  ;;  %v508_v53 = vsel %vm319_vm3, %v501_v1, %v7191_v40  ;;  %v509_v18 = vsel %vm319_vm3, %v7071_v41, %v501_v1  ;;  %v654_v38 = vadd.f32 %v11252_v58, %v7248_v44  ;;  %v11253_v41 = vld [vmem:[#allocation40_spill] sm:$0xff] }
  0xf0   :  { %v536_v22 = vmul.f32 %v7324_v0, %v508_v53  ;;  %v7340_v5 = vmax.f32 %v802_v30, 0.0  ;;  %5890 = vmatmul.msk.f32.gmra.mxu1 %vm1107_vm11, %v6848_v60  ;;  %v535_v40 = vmul.f32 %v7321_v57, %v509_v18  ;;  %v759_v43 = vadd.f32 %v7258_v6, %v669_v23  ;;  %5913 = vmatmul.msk.f32.gmra.mxu3 %vm1107_vm11, %v6754_v27 }
  0xf1   :  { %1425 = vmatpush.msra.mxu2 %v7331_v11  ;;  %891 = vrot.lane.b32.xlu1 %v7331_v11, %s6331_s2  ;;  %v653_v49 = vadd.f32 %v11253_v41, %v579_v52  ;;  %v667_v48 = vadd.f32 %v11254_v12, %v593_v25  ;;  %v668_v2 = vadd.f32 %v11255_v13, %v594_v3  ;;  %v11256_v25 = vld [vmem:[#allocation41_spill] sm:$0xff] }
  0xf2   :  { %v694_v28 = vperm.slane %v536_v22, 0  ;;  %1569 = vmatpush.msrb.mxu3 %v7340_v5  ;;  %913 = vrot.lane.b32.xlu2 %v7340_v5, %s6331_s2  ;;  %v744_v44 = vadd.f32 %v712_v63, %v654_v38  ;;  %v693_v10 = vperm.slane %v535_v40, 0  ;;  %v801_v6 = vadd.f32 %v6468_v33, %v759_v43  ;;  %v11257_v63 = vld [vmem:[#allocation42_spill] sm:$0xff] }
  0xf3   :  { %5895 = vmatmul.msk.f32.gmra.mxu2 %vm1107_vm11, %v6931_v15  ;;  %v743_v52 = vadd.f32 %v7252_v46, %v653_v49  ;;  %v652_v3 = vadd.f32 %v11256_v25, %v578_v7  ;;  %5884 = vmatmul.msk.f32.vlgmr.msrb.gmra.mxu0 %vm1107_vm11, %v6668_v14  ;;  %v651_v53 = vadd.f32 %v11257_v63, %v577_v26  ;;  %v11260_v63 = vld [vmem:[#allocation22_spill] sm:$0xff] }
  0xf4   :  { %v710_v23 = vmul.f32 %v694_v28, %v6594_v56  ;;  %v726_v1 = vmul.f32 %v694_v28, %v6461_v29  ;;  %v786_v30 = vadd.f32 %v6597_v59, %v744_v44  ;;  %v709_v18 = vmul.f32 %v693_v10, %v6594_v56  ;;  %v11258_v28 = vld [vmem:[#allocation19_spill] sm:$0xff] }
  0xf5   :  { %v725_v22 = vmul.f32 %v693_v10, %v6461_v29  ;;  %v7372_v58 = vmax.f32 %v801_v6, 0.0  ;;  %v785_v46 = vadd.f32 %v6597_v59, %v743_v52  ;;  %v11259_v6 = vld [vmem:[#allocation14_spill] sm:$0xff] }
  0xf6   :  { %v758_v7 = vadd.f32 %v726_v1, %v668_v2  ;;  %v7375_v38 = vmax.f32 %v786_v30, 0.0  ;;  %v742_v40 = vadd.f32 %v710_v23, %v652_v3  ;;  %v741_v49 = vadd.f32 %v709_v18, %v651_v53  ;;  %v7506_v23 = vld [vmem:[#allocation5 + $0x30] sm:$0xff]  ;;  %v11261_v18 = vld [vmem:[#allocation17_spill] sm:$0xff] }
  0xf7   :  { %v757_v43 = vadd.f32 %v725_v22, %v667_v48  ;;  %1540 = vmatpush.msrb.mxu2 %v7372_v58  ;;  %v7378_v41 = vmax.f32 %v785_v46, 0.0 }
  0xf8   :  { %911 = vrot.lane.b32.xlu0 %v7375_v38, %s6331_s2  ;;  %1570 = vmatpush.msrb.mxu3 %v7375_v38  ;;  %v800_v29 = vadd.f32 %v6468_v33, %v758_v7  ;;  %v784_v56 = vadd.f32 %v6597_v59, %v742_v40  ;;  %v783_v12 = vadd.f32 %v6597_v59, %v741_v49  ;;  %v7536_v40 = vld [vmem:[#allocation5 + $0x48] sm:$0xff]  ;;  %v7553_v49 = vld [vmem:[#allocation5 + $0x60] sm:$0xff] }
  0xf9   :  { %887 = vrot.lane.b32.xlu1 %v7314_v54, %s6331_s2  ;;  %1541 = vmatpush.msrb.mxu2 %v7378_v41  ;;  %v799_v26 = vadd.f32 %v6468_v33, %v757_v43  ;;  %v6219_v43 = vld [vmem:[#allocation5 + $0x38] sm:$0xff] }
  0xfa   :  { %871 = vrot.lane.b32.xlu2 %v7181_v35, %s6331_s2  ;;  %5891 = vmatmul.msk.f32.gmra.mxu1 %vm1107_vm11, %v6931_v15  ;;  %v7394_v48 = vmax.f32 %v800_v29, 0.0  ;;  %v7403_v33 = vmax.f32 %v784_v56, 0.0  ;;  %v7408_v59 = vmax.f32 %v783_v12, 0.0 }
  0xfb   :  { %5908 = vmatmul.msk.f32.vlgmr.msra.gmra.mxu2 %vm1107_vm11, %v6668_v14  ;;  %v7398_v13 = vmax.f32 %v799_v26, 0.0  ;;  %5914 = vmatmul.msk.f32.gmra.mxu3 %vm1107_vm11, %v6848_v60 }
  0xfc   :  { %1511 = vmatpush.msrb.mxu1 %v7394_v48  ;;  %5885 = vmatmul.msk.f32.gmra.mxu0 %vm1107_vm11, %v6754_v27 }
  0xfd   :  { %1482 = vmatpush.msrb.mxu0 %v7398_v13 }
  0xfe   :  { %1512 = vmatpush.msrb.mxu1 %v7403_v33 }
  0xff   :  { %1483 = vmatpush.msrb.mxu0 %v7408_v59 }
 0x100   :  { %869 = vrot.lane.b32.xlu0 %v7177_v24, %s6331_s2 }
 0x101   :  { %909 = vrot.lane.b32.xlu1 %v7372_v58, %s6331_s2 }
 0x102   :  { %893 = vrot.lane.b32.xlu2 %v7265_v20, %s6331_s2  ;;  %5904 = vmatmul.msk.f32.vlgmr.msra.gmra.mxu1 %vm1107_vm11, %v6668_v14 }
 0x103   :  { %5909 = vmatmul.msk.f32.gmra.mxu2 %vm1107_vm11, %v6754_v27  ;;  %5915 = vmatmul.msk.f32.gmra.mxu3 %vm1107_vm11, %v6931_v15 }
 0x104   :  { %5886 = vmatmul.msk.f32.gmra.mxu0 %vm1107_vm11, %v6848_v60 }
 0x108   :  { %897 = vrot.lane.b32.xlu0 %v7179_v32, %s6331_s2 }
 0x109   :  { %903 = vrot.lane.b32.xlu1 %v7403_v33, %s6331_s2 }
 0x10a   :  { %895 = vrot.lane.b32.xlu2 %v7207_v16, %s6331_s2  ;;  %5905 = vmatmul.msk.f32.gmra.mxu1 %vm1107_vm11, %v6754_v27 }
 0x10b   :  { %5910 = vmatmul.msk.f32.gmra.mxu2 %vm1107_vm11, %v6848_v60  ;;  %5928 = vmatmul.msk.f32.vlgmr.msrb.gmra.mxu3 %vm1107_vm11, %v6668_v14 }
 0x10c   :  { %5887 = vmatmul.msk.f32.gmra.mxu0 %vm1107_vm11, %v6931_v15 }
 0x10d   :  { %v7442_v2 = vpop.permute.xlu0 %865 }
 0x10e   :  { %v862_v44 = vpop.permute.xlu2 %861 }
 0x10f   :  { %v940_v10 = vsel %vm441_vm2, %v862_v44, %v7442_v2 }
 0x110   :  { %889 = vrot.lane.b32.xlu0 %v7263_v36, %s6331_s2  ;;  %v966_v52 = vmul.f32 %v11259_v6, %v940_v10 }
 0x111   :  { %993 = vrot.lane.b32.xlu1 %v11258_v28, %s6330_s0 }
 0x112   :  { %885 = vrot.lane.b32.xlu2 %v7296_v19, %s6331_s2  ;;  %5906 = vmatmul.msk.f32.gmra.mxu1 %vm1107_vm11, %v6848_v60 }
 0x113   :  { %5911 = vmatmul.msk.f32.gmra.mxu2 %vm1107_vm11, %v6931_v15  ;;  %5929 = vmatmul.msk.f32.gmra.mxu3 %vm1107_vm11, %v6754_v27 }
 0x114   :  { %5900 = vmatmul.msk.f32.vlgmr.msra.gmra.mxu0 %vm1107_vm11, %v6668_v14  ;;  %1697 = vmatpush.msra.mxu3 %v966_v52 }
 0x118   :  { %883 = vrot.lane.b32.xlu0 %v7309_v34, %s6331_s2 }
 0x119   :  { %995 = vrot.lane.b32.xlu1 %v7225_v61, %s6330_s0  ;;  %v7488_v61 = vpop.permute.xlu2 %863 }
 0x11a   :  { %907 = vrot.lane.b32.xlu2 %v7378_v41, %s6331_s2  ;;  %5907 = vmatmul.msk.f32.gmra.mxu1 %vm1107_vm11, %v6931_v15 }
 0x11b   :  { %5924 = vmatmul.msk.f32.vlgmr.msrb.gmra.mxu2 %vm1107_vm11, %v6668_v14  ;;  %5930 = vmatmul.msk.f32.gmra.mxu3 %vm1107_vm11, %v6848_v60 }
 0x11c   :  { %5901 = vmatmul.msk.f32.gmra.mxu0 %vm1107_vm11, %v6754_v27 }
 0x120   :  { %905 = vrot.lane.b32.xlu0 %v7394_v48, %s6331_s2 }
 0x121   :  { %985 = vrot.lane.b32.xlu1 %v6896_v21, %s6330_s0 }
 0x122   :  { %901 = vrot.lane.b32.xlu2 %v7398_v13, %s6331_s2  ;;  %5920 = vmatmul.msk.f32.vlgmr.msrb.gmra.mxu1 %vm1107_vm11, %v6668_v14 }
 0x123   :  { %5925 = vmatmul.msk.f32.gmra.mxu2 %vm1107_vm11, %v6754_v27  ;;  %5931 = vmatmul.msk.f32.gmra.mxu3 %vm1107_vm11, %v6931_v15 }
 0x124   :  { %5902 = vmatmul.msk.f32.gmra.mxu0 %vm1107_vm11, %v6848_v60 }
 0x127   :  { %v860_v14 = vpop.permute.xlu1 %859 }
 0x128   :  { %899 = vrot.lane.b32.xlu0 %v7408_v59, %s6331_s2  ;;  %v939_v21 = vsel %vm441_vm2, %v860_v14, %v7488_v61  ;;  %v7503_v25 = vpop.f32.mrf.mxu3 }
 0x129   :  { %1013 = vrot.lane.b32.xlu1 %v7296_v19, %s6330_s0  ;;  %v950_v3 = vmul.f32 %v11259_v6, %v939_v21 }
 0x12a   :  { %997 = vrot.lane.b32.xlu2 %v7177_v24, %s6330_s0  ;;  %5921 = vmatmul.msk.f32.gmra.mxu1 %vm1107_vm11, %v6754_v27  ;;  %v7510_v24 = vpop.permute.xlu2 %853 }
 0x12b   :  { %5926 = vmatmul.msk.f32.gmra.mxu2 %vm1107_vm11, %v6848_v60  ;;  %1698 = vmatpush.msra.mxu3 %v950_v3 }
 0x12c   :  { %5903 = vmatmul.msk.f32.gmra.mxu0 %vm1107_vm11, %v6931_v15  ;;  %5944 = vmatmul.msk.f32.vlgmr.msra.gmra.mxu3 %vm1107_vm11, %v7506_v23  ;;  %v858_v19 = vpop.permute.xlu0 %857 }
 0x12d   :  { %v942_v1 = vsel %vm441_vm2, %v858_v19, %v862_v44  ;;  %v944_v30 = vsel %vm441_vm2, %v7510_v24, %v858_v19  ;;  %v7583_v44 = vld [vmem:[#allocation5 + $0x78] sm:$0xff] }
 0x12e   :  { %v964_v53 = vmul.f32 %v11260_v63, %v944_v30  ;;  %v965_v22 = vmul.f32 %v11261_v18, %v942_v1 }
 0x12f   :  { %v856_v46 = vpop.permute.xlu1 %855 }
 0x130   :  { %991 = vrot.lane.b32.xlu0 %v6666_v39, %s6330_s0  ;;  %v941_v39 = vsel %vm441_vm2, %v856_v46, %v860_v14  ;;  %1639 = vmatpush.msra.mxu1 %v964_v53  ;;  %v7533_v7 = vpop.f32.mrf.mxu3  ;;  %v11263_v14 = vld [vmem:[#allocation58_spill] sm:$0xff]  ;;  %v11264_v53 = vld [vmem:[#allocation32_spill] sm:$0xff] }
 0x131   :  { %981 = vrot.lane.b32.xlu1 %v7054_v55, %s6330_s0  ;;  %1668 = vmatpush.msra.mxu2 %v965_v22  ;;  %v949_v55 = vmul.f32 %v11261_v18, %v941_v39  ;;  %v11265_v39 = vld [vmem:[#allocation57_spill] sm:$0xff] }
 0x132   :  { %989 = vrot.lane.b32.xlu2 %v6844_v37, %s6330_s0  ;;  %5922 = vmatmul.msk.f32.gmra.mxu1 %vm1107_vm11, %v6848_v60  ;;  %v11273_v18 = vld [vmem:[#allocation49_spill] sm:$0xff] }
 0x133   :  { %5927 = vmatmul.msk.f32.gmra.mxu2 %vm1107_vm11, %v6931_v15 }
 0x134   :  { %5916 = vmatmul.msk.f32.vlgmr.msrb.gmra.mxu0 %vm1107_vm11, %v6219_v43  ;;  %1669 = vmatpush.msra.mxu2 %v949_v55  ;;  %v11266_v55 = vld [vmem:[#allocation28_spill] sm:$0xff] }
 0x135   :  { %5945 = vmatmul.msk.f32.gmra.mxu3 %vm1107_vm11, %v7536_v40 }
 0x138   :  { %987 = vrot.lane.b32.xlu0 %v6846_v51, %s6330_s0  ;;  %v7551_v37 = vpop.f32.mrf.mxu3 }
 0x139   :  { %1003 = vrot.lane.b32.xlu1 %v7100_v47, %s6330_s0  ;;  %v7561_v47 = vpop.permute.xlu2 %881 }
 0x13a   :  { %983 = vrot.lane.b32.xlu2 %v6915_v9, %s6330_s0  ;;  %5923 = vmatmul.msk.f32.gmra.mxu1 %vm1107_vm11, %v6931_v15  ;;  %v7557_v51 = vpop.f32.mrf.mxu2  ;;  %v7559_v29 = vpop.f32.mrf.mxu1 }
 0x13b   :  { %5940 = vmatmul.msk.f32.vlgmr.msra.gmra.mxu2 %vm1107_vm11, %v7506_v23 }
 0x13c   :  { %5917 = vmatmul.msk.f32.gmra.mxu0 %vm1107_vm11, %v6754_v27  ;;  %v11262_v27 = vld [vmem:[#allocation29_spill] sm:$0xff] }
 0x13d   :  { %5946 = vmatmul.msk.f32.gmra.mxu3 %vm1107_vm11, %v7553_v49 }
 0x13e   :  { %v878_v9 = vpop.permute.xlu1 %877 }
 0x13f   :  { %v932_v56 = vsel %vm441_vm2, %v878_v9, %v7561_v47 }
 0x140   :  { %1009 = vrot.lane.b32.xlu0 %v6985_v45, %s6330_s0  ;;  %v970_v26 = vmul.f32 %v11262_v27, %v932_v56  ;;  %v7573_v12 = vpop.permute.xlu0 %851 }
 0x141   :  { %1025 = vrot.lane.b32.xlu1 %v7179_v32, %s6330_s0  ;;  %v943_v28 = vsel %vm441_vm2, %v7573_v12, %v856_v46  ;;  %v7585_v32 = vpop.f32.mrf.mxu3 }
 0x142   :  { %1007 = vrot.lane.b32.xlu2 %v6987_v17, %s6330_s0  ;;  %v948_v45 = vmul.f32 %v11260_v63, %v943_v28  ;;  %1813 = vmatpush.msrb.mxu3 %v970_v26  ;;  %v7589_v10 = vpop.f32.mrf.mxu2 }
 0x143   :  { %5941 = vmatmul.msk.f32.gmra.mxu2 %vm1107_vm11, %v7536_v40  ;;  %v7591_v17 = vpop.f32.mrf.mxu1 }
 0x144   :  { %5918 = vmatmul.msk.f32.gmra.mxu0 %vm1107_vm11, %v6848_v60  ;;  %1640 = vmatpush.msra.mxu1 %v948_v45 }
 0x145   :  { %5936 = vmatmul.msk.f32.vlgmr.msra.gmra.mxu1 %vm1107_vm11, %v7506_v23  ;;  %5947 = vmatmul.msk.f32.gmra.mxu3 %vm1107_vm11, %v7583_v44 }
 0x146   :  { %v7597_v52 = vpop.permute.xlu1 %879 }
 0x148   :  { %1011 = vrot.lane.b32.xlu0 %v7309_v34, %s6330_s0  ;;  %v876_v60 = vpop.permute.xlu0 %875 }
 0x149   :  { %1027 = vrot.lane.b32.xlu1 %v7408_v59, %s6330_s0  ;;  %v931_v21 = vsel %vm441_vm2, %v876_v60, %v7597_v52  ;;  %v7613_v1 = vpop.f32.mrf.mxu3 }
 0x14a   :  { %979 = vrot.lane.b32.xlu2 %v11263_v14, %s6330_s0  ;;  %v954_v3 = vmul.f32 %v11262_v27, %v931_v21  ;;  %v7621_v59 = vpop.f32.mrf.mxu2 }
 0x14b   :  { %5942 = vmatmul.msk.f32.gmra.mxu2 %vm1107_vm11, %v7553_v49 }
 0x14c   :  { %v7611_v19 = vpop.permute.xlu2 %913  ;;  %5919 = vmatmul.msk.f32.gmra.mxu0 %vm1107_vm11, %v6931_v15  ;;  %1814 = vmatpush.msrb.mxu3 %v954_v3  ;;  %v7623_v30 = vpop.f32.mrf.mxu1 }
 0x14d   :  { %v946_v34 = vsel %vm441_vm2, %v7611_v19, %v7510_v24  ;;  %5937 = vmatmul.msk.f32.gmra.mxu1 %vm1107_vm11, %v7536_v40  ;;  %5960 = vmatmul.msk.f32.vlgmr.msrb.gmra.mxu3 %vm1107_vm11, %v7506_v23 }
 0x14e   :  { %v963_v22 = vmul.f32 %v11264_v53, %v946_v34  ;;  %v7630_v46 = vpop.permute.xlu1 %873  ;;  %v7632_v15 = vpop.f32.mrf.mxu0 }
 0x14f   :  { %v934_v24 = vsel %vm441_vm2, %v7630_v46, %v878_v9 }
 0x150   :  { %1005 = vrot.lane.b32.xlu0 %v11265_v39, %s6330_s0  ;;  %1610 = vmatpush.msra.mxu0 %v963_v22  ;;  %v969_v43 = vmul.f32 %v11266_v55, %v934_v24  ;;  %v848_v24 = vld [vmem:[#allocation7 + $0x18] sm:$0xff] }
 0x151   :  { %1017 = vrot.lane.b32.xlu1 %v7263_v36, %s6330_s0 }
 0x152   :  { %1001 = vrot.lane.b32.xlu2 %v7171_v42, %s6330_s0  ;;  %1784 = vmatpush.msrb.mxu2 %v969_v43  ;;  %v7646_v26 = vpop.f32.mrf.mxu3 }
 0x153   :  { %5943 = vmatmul.msk.f32.gmra.mxu2 %vm1107_vm11, %v7583_v44 }
 0x154   :  { %v872_v56 = vpop.permute.xlu2 %871  ;;  %v7650_v45 = vpop.f32.mrf.mxu1 }
 0x155   :  { %v933_v28 = vsel %vm441_vm2, %v872_v56, %v876_v60  ;;  %5938 = vmatmul.msk.f32.gmra.mxu1 %vm1107_vm11, %v7553_v49  ;;  %v7654_v36 = vpop.f32.mrf.mxu2  ;;  %5961 = vmatmul.msk.f32.gmra.mxu3 %vm1107_vm11, %v7536_v40 }
 0x156   :  { %v953_v9 = vmul.f32 %v11266_v55, %v933_v28  ;;  %v7659_v42 = vpop.f32.mrf.mxu0  ;;  %v868_v60 = vpop.permute.xlu1 %867 }
 0x158   :  { %999 = vrot.lane.b32.xlu0 %v7181_v35, %s6330_s0  ;;  %1785 = vmatpush.msrb.mxu2 %v953_v9 }
 0x159   :  { %1039 = vrot.lane.b32.xlu1 %v7375_v38, %s6330_s0 }
 0x15a   :  { %1029 = vrot.lane.b32.xlu2 %v7398_v13, %s6330_s0 }
 0x15b   :  { %5956 = vmatmul.msk.f32.vlgmr.msrb.gmra.mxu2 %vm1107_vm11, %v7506_v23  ;;  %v7671_v21 = vpop.f32.mrf.mxu3 }
 0x15c   :  { %v7669_v14 = vpop.permute.xlu2 %893  ;;  %v7673_v3 = vpop.f32.mrf.mxu1 }
 0x15d   :  { %11267 = vst [vmem:[#allocation36_spill] sm:$0xff] %v7673_v3  ;;  %5939 = vmatmul.msk.f32.gmra.mxu1 %vm1107_vm11, %v7583_v44  ;;  %v7677_v35 = vpop.f32.mrf.mxu2  ;;  %5962 = vmatmul.msk.f32.gmra.mxu3 %vm1107_vm11, %v7553_v49 }
 0x15f   :  { %v7683_v38 = vpop.f32.mrf.mxu0 }
 0x160   :  { %1023 = vrot.lane.b32.xlu0 %v7207_v16, %s6330_s0 }
 0x161   :  { %1033 = vrot.lane.b32.xlu1 %v7394_v48, %s6330_s0 }
 0x162   :  { %1021 = vrot.lane.b32.xlu2 %v7265_v20, %s6330_s0 }
 0x163   :  { %v7689_v13 = vpop.permute.xlu1 %891  ;;  %5957 = vmatmul.msk.f32.gmra.mxu2 %vm1107_vm11, %v7536_v40  ;;  %v7695_v22 = vpop.f32.mrf.mxu3 }
 0x164   :  { %v7693_v34 = vpop.permute.xlu2 %895  ;;  %v7697_v39 = vpop.f32.mrf.mxu1 }
 0x165   :  { %11268 = vst [vmem:[#allocation20_spill] sm:$0xff] %v7697_v39  ;;  %v7699_v16 = vpop.f32.mrf.mxu2  ;;  %5963 = vmatmul.msk.f32.gmra.mxu3 %vm1107_vm11, %v7583_v44  ;;  %v11326_v39 = vld [vmem:[#allocation23_spill] sm:$0xff] }
 0x167   :  { %v7705_v20 = vpop.f32.mrf.mxu0 }
 0x168   :  { %1019 = vrot.lane.b32.xlu0 %v7331_v11, %s6330_s0 }
 0x169   :  { %2607 = vperm.xlu1 %6218, %v848_v24  }
 0x16a   :  { %v912_v48 = vpop.permute.xlu0 %911  ;;  %1015 = vrot.lane.b32.xlu2 %v7314_v54, %s6330_s0 }
 0x16b   :  { %v945_v43 = vsel %vm441_vm2, %v912_v48, %v7573_v12  ;;  %v7712_v28 = vpop.permute.xlu1 %887  ;;  %5958 = vmatmul.msk.f32.gmra.mxu2 %vm1107_vm11, %v7553_v49  ;;  %v7719_v11 = vpop.f32.mrf.mxu3  ;;  %v937_v12 = vsel %vm441_vm2, %v7488_v61, %v868_v60 }
 0x16c   :  { %v947_v9 = vmul.f32 %v11264_v53, %v945_v43  ;;  %v7717_v27 = vpop.permute.xlu2 %885  ;;  %11269 = vst [vmem:[#allocation24_spill] sm:$0xff] %v7719_v11 }
 0x16d   :  { %v7721_v24 = vpop.f32.mrf.mxu1  ;;  %v7723_v55 = vpop.f32.mrf.mxu2  ;;  %v930_v61 = vsel %vm441_vm2, %v7561_v47, %v7717_v27 }
 0x16e   :  { %11270 = vst [vmem:[#allocation37_spill] sm:$0xff] %v7721_v24  ;;  %1611 = vmatpush.msra.mxu0 %v947_v9 }
 0x16f   :  { %5932 = vmatmul.msk.f32.vlgmr.msra.gmra.mxu0 %vm1107_vm11, %v7506_v23 }
 0x170   :  { %1041 = vrot.lane.b32.xlu0 %v7340_v5, %s6330_s0  ;;  %v7744_v5 = vpop.f32.mrf.mxu0 }
 0x171   :  { %11271 = vst [vmem:[#allocation38_spill] sm:$0xff] %v7744_v5 }
 0x172   :  { %v870_v54 = vpop.permute.xlu0 %869  ;;  %1037 = vrot.lane.b32.xlu2 %v7372_v58, %s6330_s0  ;;  %v935_v58 = vsel %vm441_vm2, %v868_v60, %v872_v56  ;;  %v971_v56 = vmul.f32 %v6964_v4, %v930_v61  ;;  %v847_v61 = vld [vmem:[#allocation7 + $0x10] sm:$0xff] }
 0x173   :  { %v936_v43 = vsel %vm441_vm2, %v870_v54, %v7630_v46  ;;  %v938_v9 = vsel %vm441_vm2, %v7442_v2, %v870_v54  ;;  %v7740_v53 = vpop.permute.xlu1 %909  ;;  %5959 = vmatmul.msk.f32.gmra.mxu2 %vm1107_vm11, %v7583_v44  ;;  %v11272_v46 = vld [vmem:[#allocation48_spill] sm:$0xff]  ;;  %v7759_v5 = vpop.f32.mrf.mxu3  ;;  %v952_v47 = vmul.f32 %v11273_v18, %v935_v58 }
 0x174   :  { %v967_v6 = vmul.f32 %v11272_v46, %v938_v9  ;;  %v968_v63 = vmul.f32 %v11273_v18, %v936_v43  ;;  %v7754_v2 = vpop.permute.xlu2 %907  ;;  %v951_v54 = vmul.f32 %v11272_v46, %v937_v12  ;;  %11274 = vst [vmem:[#allocation25_spill] sm:$0xff] %v7759_v5  ;;  %v11276_v43 = vld [vmem:[#allocation50_spill] sm:$0xff]  ;;  %v11280_v18 = vld [vmem:[#allocation59_spill] sm:$0xff] }
 0x176   :  { %1726 = vmatpush.msrb.mxu0 %v967_v6  ;;  %1755 = vmatpush.msrb.mxu1 %v968_v63  ;;  %v7757_v11 = vpop.f32.mrf.mxu2  ;;  %v923_v63 = vsel %vm441_vm2, %v7689_v13, %v7693_v34 }
 0x177   :  { %5933 = vmatmul.msk.f32.gmra.mxu0 %vm1107_vm11, %v7536_v40  ;;  %v7765_v60 = vpop.f32.mrf.mxu1 }
 0x178   :  { %11275 = vst [vmem:[#allocation39_spill] sm:$0xff] %v7765_v60  ;;  %1035 = vrot.lane.b32.xlu0 %v7378_v41, %s6330_s0  ;;  %1727 = vmatpush.msrb.mxu0 %v951_v54 }
 0x179   :  { %1756 = vmatpush.msrb.mxu1 %v952_v47  ;;  %v7789_v54 = vpop.f32.mrf.mxu0 }
 0x17a   :  { %1842 = vmatpush.msra.mxu0 %v971_v56  ;;  %5952 = vmatmul.msk.f32.vlgmr.msrb.gmra.mxu1 %vm1107_vm11, %v7506_v23  ;;  %v898_v6 = vpop.permute.xlu0 %897  ;;  %11277 = vst [vmem:[#allocation40_spill] sm:$0xff] %v7789_v54  ;;  %v958_v56 = vmul.f32 %v11276_v43, %v923_v63  ;;  %v11283_v54 = vld [vmem:[#allocation54_spill] sm:$0xff] }
 0x17b   :  { %1031 = vrot.lane.b32.xlu2 %v7403_v33, %s6330_s0  ;;  %v924_v12 = vsel %vm441_vm2, %v7669_v14, %v898_v6  ;;  %v7780_v41 = vpop.permute.xlu1 %903  ;;  %v916_v33 = vsel %vm441_vm2, %v7740_v53, %v7611_v19  ;;  %v850_v19 = vld [vmem:[#allocation7 + $0x28] sm:$0xff] }
 0x17c   :  { %v974_v9 = vmul.f32 %v11276_v43, %v924_v12  ;;  %v7783_v58 = vpop.permute.xlu2 %901  ;;  %v915_v12 = vsel %vm441_vm2, %v7754_v2, %v912_v48  ;;  %v978_v5 = vmul.f32 %v11280_v18, %v916_v33  ;;  %v925_v33 = vsel %vm441_vm2, %v7712_v28, %v7689_v13 }
 0x17d   :  { %v962_v48 = vmul.f32 %v11280_v18, %v915_v12  ;;  %v849_v18 = vld [vmem:[#allocation7 + $0x20] sm:$0xff] }
 0x17e   :  { %1929 = vmatpush.msra.mxu3 %v974_v9  ;;  %v7792_v47 = vpop.f32.mrf.mxu2  ;;  %v7794_v46 = vpop.f32.mrf.mxu3 }
 0x17f   :  { %11278 = vst [vmem:[#allocation26_spill] sm:$0xff] %v7792_v47  ;;  %5934 = vmatmul.msk.f32.gmra.mxu0 %vm1107_vm11, %v7553_v49  ;;  %v7804_v63 = vpop.f32.mrf.mxu1 }
 0x180   :  { %11279 = vst [vmem:[#allocation27_spill] sm:$0xff] %v7794_v46  ;;  %2602 = vperm.xlu0 %6217, %v847_v61   ;;  %1930 = vmatpush.msra.mxu3 %v958_v56  ;;  %v11284_v46 = vld [vmem:[#allocation13_spill] sm:$0xff] }
 0x181   :  { %5976 = vmatmul.msk.f32.vlgmr.msra.gmra.mxu3 %vm1107_vm11, %v7506_v23  ;;  %11281 = vst [vmem:[#allocation41_spill] sm:$0xff] %v7804_v63  ;;  %v11282_v63 = vld [vmem:[#allocation56_spill] sm:$0xff] }
 0x182   :  { %5953 = vmatmul.msk.f32.gmra.mxu1 %vm1107_vm11, %v7536_v40  ;;  %2045 = vmatpush.msrb.mxu3 %v978_v5  ;;  %v890_v9 = vpop.permute.xlu0 %889 }
 0x183   :  { %v926_v61 = vsel %vm441_vm2, %v890_v9, %v7669_v14  ;;  %v928_v56 = vsel %vm441_vm2, %v7717_v27, %v890_v9  ;;  %v994_v43 = vpop.permute.xlu1 %993  ;;  %2617 = vperm.xlu2 %6216, %v850_v19   ;;  %v957_v14 = vmul.f32 %v11283_v54, %v925_v33  ;;  %v922_v33 = vsel %vm441_vm2, %v898_v6, %v7783_v58 }
 0x184   :  { %v972_v5 = vmul.f32 %v11282_v63, %v928_v56  ;;  %v973_v47 = vmul.f32 %v11283_v54, %v926_v61  ;;  %2046 = vmatpush.msrb.mxu3 %v962_v48  ;;  %v7821_v12 = vpop.permute.xlu2 %997  ;;  %v7834_v48 = vpop.f32.mrf.mxu0  ;;  %v975_v54 = vmul.f32 %v7243_v50, %v922_v33  ;;  %v917_v33 = vsel %vm441_vm2, %v7780_v41, %v7754_v2 }
 0x185   :  { %v1066_v13 = vsel %vm319_vm3, %v994_v43, %v7821_v12  ;;  %11287 = vst [vmem:[#allocation58_spill] sm:$0xff] %v7834_v48  ;;  %v961_v2 = vmul.f32 %v7202_v8, %v917_v33  ;;  %v11315_v48 = vld [vmem:[#allocation45_spill] sm:$0xff] }
 0x186   :  { %1871 = vmatpush.msra.mxu1 %v972_v5  ;;  %1900 = vmatpush.msra.mxu2 %v973_v47  ;;  %v1094_v27 = vmul.f32 %v11284_v46, %v1066_v13  ;;  %v7828_v9 = vpop.f32.mrf.mxu2  ;;  %v7830_v19 = vpop.f32.mrf.mxu3 }
 0x187   :  { %11285 = vst [vmem:[#allocation42_spill] sm:$0xff] %v7828_v9  ;;  %5935 = vmatmul.msk.f32.gmra.mxu0 %vm1107_vm11, %v7583_v44  ;;  %v7853_v5 = vpop.f32.mrf.mxu1 }
 0x188   :  { %11286 = vst [vmem:[#allocation19_spill] sm:$0xff] %v7830_v19  ;;  %2612 = vperm.xlu0 %6217, %v849_v18   ;;  %1901 = vmatpush.msra.mxu2 %v957_v14  ;;  %v8049_v19 = vld [vmem:[#allocation5 + $0x58] sm:$0xff] }
 0x189   :  { %5972 = vmatmul.msk.f32.vlgmr.msra.gmra.mxu2 %vm1107_vm11, %v7506_v23  ;;  %5977 = vmatmul.msk.f32.gmra.mxu3 %vm1107_vm11, %v7536_v40  ;;  %11288 = vst [vmem:[#allocation57_spill] sm:$0xff] %v7853_v5 }
 0x18a   :  { %5954 = vmatmul.msk.f32.gmra.mxu1 %vm1107_vm11, %v7553_v49  ;;  %v884_v47 = vpop.permute.xlu0 %883  ;;  %2173 = vmatpush.msra.mxu3 %v1094_v27 }
 0x18b   :  { %v927_v18 = vsel %vm441_vm2, %v884_v47, %v7712_v28  ;;  %v929_v61 = vsel %vm441_vm2, %v7597_v52, %v884_v47  ;;  %v7851_v56 = vpop.permute.xlu1 %995 }
 0x18c   :  { %v955_v13 = vmul.f32 %v6964_v4, %v929_v61  ;;  %v956_v14 = vmul.f32 %v11282_v63, %v927_v18  ;;  %v990_v27 = vpop.permute.xlu2 %989  ;;  %v7870_v47 = vpop.f32.mrf.mxu0 }
 0x18d   :  { %11291 = vst [vmem:[#allocation62_spill] sm:$0xff] %v7870_v47  ;;  %v1068_v63 = vsel %vm319_vm3, %v990_v27, %v994_v43 }
 0x18e   :  { %1843 = vmatpush.msra.mxu0 %v955_v13  ;;  %1872 = vmatpush.msra.mxu1 %v956_v14  ;;  %v7858_v6 = vpop.f32.mrf.mxu2  ;;  %v7860_v28 = vpop.f32.mrf.mxu3 }
 0x18f   :  { %11289 = vst [vmem:[#allocation60_spill] sm:$0xff] %v7858_v6  ;;  %5948 = vmatmul.msk.f32.vlgmr.msrb.gmra.mxu0 %vm1107_vm11, %v7506_v23 }
 0x190   :  { %11290 = vst [vmem:[#allocation61_spill] sm:$0xff] %v7860_v28  ;;  %1958 = vmatpush.msrb.mxu0 %v975_v54  ;;  %v7886_v28 = vpop.f32.mrf.mxu1 }
 0x191   :  { %5973 = vmatmul.msk.f32.gmra.mxu2 %vm1107_vm11, %v7536_v40  ;;  %5978 = vmatmul.msk.f32.gmra.mxu3 %vm1107_vm11, %v7553_v49  ;;  %11292 = vst [vmem:[#allocation63_spill] sm:$0xff] %v7886_v28 }
 0x192   :  { %5955 = vmatmul.msk.f32.gmra.mxu1 %vm1107_vm11, %v7583_v44  ;;  %v906_v52 = vpop.permute.xlu0 %905 }
 0x193   :  { %v918_v54 = vsel %vm441_vm2, %v906_v52, %v7740_v53  ;;  %v920_v18 = vsel %vm441_vm2, %v7783_v58, %v906_v52  ;;  %v986_v14 = vpop.permute.xlu1 %985  ;;  %v11294_v58 = vld [vmem:[#allocation16_spill] sm:$0xff] }
 0x194   :  { %v976_v61 = vmul.f32 %v7255_v62, %v920_v18  ;;  %v977_v13 = vmul.f32 %v7202_v8, %v918_v54  ;;  %v984_v4 = vpop.permute.xlu2 %983  ;;  %v1093_v52 = vmul.f32 %v11294_v58, %v1068_v63  ;;  %v1070_v43 = vsel %vm319_vm3, %v986_v14, %v990_v27  ;;  %v7914_v27 = vpop.f32.mrf.mxu0  ;;  %v11297_v8 = vld [vmem:[#allocation30_spill] sm:$0xff] }
 0x195   :  { %11296 = vst [vmem:[#allocation66_spill] sm:$0xff] %v7914_v27 }
 0x196   :  { %1987 = vmatpush.msrb.mxu1 %v976_v61  ;;  %2016 = vmatpush.msrb.mxu2 %v977_v13  ;;  %v7889_v53 = vpop.f32.mrf.mxu2  ;;  %v7894_v54 = vpop.f32.mrf.mxu3 }
 0x197   :  { %11293 = vst [vmem:[#allocation64_spill] sm:$0xff] %v7889_v53  ;;  %5949 = vmatmul.msk.f32.gmra.mxu0 %vm1107_vm11, %v7536_v40  ;;  %v11314_v53 = vld [vmem:[#allocation52_spill] sm:$0xff] }
 0x198   :  { %2017 = vmatpush.msrb.mxu2 %v961_v2  ;;  %11295 = vst [vmem:[#allocation65_spill] sm:$0xff] %v7894_v54  ;;  %v1092_v54 = vmul.f32 %v11297_v8, %v1070_v43 }
 0x199   :  { %5974 = vmatmul.msk.f32.gmra.mxu2 %vm1107_vm11, %v7553_v49  ;;  %5979 = vmatmul.msk.f32.gmra.mxu3 %vm1107_vm11, %v7583_v44 }
 0x19a   :  { %5968 = vmatmul.msk.f32.vlgmr.msra.gmra.mxu1 %vm1107_vm11, %v7506_v23  ;;  %2144 = vmatpush.msra.mxu2 %v1093_v52  ;;  %v900_v33 = vpop.permute.xlu0 %899 }
 0x19b   :  { %v919_v63 = vsel %vm441_vm2, %v900_v33, %v7780_v41  ;;  %v921_v18 = vsel %vm441_vm2, %v7693_v34, %v900_v33  ;;  %v7917_v52 = vpop.permute.xlu1 %1013  ;;  %v7923_v34 = vpop.f32.mrf.mxu1 }
 0x19c   :  { %v959_v61 = vmul.f32 %v7243_v50, %v921_v18  ;;  %v960_v13 = vmul.f32 %v7255_v62, %v919_v63  ;;  %v7912_v2 = vpop.permute.xlu2 %1007  ;;  %11299 = vst [vmem:[#allocation68_spill] sm:$0xff] %v7923_v34 }
 0x19e   :  { %1959 = vmatpush.msrb.mxu0 %v959_v61  ;;  %1988 = vmatpush.msrb.mxu1 %v960_v13  ;;  %v7919_v5 = vpop.f32.mrf.mxu2  ;;  %v7931_v43 = vpop.f32.mrf.mxu3 }
 0x19f   :  { %11298 = vst [vmem:[#allocation67_spill] sm:$0xff] %v7919_v5  ;;  %5950 = vmatmul.msk.f32.gmra.mxu0 %vm1107_vm11, %v7553_v49  ;;  %v7941_v61 = vpop.f32.mrf.mxu0  ;;  %v11305_v5 = vld [vmem:[#allocation44_spill] sm:$0xff] }
 0x1a0   :  { %2115 = vmatpush.msra.mxu1 %v1092_v54  ;;  %11300 = vst [vmem:[#allocation69_spill] sm:$0xff] %v7931_v43 }
 0x1a1   :  { %5975 = vmatmul.msk.f32.gmra.mxu2 %vm1107_vm11, %v7583_v44  ;;  %5992 = vmatmul.msk.f32.vlgmr.msrb.gmra.mxu3 %vm1107_vm11, %v7506_v23  ;;  %11302 = vst [vmem:[#allocation71_spill] sm:$0xff] %v7941_v61 }
 0x1a2   :  { %5969 = vmatmul.msk.f32.gmra.mxu1 %vm1107_vm11, %v7536_v40  ;;  %v992_v41 = vpop.permute.xlu0 %991 }
 0x1a3   :  { %v1065_v33 = vsel %vm319_vm3, %v992_v41, %v7851_v56  ;;  %v7945_v13 = vpop.permute.xlu1 %981  ;;  %v7951_v50 = vpop.f32.mrf.mxu1 }
 0x1a4   :  { %v1078_v54 = vmul.f32 %v11284_v46, %v1065_v33  ;;  %v7937_v63 = vpop.permute.xlu2 %979  ;;  %11303 = vst [vmem:[#allocation72_spill] sm:$0xff] %v7951_v50 }
 0x1a5   :  { %v1071_v50 = vsel %vm319_vm3, %v7937_v63, %v984_v4 }
 0x1a6   :  { %2174 = vmatpush.msra.mxu3 %v1078_v54  ;;  %v7939_v18 = vpop.f32.mrf.mxu2  ;;  %v1072_v54 = vsel %vm319_vm3, %v7945_v13, %v986_v14 }
 0x1a7   :  { %11301 = vst [vmem:[#allocation70_spill] sm:$0xff] %v7939_v18  ;;  %5951 = vmatmul.msk.f32.gmra.mxu0 %vm1107_vm11, %v7583_v44  ;;  %v7964_v18 = vpop.f32.mrf.mxu3  ;;  %v1091_v43 = vmul.f32 %v11305_v5, %v1072_v54 }
 0x1a8   :  { %11304 = vst [vmem:[#allocation73_spill] sm:$0xff] %v7964_v18 }
 0x1a9   :  { %5988 = vmatmul.msk.f32.vlgmr.msrb.gmra.mxu2 %vm1107_vm11, %v7506_v23  ;;  %5993 = vmatmul.msk.f32.gmra.mxu3 %vm1107_vm11, %v7536_v40 }
 0x1aa   :  { %5970 = vmatmul.msk.f32.gmra.mxu1 %vm1107_vm11, %v7553_v49  ;;  %v988_v33 = vpop.permute.xlu0 %987 }
 0x1ab   :  { %v1067_v46 = vsel %vm319_vm3, %v988_v33, %v992_v41  ;;  %v1069_v62 = vsel %vm319_vm3, %v984_v4, %v988_v33  ;;  %v1004_v4 = vpop.permute.xlu1 %1003 }
 0x1ac   :  { %v1076_v27 = vmul.f32 %v11297_v8, %v1069_v62  ;;  %v1077_v61 = vmul.f32 %v11294_v58, %v1067_v46  ;;  %v7970_v14 = vpop.permute.xlu2 %1001  ;;  %v1075_v62 = vmul.f32 %v11305_v5, %v1071_v50  ;;  %v7977_v46 = vpop.f32.mrf.mxu0 }
 0x1ad   :  { %11307 = vst [vmem:[#allocation75_spill] sm:$0xff] %v7977_v46 }
 0x1ae   :  { %2116 = vmatpush.msra.mxu1 %v1076_v27  ;;  %2145 = vmatpush.msra.mxu2 %v1077_v61  ;;  %v7972_v41 = vpop.f32.mrf.mxu2  ;;  %v7985_v61 = vpop.f32.mrf.mxu1 }
 0x1af   :  { %11306 = vst [vmem:[#allocation74_spill] sm:$0xff] %v7972_v41  ;;  %5964 = vmatmul.msk.f32.vlgmr.msra.gmra.mxu0 %vm1107_vm11, %v7506_v23  ;;  %v7991_v54 = vpop.f32.mrf.mxu3  ;;  %v8019_v41 = vld [vmem:[#allocation5 + $0x40] sm:$0xff] }
 0x1b0   :  { %2086 = vmatpush.msra.mxu0 %v1091_v43  ;;  %11308 = vst [vmem:[#allocation76_spill] sm:$0xff] %v7985_v61  ;;  %v11309_v43 = vld [vmem:[#allocation31_spill] sm:$0xff] }
 0x1b1   :  { %5989 = vmatmul.msk.f32.gmra.mxu2 %vm1107_vm11, %v7536_v40  ;;  %5994 = vmatmul.msk.f32.gmra.mxu3 %vm1107_vm11, %v7553_v49 }
 0x1b2   :  { %5971 = vmatmul.msk.f32.gmra.mxu1 %vm1107_vm11, %v7583_v44  ;;  %2087 = vmatpush.msra.mxu0 %v1075_v62  ;;  %v1010_v27 = vpop.permute.xlu0 %1009 }
 0x1b3   :  { %v1058_v50 = vsel %vm319_vm3, %v1010_v27, %v7917_v52  ;;  %v1026_v58 = vpop.permute.xlu1 %1025 }
 0x1b4   :  { %v1098_v33 = vmul.f32 %v11309_v43, %v1058_v50  ;;  %v7997_v8 = vpop.permute.xlu2 %1029  ;;  %v8007_v50 = vpop.f32.mrf.mxu0 }
 0x1b5   :  { %11311 = vst [vmem:[#allocation78_spill] sm:$0xff] %v8007_v50  ;;  %v1050_v46 = vsel %vm319_vm3, %v1026_v58, %v7997_v8  ;;  %v11313_v50 = vld [vmem:[#allocation53_spill] sm:$0xff] }
 0x1b6   :  { %2289 = vmatpush.msrb.mxu3 %v1098_v33  ;;  %v7993_v5 = vpop.f32.mrf.mxu2  ;;  %v1102_v34 = vmul.f32 %v11313_v50, %v1050_v46 }
 0x1b7   :  { %11310 = vst [vmem:[#allocation77_spill] sm:$0xff] %v7993_v5  ;;  %5965 = vmatmul.msk.f32.gmra.mxu0 %vm1107_vm11, %v7536_v40  ;;  %v8014_v5 = vpop.f32.mrf.mxu1 }
 0x1b8   :  { %11312 = vst [vmem:[#allocation79_spill] sm:$0xff] %v8014_v5  ;;  %v8026_v28 = vpop.f32.mrf.mxu3 }
 0x1b9   :  { %5990 = vmatmul.msk.f32.gmra.mxu2 %vm1107_vm11, %v7553_v49  ;;  %5995 = vmatmul.msk.f32.gmra.mxu3 %vm1107_vm11, %v7583_v44 }
 0x1ba   :  { %5984 = vmatmul.msk.f32.vlgmr.msrb.gmra.mxu1 %vm1107_vm11, %v7506_v23  ;;  %v8005_v62 = vpop.permute.xlu0 %1011 }
 0x1bb   :  { %v1057_v33 = vsel %vm319_vm3, %v7912_v2, %v8005_v62 }
 0x1bc   :  { %v1082_v61 = vmul.f32 %v11309_v43, %v1057_v33  ;;  %v1059_v43 = vsel %vm319_vm3, %v1004_v4, %v7912_v2  ;;  %v8044_v9 = vpop.f32.mrf.mxu0 }
 0x1bd   :  { %11316 = vst [vmem:[#allocation80_spill] sm:$0xff] %v8044_v9  ;;  %v1081_v2 = vmul.f32 %v11315_v48, %v1059_v43  ;;  %v8058_v9 = vpop.permute.xlu1 %1027 }
 0x1be   :  { %2290 = vmatpush.msrb.mxu3 %v1082_v61  ;;  %v8021_v18 = vpop.f32.mrf.mxu2  ;;  %v1022_v61 = vpop.permute.xlu2 %1021 }
 0x1bf   :  { %5966 = vmatmul.msk.f32.gmra.mxu0 %vm1107_vm11, %v7553_v49 }
 0x1c1   :  { %5991 = vmatmul.msk.f32.gmra.mxu2 %vm1107_vm11, %v7583_v44  ;;  %6008 = vmatmul.msk.f32.vlgmr.msra.gmra.mxu3 %vm1107_vm11, %v8019_v41 }
 0x1c2   :  { %5985 = vmatmul.msk.f32.gmra.mxu1 %vm1107_vm11, %v7536_v40  ;;  %2405 = vmatpush.msra.mxu3 %v1102_v34  ;;  %v1006_v33 = vpop.permute.xlu0 %1005  ;;  %v1052_v34 = vsel %vm319_vm3, %v1022_v61, %v1026_v58  ;;  %v1064_v58 = vsel %vm319_vm3, %v7821_v12, %v7970_v14 }
 0x1c3   :  { %v1060_v46 = vsel %vm319_vm3, %v1006_v33, %v1010_v27  ;;  %v1062_v5 = vsel %vm319_vm3, %v7970_v14, %v1006_v33  ;;  %v8051_v27 = vpop.f32.mrf.mxu1 }
 0x1c4   :  { %v1096_v47 = vmul.f32 %v11314_v53, %v1062_v5  ;;  %v1097_v6 = vmul.f32 %v11315_v48, %v1060_v46  ;;  %11317 = vst [vmem:[#allocation81_spill] sm:$0xff] %v8051_v27  ;;  %v11318_v5 = vld [vmem:[#allocation43_spill] sm:$0xff]  ;;  %v8081_v3 = vpop.f32.mrf.mxu0 }
 0x1c5   :  { %v1101_v46 = vmul.f32 %v11318_v5, %v1052_v34  ;;  %v11319_v48 = vld [vmem:[#allocation51_spill] sm:$0xff]  ;;  %11320 = vst [vmem:[#allocation82_spill] sm:$0xff] %v8081_v3 }
 0x1c6   :  { %2231 = vmatpush.msrb.mxu1 %v1096_v47  ;;  %2260 = vmatpush.msrb.mxu2 %v1097_v6  ;;  %v8055_v33 = vpop.f32.mrf.mxu2  ;;  %v8066_v6 = vpop.f32.mrf.mxu3  ;;  %v1095_v27 = vmul.f32 %v11319_v48, %v1064_v58 }
 0x1c7   :  { %5967 = vmatmul.msk.f32.gmra.mxu0 %vm1107_vm11, %v7583_v44 }
 0x1c8   :  { %2261 = vmatpush.msrb.mxu2 %v1081_v2 }
 0x1c9   :  { %6004 = vmatmul.msk.f32.vlgmr.msra.gmra.mxu2 %vm1107_vm11, %v8019_v41  ;;  %6009 = vmatmul.msk.f32.gmra.mxu3 %vm1107_vm11, %v8049_v19 }
 0x1ca   :  { %5986 = vmatmul.msk.f32.gmra.mxu1 %vm1107_vm11, %v7553_v49  ;;  %2376 = vmatpush.msra.mxu2 %v1101_v46  ;;  %v1000_v47 = vpop.permute.xlu0 %999  ;;  %v8079_v46 = vld [vmem:[#allocation5 + $0x70] sm:$0xff] }
 0x1cb   :  { %v1061_v43 = vsel %vm319_vm3, %v1000_v47, %v1004_v4  ;;  %v1063_v2 = vsel %vm319_vm3, %v7851_v56, %v1000_v47  ;;  %v8086_v14 = vpop.f32.mrf.mxu1  ;;  %v1018_v47 = vpop.permute.xlu1 %1017 }
 0x1cc   :  { %v1080_v34 = vmul.f32 %v11314_v53, %v1061_v43  ;;  %v1079_v12 = vmul.f32 %v11319_v48, %v1063_v2  ;;  %v1054_v43 = vsel %vm319_vm3, %v1018_v47, %v1022_v61  ;;  %v8108_v2 = vpop.f32.mrf.mxu0 }
 0x1cd   :  { %11321 = vst [vmem:[#allocation83_spill] sm:$0xff] %v8108_v2 }
 0x1ce   :  { %2232 = vmatpush.msrb.mxu1 %v1080_v34  ;;  %v8092_v56 = vpop.f32.mrf.mxu2  ;;  %v8104_v34 = vld [vmem:[#allocation5 + $0x88] sm:$0xff] }
 0x1cf   :  { %5980 = vmatmul.msk.f32.vlgmr.msrb.gmra.mxu0 %vm1107_vm11, %v7506_v23 }
 0x1d0   :  { %2202 = vmatpush.msrb.mxu0 %v1095_v27  ;;  %v8099_v27 = vpop.f32.mrf.mxu3 }
 0x1d1   :  { %6005 = vmatmul.msk.f32.gmra.mxu2 %vm1107_vm11, %v8049_v19  ;;  %6010 = vmatmul.msk.f32.gmra.mxu3 %vm1107_vm11, %v8079_v46 }
 0x1d2   :  { %5987 = vmatmul.msk.f32.gmra.mxu1 %vm1107_vm11, %v7583_v44  ;;  %2203 = vmatpush.msrb.mxu0 %v1079_v12  ;;  %v1024_v4 = vpop.permute.xlu0 %1023  ;;  %v11322_v12 = vld [vmem:[#allocation47_spill] sm:$0xff] }
 0x1d3   :  { %v1049_v23 = vsel %vm319_vm3, %v1024_v4, %v8058_v9  ;;  %v1100_v48 = vmul.f32 %v11322_v12, %v1054_v43 }
 0x1d4   :  { %v1086_v58 = vmul.f32 %v11313_v50, %v1049_v23  ;;  %v1016_v23 = vpop.permute.xlu2 %1015 }
 0x1d6   :  { %2406 = vmatpush.msra.mxu3 %v1086_v58  ;;  %v8117_v58 = vpop.f32.mrf.mxu1  ;;  %v8123_v50 = vpop.f32.mrf.mxu2 }
 0x1d7   :  { %5981 = vmatmul.msk.f32.gmra.mxu0 %vm1107_vm11, %v7536_v40 }
 0x1d8   :  { %v8127_v2 = vpop.f32.mrf.mxu3 }
 0x1d9   :  { %6006 = vmatmul.msk.f32.gmra.mxu2 %vm1107_vm11, %v8079_v46  ;;  %6011 = vmatmul.msk.f32.gmra.mxu3 %vm1107_vm11, %v8104_v34 }
 0x1da   :  { %6000 = vmatmul.msk.f32.vlgmr.msra.gmra.mxu1 %vm1107_vm11, %v8019_v41  ;;  %v1020_v61 = vpop.permute.xlu0 %1019 }
 0x1db   :  { %2347 = vmatpush.msra.mxu1 %v1100_v48  ;;  %v1051_v40 = vsel %vm319_vm3, %v1020_v61, %v1024_v4  ;;  %v1053_v43 = vsel %vm319_vm3, %v1016_v23, %v1020_v61  ;;  %v1040_v48 = vpop.permute.xlu1 %1039  ;;  %v8137_v61 = vpop.f32.mrf.mxu0 }
 0x1dc   :  { %v1084_v53 = vmul.f32 %v11322_v12, %v1053_v43  ;;  %v1085_v3 = vmul.f32 %v11318_v5, %v1051_v40  ;;  %11323 = vst [vmem:[#allocation84_spill] sm:$0xff] %v8137_v61  ;;  %v11324_v40 = vld [vmem:[#allocation33_spill] sm:$0xff] }
 0x1de   :  { %2348 = vmatpush.msra.mxu1 %v1084_v53  ;;  %2377 = vmatpush.msra.mxu2 %v1085_v3  ;;  %v1073_v3 = vsel %vm319_vm3, %v1040_v48, %v7937_v63  ;;  %v1038_v53 = vpop.permute.xlu2 %1037  ;;  %v8146_v12 = vpop.f32.mrf.mxu1 }
 0x1df   :  { %5982 = vmatmul.msk.f32.gmra.mxu0 %vm1107_vm11, %v7553_v49  ;;  %v8150_v60 = vpop.f32.mrf.mxu2  ;;  %v1090_v61 = vmul.f32 %v11324_v40, %v1073_v3 }
 0x1e0   :  { %11325 = vst [vmem:[#allocation85_spill] sm:$0xff] %v8150_v60  ;;  %v8155_v63 = vpop.f32.mrf.mxu3 }
 0x1e1   :  { %6007 = vmatmul.msk.f32.gmra.mxu2 %vm1107_vm11, %v8104_v34  ;;  %6024 = vmatmul.msk.f32.vlgmr.msrb.gmra.mxu3 %vm1107_vm11, %v8019_v41 }
 0x1e2   :  { %6001 = vmatmul.msk.f32.gmra.mxu1 %vm1107_vm11, %v8049_v19  ;;  %v1042_v4 = vpop.permute.xlu0 %1041 }
 0x1e3   :  { %v1074_v49 = vsel %vm319_vm3, %v1042_v4, %v7945_v13  ;;  %v1044_v5 = vsel %vm319_vm3, %v1038_v53, %v1042_v4 }
 0x1e4   :  { %v1106_v43 = vmul.f32 %v11324_v40, %v1074_v49  ;;  %v1105_v13 = vmul.f32 %v11326_v39, %v1044_v5  ;;  %v1055_v49 = vsel %vm319_vm3, %v8005_v62, %v1016_v23 }
 0x1e6   :  { %2521 = vmatpush.msrb.mxu3 %v1106_v43  ;;  %v11327_v43 = vld [vmem:[#allocation46_spill] sm:$0xff] }
 0x1e7   :  { %5983 = vmatmul.msk.f32.gmra.mxu0 %vm1107_vm11, %v7583_v44  ;;  %v1056_v44 = vsel %vm319_vm3, %v7917_v52, %v1018_v47  ;;  %v8178_v24 = vpop.f32.mrf.mxu2  ;;  %v1083_v52 = vmul.f32 %v11327_v43, %v1055_v49  ;;  %v1034_v47 = vpop.permute.xlu1 %1033 }
 0x1e8   :  { %2522 = vmatpush.msrb.mxu3 %v1090_v61  ;;  %v1099_v40 = vmul.f32 %v11327_v43, %v1056_v44  ;;  %v8187_v62 = vpop.f32.mrf.mxu3 }
 0x1e9   :  { %6020 = vmatmul.msk.f32.vlgmr.msrb.gmra.mxu2 %vm1107_vm11, %v8019_v41  ;;  %6025 = vmatmul.msk.f32.gmra.mxu3 %vm1107_vm11, %v8049_v19 }
 0x1ea   :  { %6002 = vmatmul.msk.f32.gmra.mxu1 %vm1107_vm11, %v8079_v46  ;;  %2492 = vmatpush.msrb.mxu2 %v1105_v13  ;;  %v1036_v4 = vpop.permute.xlu0 %1035  ;;  %v8176_v13 = vpop.f32.mrf.mxu1 }
 0x1eb   :  { %v1043_v3 = vsel %vm319_vm3, %v1036_v4, %v1040_v48  ;;  %v1046_v48 = vsel %vm319_vm3, %v1034_v47, %v1038_v53 }
 0x1ec   :  { %v8169_v5 = vpop.f32.mrf.mxu0  ;;  %v1089_v61 = vmul.f32 %v11326_v39, %v1043_v3 }
 0x1ee   :  { %2493 = vmatpush.msrb.mxu2 %v1089_v61  ;;  %v1104_v61 = vmul.f32 %v7324_v0, %v1046_v48 }
 0x1ef   :  { %5996 = vmatmul.msk.f32.vlgmr.msra.gmra.mxu0 %vm1107_vm11, %v8019_v41  ;;  %v8202_v49 = vpop.f32.mrf.mxu2 }
 0x1f0   :  { %2318 = vmatpush.msra.mxu0 %v1099_v40  ;;  %v1032_v40 = vpop.permute.xlu2 %1031 }
 0x1f1   :  { %6021 = vmatmul.msk.f32.gmra.mxu2 %vm1107_vm11, %v8049_v19  ;;  %6026 = vmatmul.msk.f32.gmra.mxu3 %vm1107_vm11, %v8079_v46  ;;  %v1045_v3 = vsel %vm319_vm3, %v1032_v40, %v1036_v4 }
 0x1f2   :  { %6003 = vmatmul.msk.f32.gmra.mxu1 %vm1107_vm11, %v8104_v34  ;;  %2319 = vmatpush.msra.mxu0 %v1083_v52  ;;  %v1088_v53 = vmul.f32 %v7324_v0, %v1045_v3  ;;  %v8211_v52 = vpop.f32.mrf.mxu3  ;;  %v1048_v0 = vsel %vm319_vm3, %v7997_v8, %v1034_v47 }
 0x1f4   :  { %v8191_v23 = vpop.f32.mrf.mxu0 }
 0x1f7   :  { %v8195_v44 = vpop.f32.mrf.mxu1  ;;  %5997 = vmatmul.msk.f32.gmra.mxu0 %vm1107_vm11, %v8049_v19  ;;  %v8225_v48 = vpop.f32.mrf.mxu2 }
 0x1f8   :  { %11328 = vst [vmem:[#allocation86_spill] sm:$0xff] %v8195_v44  ;;  %v1047_v44 = vsel %vm319_vm3, %v8058_v9, %v1032_v40 }
 0x1f9   :  { %6022 = vmatmul.msk.f32.gmra.mxu2 %vm1107_vm11, %v8079_v46  ;;  %6027 = vmatmul.msk.f32.gmra.mxu3 %vm1107_vm11, %v8104_v34  ;;  %v1087_v8 = vmul.f32 %v7321_v57, %v1047_v44 }
 0x1fa   :  { %6016 = vmatmul.msk.f32.vlgmr.msrb.gmra.mxu1 %vm1107_vm11, %v8019_v41 }
 0x1fb   :  { %2463 = vmatpush.msrb.mxu1 %v1104_v61 }
 0x1fc   :  { %v8213_v39 = vpop.f32.mrf.mxu0 }
 0x1fd   :  { %2464 = vmatpush.msrb.mxu1 %v1088_v53 }
 0x1ff   :  { %v8215_v4 = vpop.f32.mrf.mxu1  ;;  %5998 = vmatmul.msk.f32.gmra.mxu0 %vm1107_vm11, %v8079_v46 }
 0x200   :  { %11329 = vst [vmem:[#allocation87_spill] sm:$0xff] %v8215_v4 }
 0x201   :  { %6023 = vmatmul.msk.f32.gmra.mxu2 %vm1107_vm11, %v8104_v34  ;;  %6040 = vmatmul.msk.f32.vlgmr.msra.gmra.mxu3 %vm1107_vm11, %v8019_v41 }
 0x202   :  { %6017 = vmatmul.msk.f32.gmra.mxu1 %vm1107_vm11, %v8049_v19 }
 0x204   :  { %v8227_v3 = vpop.f32.mrf.mxu0  ;;  %v8229_v61 = vpop.f32.mrf.mxu3 }
 0x205   :  { %11330 = vst [vmem:[#allocation88_spill] sm:$0xff] %v8229_v61 }
 0x207   :  { %v8231_v53 = vpop.f32.mrf.mxu1  ;;  %5999 = vmatmul.msk.f32.gmra.mxu0 %vm1107_vm11, %v8104_v34 }
 0x208   :  { %11331 = vst [vmem:[#allocation89_spill] sm:$0xff] %v8231_v53  ;;  %v1103_v53 = vmul.f32 %v7321_v57, %v1048_v0 }
 0x209   :  { %6036 = vmatmul.msk.f32.vlgmr.msra.gmra.mxu2 %vm1107_vm11, %v8019_v41  ;;  %6041 = vmatmul.msk.f32.gmra.mxu3 %vm1107_vm11, %v8049_v19 }
 0x20a   :  { %6018 = vmatmul.msk.f32.gmra.mxu1 %vm1107_vm11, %v8079_v46 }
 0x20c   :  { %v8244_v43 = vpop.f32.mrf.mxu0  ;;  %v8246_v61 = vpop.f32.mrf.mxu2 }
 0x20d   :  { %11332 = vst [vmem:[#allocation90_spill] sm:$0xff] %v8244_v43  ;;  %v8251_v4 = vpop.f32.mrf.mxu3 }
 0x20e   :  { %11333 = vst [vmem:[#allocation91_spill] sm:$0xff] %v8246_v61 }
 0x20f   :  { %11334 = vst [vmem:[#allocation92_spill] sm:$0xff] %v8251_v4  ;;  %v8254_v60 = vpop.f32.mrf.mxu1  ;;  %6012 = vmatmul.msk.f32.vlgmr.msrb.gmra.mxu0 %vm1107_vm11, %v8019_v41 }
 0x210   :  { %2434 = vmatpush.msrb.mxu0 %v1103_v53 }
 0x211   :  { %6037 = vmatmul.msk.f32.gmra.mxu2 %vm1107_vm11, %v8049_v19  ;;  %6042 = vmatmul.msk.f32.gmra.mxu3 %vm1107_vm11, %v8079_v46 }
 0x212   :  { %6019 = vmatmul.msk.f32.gmra.mxu1 %vm1107_vm11, %v8104_v34  ;;  %2435 = vmatpush.msrb.mxu0 %v1087_v8 }
 0x214   :  { %v8265_v9 = vpop.f32.mrf.mxu0  ;;  %v8267_v0 = vpop.f32.mrf.mxu2 }
 0x215   :  { %11335 = vst [vmem:[#allocation93_spill] sm:$0xff] %v8265_v9  ;;  %v8269_v47 = vpop.f32.mrf.mxu3 }
 0x216   :  { %11336 = vst [vmem:[#allocation94_spill] sm:$0xff] %v8267_v0 }
 0x217   :  { %11337 = vst [vmem:[#allocation95_spill] sm:$0xff] %v8269_v47  ;;  %v8271_v40 = vpop.f32.mrf.mxu1  ;;  %6013 = vmatmul.msk.f32.gmra.mxu0 %vm1107_vm11, %v8049_v19 }
 0x218   :  { %11338 = vst [vmem:[#allocation96_spill] sm:$0xff] %v8271_v40 }
 0x219   :  { %6038 = vmatmul.msk.f32.gmra.mxu2 %vm1107_vm11, %v8079_v46  ;;  %6043 = vmatmul.msk.f32.gmra.mxu3 %vm1107_vm11, %v8104_v34 }
 0x21a   :  { %6032 = vmatmul.msk.f32.vlgmr.msra.gmra.mxu1 %vm1107_vm11, %v8019_v41 }
 0x21c   :  { %v8281_v44 = vpop.f32.mrf.mxu0  ;;  %v8283_v53 = vpop.f32.mrf.mxu2 }
 0x21d   :  { %11339 = vst [vmem:[#allocation97_spill] sm:$0xff] %v8281_v44  ;;  %v8285_v8 = vpop.f32.mrf.mxu3 }
 0x21e   :  { %11340 = vst [vmem:[#allocation98_spill] sm:$0xff] %v8283_v53 }
 0x21f   :  { %11341 = vst [vmem:[#allocation99_spill] sm:$0xff] %v8285_v8  ;;  %v8287_v57 = vpop.f32.mrf.mxu1  ;;  %6014 = vmatmul.msk.f32.gmra.mxu0 %vm1107_vm11, %v8079_v46 }
 0x220   :  { %11342 = vst [vmem:[#allocation100_spill] sm:$0xff] %v8287_v57 }
 0x221   :  { %6039 = vmatmul.msk.f32.gmra.mxu2 %vm1107_vm11, %v8104_v34  ;;  %6056 = vmatmul.msk.f32.vlgmr.msrb.gmra.mxu3 %vm1107_vm11, %v8019_v41 }
 0x222   :  { %6033 = vmatmul.msk.f32.gmra.mxu1 %vm1107_vm11, %v8049_v19 }
 0x224   :  { %v8297_v31 = vpop.f32.mrf.mxu0  ;;  %v8299_v40 = vpop.f32.mrf.mxu2 }
 0x225   :  { %11343 = vst [vmem:[#allocation101_spill] sm:$0xff] %v8297_v31  ;;  %v8301_v9 = vpop.f32.mrf.mxu3 }
 0x226   :  { %11344 = vst [vmem:[#allocation102_spill] sm:$0xff] %v8299_v40 }
 0x227   :  { %11345 = vst [vmem:[#allocation103_spill] sm:$0xff] %v8301_v9  ;;  %v8303_v44 = vpop.f32.mrf.mxu1  ;;  %6015 = vmatmul.msk.f32.gmra.mxu0 %vm1107_vm11, %v8104_v34 }
 0x228   :  { %11346 = vst [vmem:[#allocation104_spill] sm:$0xff] %v8303_v44 }
 0x229   :  { %6052 = vmatmul.msk.f32.vlgmr.msrb.gmra.mxu2 %vm1107_vm11, %v8019_v41  ;;  %6057 = vmatmul.msk.f32.gmra.mxu3 %vm1107_vm11, %v8049_v19 }
 0x22a   :  { %6034 = vmatmul.msk.f32.gmra.mxu1 %vm1107_vm11, %v8079_v46 }
 0x22c   :  { %v8313_v57 = vpop.f32.mrf.mxu0  ;;  %v8315_v31 = vpop.f32.mrf.mxu2 }
 0x22d   :  { %11347 = vst [vmem:[#allocation105_spill] sm:$0xff] %v8313_v57  ;;  %v8317_v40 = vpop.f32.mrf.mxu3 }
 0x22e   :  { %11348 = vst [vmem:[#allocation106_spill] sm:$0xff] %v8315_v31 }
 0x22f   :  { %11349 = vst [vmem:[#allocation107_spill] sm:$0xff] %v8317_v40  ;;  %v8319_v9 = vpop.f32.mrf.mxu1  ;;  %6028 = vmatmul.msk.f32.vlgmr.msra.gmra.mxu0 %vm1107_vm11, %v8019_v41 }
 0x230   :  { %11350 = vst [vmem:[#allocation108_spill] sm:$0xff] %v8319_v9 }
 0x231   :  { %6053 = vmatmul.msk.f32.gmra.mxu2 %vm1107_vm11, %v8049_v19  ;;  %6058 = vmatmul.msk.f32.gmra.mxu3 %vm1107_vm11, %v8079_v46 }
 0x232   :  { %6035 = vmatmul.msk.f32.gmra.mxu1 %vm1107_vm11, %v8104_v34 }
 0x234   :  { %v8329_v44 = vpop.f32.mrf.mxu0  ;;  %v8331_v57 = vpop.f32.mrf.mxu2 }
 0x235   :  { %11351 = vst [vmem:[#allocation109_spill] sm:$0xff] %v8329_v44  ;;  %v8333_v31 = vpop.f32.mrf.mxu3 }
 0x236   :  { %11352 = vst [vmem:[#allocation110_spill] sm:$0xff] %v8331_v57 }
 0x237   :  { %11353 = vst [vmem:[#allocation111_spill] sm:$0xff] %v8333_v31  ;;  %v8335_v40 = vpop.f32.mrf.mxu1  ;;  %6029 = vmatmul.msk.f32.gmra.mxu0 %vm1107_vm11, %v8049_v19 }
 0x238   :  { %11354 = vst [vmem:[#allocation112_spill] sm:$0xff] %v8335_v40 }
 0x239   :  { %6054 = vmatmul.msk.f32.gmra.mxu2 %vm1107_vm11, %v8079_v46  ;;  %6059 = vmatmul.msk.f32.gmra.mxu3 %vm1107_vm11, %v8104_v34 }
 0x23a   :  { %6048 = vmatmul.msk.f32.vlgmr.msrb.gmra.mxu1 %vm1107_vm11, %v8019_v41 }
 0x23c   :  { %v8345_v9 = vpop.f32.mrf.mxu0  ;;  %v8347_v44 = vpop.f32.mrf.mxu2 }
 0x23d   :  { %11355 = vst [vmem:[#allocation113_spill] sm:$0xff] %v8345_v9  ;;  %v8349_v57 = vpop.f32.mrf.mxu3 }
 0x23e   :  { %11356 = vst [vmem:[#allocation114_spill] sm:$0xff] %v8347_v44 }
 0x23f   :  { %11357 = vst [vmem:[#allocation115_spill] sm:$0xff] %v8349_v57  ;;  %v8351_v31 = vpop.f32.mrf.mxu1  ;;  %6030 = vmatmul.msk.f32.gmra.mxu0 %vm1107_vm11, %v8079_v46 }
 0x240   :  { %11358 = vst [vmem:[#allocation116_spill] sm:$0xff] %v8351_v31  ;;  %v1672_v31 = vadd.f32 %v8021_v18, %v7557_v51  ;;  %v1643_v18 = vadd.f32 %v8086_v14, %v7559_v29  ;;  %v1710_v29 = vadd.f32 %v8099_v27, %v7585_v32 }
 0x241   :  { %6055 = vmatmul.msk.f32.gmra.mxu2 %vm1107_vm11, %v8104_v34 }
 0x242   :  { %6049 = vmatmul.msk.f32.gmra.mxu1 %vm1107_vm11, %v8049_v19 }
 0x244   :  { %v8359_v40 = vpop.f32.mrf.mxu0  ;;  %v8361_v53 = vpop.f32.mrf.mxu2 }
 0x245   :  { %11359 = vst [vmem:[#allocation117_spill] sm:$0xff] %v8359_v40  ;;  %v2176_v9 = vpop.f32.mrf.mxu3  ;;  %v8373_v40 = vpop.permute.xlu0 %2602 }
 0x246   :  { %11360 = vst [vmem:[#allocation118_spill] sm:$0xff] %v8361_v53  ;;  %v1701_v53 = vadd.f32 %v7991_v54, %v7503_v25 }
 0x247   :  { %v8363_v0 = vpop.f32.mrf.mxu1  ;;  %6031 = vmatmul.msk.f32.gmra.mxu0 %vm1107_vm11, %v8104_v34 }
 0x248   :  { %11361 = vst [vmem:[#allocation119_spill] sm:$0xff] %v8363_v0  ;;  %v2539_v47 = vadd.f32 %v2176_v9, %v1701_v53  ;;  %v1707_v9 = vadd.f32 %v8066_v6, %v7551_v37  ;;  %v1646_v37 = vadd.f32 %v8117_v58, %v7591_v17  ;;  %v8412_v6 = vpop.permute.xlu2 %2617  ;;  %v1678_v17 = vadd.f32 %v8092_v56, %v7621_v59  ;;  %v8424_v58 = vpop.permute.xlu1 %2607 }
 0x24a   :  { %6050 = vmatmul.msk.f32.gmra.mxu1 %vm1107_vm11, %v8079_v46  ;;  %v2623_v25 = vadd.f32 %v8373_v40, %v2539_v47  ;;  %v1704_v47 = vadd.f32 %v8026_v28, %v7533_v7 }
 0x24c   :  { %v8371_v44 = vpop.f32.mrf.mxu0  ;;  %v2147_v57 = vpop.f32.mrf.mxu2 }
 0x24d   :  { %v2538_v61 = vadd.f32 %v2147_v57, %v1672_v31  ;;  %v2179_v8 = vpop.f32.mrf.mxu3  ;;  %v8416_v7 = vpop.permute.xlu0 %2612 }
 0x24f   :  { %v2622_v0 = vadd.f32 %v8373_v40, %v2538_v61  ;;  %v8378_v4 = vpop.f32.mrf.mxu1  ;;  %6044 = vmatmul.msk.f32.vlgmr.msrb.gmra.mxu0 %vm1107_vm11, %v8019_v41  ;;  %v8395_v61 = vmax.f32 %v2623_v25, 0.0 }
 0x251   :  { %v8382_v43 = vmax.f32 %v2622_v0, 0.0 }
 0x252   :  { %6051 = vmatmul.msk.f32.gmra.mxu1 %vm1107_vm11, %v8104_v34 }
 0x253   :  { %2772 = vrot.lane.b32.xlu0 %v8382_v43, %s6331_s2 }
 0x254   :  { %v8388_v31 = vpop.f32.mrf.mxu0  ;;  %v2150_v57 = vpop.f32.mrf.mxu2 }
 0x255   :  { %v2182_v51 = vpop.f32.mrf.mxu3 }
 0x256   :  { %v2571_v14 = vadd.f32 %v2182_v51, %v1707_v9 }
 0x257   :  { %v2118_v54 = vpop.f32.mrf.mxu1  ;;  %6045 = vmatmul.msk.f32.gmra.mxu0 %vm1107_vm11, %v8049_v19 }
 0x258   :  { %v2537_v41 = vadd.f32 %v2118_v54, %v1643_v18  ;;  %v2555_v54 = vadd.f32 %v2179_v8, %v1704_v47  ;;  %v2655_v28 = vadd.f32 %v8416_v7, %v2571_v14  ;;  %v1675_v47 = vadd.f32 %v8055_v33, %v7589_v10 }
 0x25a   :  { %v2621_v0 = vadd.f32 %v8373_v40, %v2537_v41  ;;  %v2639_v8 = vadd.f32 %v8424_v58, %v2555_v54 }
 0x25b   :  { %3036 = vrot.lane.b32.xlu0 %v8395_v61, %s6330_s0 }
 0x25c   :  { %v8406_v53 = vpop.f32.mrf.mxu0  ;;  %v2153_v19 = vpop.f32.mrf.mxu2  ;;  %v8408_v25 = vmax.f32 %v2621_v0, 0.0  ;;  %v8443_v10 = vmax.f32 %v2639_v8, 0.0 }
 0x25d   :  { %v2185_v18 = vpop.f32.mrf.mxu3 }
 0x25e   :  { %11362 = vst [vmem:[#allocation120_spill] sm:$0xff] %v8408_v25  ;;  %v2587_v41 = vadd.f32 %v2185_v18, %v1710_v29  ;;  %2764 = vrot.lane.b32.xlu2 %v8408_v25, %s6331_s2  ;;  %v2570_v29 = vadd.f32 %v2153_v19, %v1678_v17  ;;  %v8437_v18 = vmax.f32 %v2655_v28, 0.0 }
 0x25f   :  { %v2121_v32 = vpop.f32.mrf.mxu1  ;;  %6046 = vmatmul.msk.f32.gmra.mxu0 %vm1107_vm11, %v8079_v46  ;;  %v1681_v46 = vadd.f32 %v8123_v50, %v7654_v36 }
 0x260   :  { %v2671_v27 = vadd.f32 %v8412_v6, %v2587_v41  ;;  %v2553_v51 = vadd.f32 %v2121_v32, %v1646_v37  ;;  %v2554_v37 = vadd.f32 %v2150_v57, %v1675_v47  ;;  %v2654_v36 = vadd.f32 %v8416_v7, %v2570_v29 }
 0x261   :  { %v1614_v32 = vadd.f32 %v8169_v5, %v7632_v15  ;;  %v1652_v47 = vadd.f32 %v8176_v13, %v7650_v45  ;;  %v1617_v45 = vadd.f32 %v8191_v23, %v7659_v42  ;;  %v1823_v23 = vadd.f32 %v8187_v62, %v7671_v21 }
 0x262   :  { %v8427_v9 = vmax.f32 %v2671_v27, 0.0  ;;  %v2637_v0 = vadd.f32 %v8424_v58, %v2553_v51  ;;  %v2638_v57 = vadd.f32 %v8424_v58, %v2554_v37  ;;  %v8457_v28 = vmax.f32 %v2654_v36, 0.0 }
 0x263   :  { %v1649_v27 = vadd.f32 %v8146_v12, %v7623_v30 }
 0x264   :  { %3356 = vmatpush.msra.mxu3 %v8427_v9  ;;  %v8435_v14 = vpop.f32.mrf.mxu0  ;;  %v2156_v59 = vpop.f32.mrf.mxu2  ;;  %v2701_v56 = vmax.f32 %v2637_v0, 0.0  ;;  %v8464_v0 = vmax.f32 %v2638_v57, 0.0 }
 0x265   :  { %v2586_v54 = vadd.f32 %v2156_v59, %v1681_v46  ;;  %v8439_v41 = vpop.f32.mrf.mxu3 }
 0x266   :  { %2766 = vrot.lane.b32.xlu0 %v2701_v56, %s6331_s2  ;;  %3357 = vmatpush.msra.mxu3 %v8437_v18 }
 0x267   :  { %v2670_v50 = vadd.f32 %v8412_v6, %v2586_v54  ;;  %v2124_v33 = vpop.f32.mrf.mxu1  ;;  %6047 = vmatmul.msk.f32.gmra.mxu0 %vm1107_vm11, %v8104_v34 }
 0x268   :  { %3358 = vmatpush.msra.mxu3 %v8443_v10  ;;  %v2569_v15 = vadd.f32 %v2124_v33, %v1649_v27  ;;  %v1620_v27 = vadd.f32 %v8213_v39, %v7683_v38  ;;  %v1817_v38 = vadd.f32 %v8127_v2, %v7613_v1  ;;  %v1791_v1 = vadd.f32 %v8178_v24, %v7699_v16 }
 0x269   :  { %v8451_v19 = vmax.f32 %v2670_v50, 0.0 }
 0x26a   :  { %3359 = vmatpush.msra.mxu3 %v8395_v61  ;;  %v2653_v29 = vadd.f32 %v8416_v7, %v2569_v15 }
 0x26b   :  { %3333 = vmatpush.msra.mxu2 %v8451_v19 }
 0x26c   :  { %v2089_v51 = vpop.f32.mrf.mxu0  ;;  %v8461_v34 = vpop.f32.mrf.mxu2  ;;  %v8485_v33 = vmax.f32 %v2653_v29, 0.0  ;;  %v1623_v29 = vadd.f32 %v8227_v3, %v7705_v20 }
 0x26d   :  { %v2536_v17 = vadd.f32 %v2089_v51, %v1614_v32  ;;  %v2295_v8 = vpop.f32.mrf.mxu3  ;;  %3334 = vmatpush.msra.mxu2 %v8457_v28  ;;  %v1820_v51 = vadd.f32 %v8155_v63, %v7646_v26  ;;  %v2543_v26 = vadd.f32 %v8439_v41, %v1817_v38  ;;  %v1797_v41 = vadd.f32 %v8225_v48, %v7757_v11 }
 0x26e   :  { %3022 = vrot.lane.b32.xlu0 %v2701_v56, %s6330_s0 }
 0x26f   :  { %v2620_v5 = vadd.f32 %v8373_v40, %v2536_v17  ;;  %v2127_v46 = vpop.f32.mrf.mxu1  ;;  %3335 = vmatpush.msra.mxu2 %v8464_v0  ;;  %v1826_v17 = vadd.f32 %v8211_v52, %v7695_v22  ;;  %v2559_v39 = vadd.f32 %v2295_v8, %v1820_v51  ;;  %v2627_v24 = vadd.f32 %v8373_v40, %v2543_v26  ;;  %v11370_v26 = vld [vmem:[#allocation20_spill] sm:$0xff] }
 0x270   :  { %v2585_v30 = vadd.f32 %v2127_v46, %v1652_v47  ;;  %v1794_v46 = vadd.f32 %v8202_v49, %v7723_v55  ;;  %v11365_v55 = vld [vmem:[#allocation85_spill] sm:$0xff] }
 0x271   :  { %3336 = vmatpush.msra.mxu2 %v8382_v43  ;;  %v8472_v12 = vmax.f32 %v2620_v5, 0.0  ;;  %v2643_v2 = vadd.f32 %v8424_v58, %v2559_v39  ;;  %v1788_v16 = vadd.f32 %v11365_v55, %v7677_v35 }
 0x272   :  { %v2669_v59 = vadd.f32 %v8412_v6, %v2585_v30  ;;  %v8523_v30 = vld [vmem:[#allocation5 + $0x98] sm:$0xff] }
 0x273   :  { %11363 = vst [vmem:[#allocation121_spill] sm:$0xff] %v8472_v12  ;;  %2756 = vrot.lane.b32.xlu1 %v8472_v12, %s6331_s2  ;;  %6064 = vmatmul.msk.f32.vlgmr.msra.gmra.mxu2 %vm3268_vm7, %v8523_v30  ;;  %v8552_v35 = vmax.f32 %v2643_v2, 0.0 }
 0x274   :  { %v8480_v13 = vmax.f32 %v2669_v59, 0.0  ;;  %v2092_v37 = vpop.f32.mrf.mxu0  ;;  %v2266_v54 = vpop.f32.mrf.mxu2  ;;  %6066 = vmatmul.msk.f32.vlgmr.msra.gmra.mxu3 %vm3268_vm7, %v8523_v30 }
 0x275   :  { %v2552_v36 = vadd.f32 %v2092_v37, %v1617_v45  ;;  %v2298_v50 = vpop.f32.mrf.mxu3  ;;  %v2558_v20 = vadd.f32 %v2266_v54, %v1791_v1  ;;  %v2542_v37 = vadd.f32 %v8461_v34, %v1788_v16 }
 0x276   :  { %3310 = vmatpush.msra.mxu1 %v8480_v13  ;;  %3038 = vrot.lane.b32.xlu0 %v8443_v10, %s6330_s0  ;;  %v2575_v47 = vadd.f32 %v2298_v50, %v1823_v23  ;;  %v8559_v23 = vmax.f32 %v2627_v24, 0.0 }
 0x277   :  { %v2636_v57 = vadd.f32 %v8424_v58, %v2552_v36  ;;  %v8488_v32 = vpop.f32.mrf.mxu1  ;;  %v2626_v34 = vadd.f32 %v8373_v40, %v2542_v37 }
 0x278   :  { %3311 = vmatpush.msra.mxu1 %v8485_v33  ;;  %v2659_v22 = vadd.f32 %v8416_v7, %v2575_v47 }
 0x279   :  { %v8491_v42 = vmax.f32 %v2636_v57, 0.0  ;;  %v8592_v2 = vmax.f32 %v2626_v34, 0.0  ;;  %v11380_v34 = vld [vmem:[#allocation95_spill] sm:$0xff] }
 0x27a   :  { %3312 = vmatpush.msra.mxu1 %v2701_v56  ;;  %v8537_v11 = vmax.f32 %v2659_v22, 0.0  ;;  %v11371_v22 = vld [vmem:[#allocation87_spill] sm:$0xff] }
 0x27b   :  { %11364 = vst [vmem:[#allocation122_spill] sm:$0xff] %v8491_v42  ;;  %2758 = vrot.lane.b32.xlu2 %v8491_v42, %s6331_s2  ;;  %2780 = vrot.lane.b32.xlu1 %v8395_v61, %s6331_s2 }
 0x27c   :  { %3313 = vmatpush.msra.mxu1 %v8408_v25  ;;  %v2095_v21 = vpop.f32.mrf.mxu0  ;;  %v2269_v62 = vpop.f32.mrf.mxu2 }
 0x27d   :  { %v2568_v56 = vadd.f32 %v2095_v21, %v1620_v27  ;;  %v2301_v15 = vpop.f32.mrf.mxu3  ;;  %v2574_v59 = vadd.f32 %v2269_v62, %v1794_v46  ;;  %6062 = vmatmul.msk.f32.vlgmr.msra.gmra.mxu1 %vm3268_vm7, %v8523_v30  ;;  %v2642_v27 = vadd.f32 %v8424_v58, %v2558_v20  ;;  %v11368_v21 = vld [vmem:[#allocation37_spill] sm:$0xff] }
 0x27e   :  { %v2591_v5 = vadd.f32 %v2301_v15, %v1826_v17  ;;  %3030 = vrot.lane.b32.xlu0 %v8464_v0, %s6330_s0  ;;  %v11369_v62 = vld [vmem:[#allocation89_spill] sm:$0xff]  ;;  %11373 = vst [vmem:[#allocation37_spill] sm:$0xff] %v8592_v2 }
 0x27f   :  { %v8510_v61 = vpop.f32.mrf.mxu1  ;;  %v2652_v63 = vadd.f32 %v8416_v7, %v2568_v56  ;;  %v2658_v54 = vadd.f32 %v8416_v7, %v2574_v59  ;;  %v1765_v56 = vadd.f32 %v11369_v62, %v11368_v21 }
 0x280   :  { %v2675_v52 = vadd.f32 %v8412_v6, %v2591_v5  ;;  %v8582_v5 = vmax.f32 %v2642_v27, 0.0  ;;  %v11379_v27 = vld [vmem:[#allocation27_spill] sm:$0xff] }
 0x281   :  { %v8539_v48 = vmax.f32 %v2652_v63, 0.0  ;;  %v8570_v47 = vmax.f32 %v2658_v54, 0.0  ;;  %v1762_v63 = vadd.f32 %v11371_v22, %v11370_v26  ;;  %v1939_v21 = vadd.f32 %v11380_v34, %v11379_v27  ;;  %v11381_v26 = vld [vmem:[#allocation25_spill] sm:$0xff]  ;;  %v11382_v22 = vld [vmem:[#allocation92_spill] sm:$0xff]  ;;  %v11389_v34 = vld [vmem:[#allocation42_spill] sm:$0xff] }
 0x282   :  { %v8521_v8 = vmax.f32 %v2675_v52, 0.0  ;;  %v11372_v52 = vld [vmem:[#allocation39_spill] sm:$0xff] }
 0x283   :  { %2782 = vrot.lane.b32.xlu2 %v8443_v10, %s6331_s2  ;;  %3028 = vrot.lane.b32.xlu1 %v8382_v43, %s6330_s0  ;;  %11366 = vst [vmem:[#allocation85_spill] sm:$0xff] %v8539_v48  ;;  %v1768_v46 = vadd.f32 %v8254_v60, %v11372_v52  ;;  %v2557_v55 = vadd.f32 %v8510_v61, %v1762_v63  ;;  %v11383_v52 = vld [vmem:[#allocation19_spill] sm:$0xff] }
 0x284   :  { %3448 = vmatpush.msrb.mxu3 %v8521_v8  ;;  %v2098_v49 = vpop.f32.mrf.mxu0  ;;  %v2272_v45 = vpop.f32.mrf.mxu2  ;;  %v1936_v63 = vadd.f32 %v11382_v22, %v11381_v26  ;;  %v11392_v26 = vld [vmem:[#allocation98_spill] sm:$0xff] }
 0x285   :  { %v2584_v3 = vadd.f32 %v2098_v49, %v1623_v29  ;;  %v2590_v10 = vadd.f32 %v2272_v45, %v1797_v41  ;;  %v8543_v43 = vpop.f32.mrf.mxu3  ;;  %v11374_v41 = vld [vmem:[#allocation36_spill] sm:$0xff]  ;;  %v11375_v29 = vld [vmem:[#allocation86_spill] sm:$0xff]  ;;  %v2641_v45 = vadd.f32 %v8424_v58, %v2557_v55 }
 0x286   :  { %3449 = vmatpush.msrb.mxu3 %v8537_v11  ;;  %2760 = vrot.lane.b32.xlu0 %v8539_v48, %s6331_s2  ;;  %v1759_v59 = vadd.f32 %v11375_v29, %v11374_v41  ;;  %v11385_v29 = vld [vmem:[#allocation24_spill] sm:$0xff]  ;;  %v11393_v22 = vld [vmem:[#allocation58_spill] sm:$0xff] }
 0x287   :  { %v2668_v36 = vadd.f32 %v8412_v6, %v2584_v3  ;;  %v2674_v50 = vadd.f32 %v8412_v6, %v2590_v10  ;;  %v2240_v57 = vpop.f32.mrf.mxu1 }
 0x288   :  { %3450 = vmatpush.msrb.mxu3 %v8552_v35  ;;  %v2573_v1 = vadd.f32 %v2240_v57, %v1765_v56  ;;  %v2541_v60 = vadd.f32 %v8488_v32, %v1759_v59  ;;  %v11386_v59 = vld [vmem:[#allocation88_spill] sm:$0xff] }
 0x289   :  { %v8562_v51 = vmax.f32 %v2668_v36, 0.0  ;;  %v8564_v17 = vmax.f32 %v2674_v50, 0.0  ;;  %v11376_v36 = vld [vmem:[#allocation38_spill] sm:$0xff]  ;;  %v1933_v55 = vadd.f32 %v11386_v59, %v11385_v29  ;;  %v11397_v29 = vld [vmem:[#allocation101_spill] sm:$0xff] }
 0x28a   :  { %3451 = vmatpush.msrb.mxu3 %v8559_v23  ;;  %v2657_v24 = vadd.f32 %v8416_v7, %v2573_v1  ;;  %v2625_v10 = vadd.f32 %v8373_v40, %v2541_v60  ;;  %v11377_v50 = vld [vmem:[#allocation90_spill] sm:$0xff] }
 0x28b   :  { %11367 = vst [vmem:[#allocation123_spill] sm:$0xff] %v8562_v51  ;;  %3287 = vmatpush.msra.mxu0 %v8562_v51  ;;  %3425 = vmatpush.msrb.mxu2 %v8564_v17  ;;  %v1730_v57 = vadd.f32 %v11377_v50, %v11376_v36  ;;  %v11387_v50 = vld [vmem:[#allocation26_spill] sm:$0xff] }
 0x28c   :  { %3024 = vrot.lane.b32.xlu2 %v8485_v33, %s6330_s0  ;;  %2774 = vrot.lane.b32.xlu1 %v8464_v0, %s6331_s2  ;;  %v2205_v15 = vpop.f32.mrf.mxu0  ;;  %v8578_v38 = vpop.f32.mrf.mxu2  ;;  %v8617_v37 = vmax.f32 %v2657_v24, 0.0  ;;  %v8629_v56 = vmax.f32 %v2625_v10, 0.0 }
 0x28d   :  { %v2411_v39 = vpop.f32.mrf.mxu3  ;;  %3426 = vmatpush.msrb.mxu2 %v8570_v47  ;;  %3288 = vmatpush.msra.mxu0 %v8539_v48  ;;  %v2540_v62 = vadd.f32 %v2205_v15, %v1730_v57  ;;  %v11388_v57 = vld [vmem:[#allocation91_spill] sm:$0xff]  ;;  %v11431_v48 = vld [vmem:[#allocation117_spill] sm:$0xff] }
 0x28e   :  { %2784 = vrot.lane.b32.xlu0 %v8437_v18, %s6331_s2  ;;  %v2563_v24 = vadd.f32 %v2411_v39, %v1936_v63  ;;  %v1904_v27 = vadd.f32 %v11388_v57, %v11387_v50  ;;  %v11390_v39 = vld [vmem:[#allocation94_spill] sm:$0xff]  ;;  %v11394_v63 = vld [vmem:[#allocation97_spill] sm:$0xff]  ;;  %v11400_v57 = vld [vmem:[#allocation40_spill] sm:$0xff] }
 0x28f   :  { %v2243_v0 = vpop.f32.mrf.mxu1  ;;  %3289 = vmatpush.msra.mxu0 %v8491_v42  ;;  %3427 = vmatpush.msrb.mxu2 %v8582_v5  ;;  %v2624_v60 = vadd.f32 %v8373_v40, %v2540_v62  ;;  %v11391_v62 = vld [vmem:[#allocation60_spill] sm:$0xff] }
 0x290   :  { %v2589_v16 = vadd.f32 %v2243_v0, %v1768_v46  ;;  %v11384_v46 = vld [vmem:[#allocation99_spill] sm:$0xff] }
 0x291   :  { %3290 = vmatpush.msra.mxu0 %v8472_v12  ;;  %3428 = vmatpush.msrb.mxu2 %v8592_v2  ;;  %v1942_v1 = vadd.f32 %v11384_v46, %v11383_v52  ;;  %v1736_v52 = vadd.f32 %v11394_v63, %v11393_v22  ;;  %v2647_v46 = vadd.f32 %v8424_v58, %v2563_v24 }
 0x292   :  { %v2673_v49 = vadd.f32 %v8412_v6, %v2589_v16  ;;  %6060 = vmatmul.msk.f32.vlgmr.msra.gmra.mxu0 %vm3268_vm7, %v8523_v30 }
 0x294   :  { %v8605_v20 = vmax.f32 %v2673_v49, 0.0  ;;  %2776 = vrot.lane.b32.xlu2 %v8457_v28, %s6331_s2  ;;  %2768 = vrot.lane.b32.xlu1 %v8485_v33, %s6331_s2  ;;  %v8611_v61 = vpop.f32.mrf.mxu0  ;;  %v2382_v32 = vpop.f32.mrf.mxu2  ;;  %v8624_v33 = vmax.f32 %v2641_v45, 0.0 }
 0x295   :  { %v2414_v3 = vpop.f32.mrf.mxu3 }
 0x296   :  { %3402 = vmatpush.msrb.mxu1 %v8605_v20  ;;  %3040 = vrot.lane.b32.xlu0 %v8437_v18, %s6330_s0  ;;  %11378 = vst [vmem:[#allocation89_spill] sm:$0xff] %v8624_v33  ;;  %v8631_v18 = vld [vmem:[#allocation5 + $0xb0] sm:$0xff]  ;;  %v2579_v0 = vadd.f32 %v2414_v3, %v1939_v21  ;;  %v2547_v3 = vadd.f32 %v8543_v43, %v1933_v55  ;;  %v8671_v43 = vmax.f32 %v2624_v60, 0.0 }
 0x297   :  { %v8619_v54 = vpop.f32.mrf.mxu1  ;;  %6067 = vmatmul.msk.f32.gmra.mxu3 %vm3268_vm7, %v8631_v18  ;;  %6065 = vmatmul.msk.f32.gmra.mxu2 %vm3268_vm7, %v8631_v18  ;;  %v1907_v21 = vadd.f32 %v11390_v39, %v11389_v34  ;;  %v11398_v55 = vld [vmem:[#allocation64_spill] sm:$0xff]  ;;  %v11401_v34 = vld [vmem:[#allocation93_spill] sm:$0xff] }
 0x298   :  { %3403 = vmatpush.msrb.mxu1 %v8617_v37  ;;  %v2663_v10 = vadd.f32 %v8416_v7, %v2579_v0  ;;  %v11396_v0 = vld [vmem:[#allocation62_spill] sm:$0xff]  ;;  %v1733_v24 = vadd.f32 %v11401_v34, %v11400_v57 }
 0x299   :  { %6063 = vmatmul.msk.f32.gmra.mxu1 %vm3268_vm7, %v8631_v18  ;;  %v1739_v59 = vadd.f32 %v11397_v29, %v11396_v0 }
 0x29a   :  { %3404 = vmatpush.msrb.mxu1 %v8624_v33  ;;  %6061 = vmatmul.msk.f32.gmra.mxu0 %vm3268_vm7, %v8631_v18 }
 0x29c   :  { %3405 = vmatpush.msrb.mxu1 %v8629_v56  ;;  %2770 = vrot.lane.b32.xlu2 %v8480_v13, %s6331_s2  ;;  %v2211_v15 = vpop.f32.mrf.mxu0  ;;  %v2385_v41 = vpop.f32.mrf.mxu2 }
 0x29d   :  { %2762 = vrot.lane.b32.xlu1 %v8562_v51, %s6331_s2  ;;  %v2417_v16 = vpop.f32.mrf.mxu3  ;;  %v2572_v60 = vadd.f32 %v2211_v15, %v1736_v52  ;;  %v2556_v15 = vadd.f32 %v8611_v61, %v1733_v24 }
 0x29e   :  { %v2595_v49 = vadd.f32 %v2417_v16, %v1942_v1  ;;  %3032 = vrot.lane.b32.xlu0 %v8457_v28, %s6330_s0  ;;  %v1910_v28 = vadd.f32 %v11392_v26, %v11391_v62  ;;  %v11399_v16 = vld [vmem:[#allocation102_spill] sm:$0xff]  ;;  %v2562_v26 = vadd.f32 %v2382_v32, %v1907_v21  ;;  %v2546_v32 = vadd.f32 %v8578_v38, %v1904_v27 }
 0x29f   :  { %v8655_v45 = vpop.f32.mrf.mxu1  ;;  %6074 = vmatmul.msk.f32.vlgmr.msrb.gmra.mxu3 %vm3268_vm7, %v8523_v30  ;;  %6072 = vmatmul.msk.f32.vlgmr.msrb.gmra.mxu2 %vm3268_vm7, %v8523_v30  ;;  %v2656_v29 = vadd.f32 %v8416_v7, %v2572_v60  ;;  %v2640_v38 = vadd.f32 %v8424_v58, %v2556_v15 }
 0x2a0   :  { %v2679_v36 = vadd.f32 %v8412_v6, %v2595_v49  ;;  %v1913_v49 = vadd.f32 %v11399_v16, %v11398_v55  ;;  %v2578_v50 = vadd.f32 %v2385_v41, %v1910_v28  ;;  %v8687_v41 = vmax.f32 %v2663_v10, 0.0  ;;  %v11404_v16 = vld [vmem:[#allocation63_spill] sm:$0xff] }
 0x2a1   :  { %6070 = vmatmul.msk.f32.vlgmr.msrb.gmra.mxu1 %vm3268_vm7, %v8523_v30  ;;  %v2630_v27 = vadd.f32 %v8373_v40, %v2546_v32  ;;  %v8729_v24 = vmax.f32 %v2656_v29, 0.0  ;;  %v11411_v29 = vld [vmem:[#allocation41_spill] sm:$0xff] }
 0x2a2   :  { %v8669_v1 = vmax.f32 %v2679_v36, 0.0  ;;  %v2631_v36 = vadd.f32 %v8373_v40, %v2547_v3  ;;  %11402 = vst [vmem:[#allocation87_spill] sm:$0xff] %v8687_v41  ;;  %v8699_v3 = vmax.f32 %v2647_v46, 0.0  ;;  %v2662_v10 = vadd.f32 %v8416_v7, %v2578_v50 }
 0x2a4   :  { %11395 = vst [vmem:[#allocation20_spill] sm:$0xff] %v8669_v1  ;;  %3540 = vmatpush.msra.mxu3 %v8669_v1  ;;  %2788 = vrot.lane.b32.xlu2 %v8671_v43, %s6331_s2  ;;  %v2214_v39 = vpop.f32.mrf.mxu0  ;;  %v2388_v62 = vpop.f32.mrf.mxu2  ;;  %v8707_v61 = vmax.f32 %v2631_v36, 0.0  ;;  %v8719_v55 = vmax.f32 %v2662_v10, 0.0  ;;  %v8745_v10 = vmax.f32 %v2640_v38, 0.0  ;;  %v11435_v1 = vld [vmem:[#allocation109_spill] sm:$0xff] }
 0x2a5   :  { %2786 = vrot.lane.b32.xlu1 %v8427_v9, %s6331_s2  ;;  %v2588_v28 = vadd.f32 %v2214_v39, %v1739_v59  ;;  %v2594_v22 = vadd.f32 %v2388_v62, %v1913_v49  ;;  %v8691_v63 = vpop.f32.mrf.mxu3  ;;  %v2646_v59 = vadd.f32 %v8424_v58, %v2562_v26  ;;  %v11405_v49 = vld [vmem:[#allocation104_spill] sm:$0xff]  ;;  %v11407_v39 = vld [vmem:[#allocation57_spill] sm:$0xff] }
 0x2a6   :  { %3541 = vmatpush.msra.mxu3 %v8687_v41  ;;  %3026 = vrot.lane.b32.xlu0 %v8480_v13, %s6330_s0  ;;  %v1881_v50 = vadd.f32 %v11405_v49, %v11404_v16  ;;  %v11408_v62 = vld [vmem:[#allocation100_spill] sm:$0xff]  ;;  %v11432_v41 = vld [vmem:[#allocation77_spill] sm:$0xff] }
 0x2a7   :  { %v2672_v21 = vadd.f32 %v8412_v6, %v2588_v28  ;;  %v2678_v52 = vadd.f32 %v8412_v6, %v2594_v22  ;;  %v2356_v0 = vpop.f32.mrf.mxu1  ;;  %6073 = vmatmul.msk.f32.gmra.mxu2 %vm3268_vm7, %v8631_v18  ;;  %v8736_v60 = vmax.f32 %v2646_v59, 0.0  ;;  %v1878_v26 = vadd.f32 %v11408_v62, %v11407_v39  ;;  %v11409_v28 = vld [vmem:[#allocation68_spill] sm:$0xff]  ;;  %6075 = vmatmul.msk.f32.gmra.mxu3 %vm3268_vm7, %v8631_v18 }
 0x2a8   :  { %3542 = vmatpush.msra.mxu3 %v8699_v3  ;;  %v11410_v22 = vld [vmem:[#allocation108_spill] sm:$0xff]  ;;  %v2577_v32 = vadd.f32 %v2356_v0, %v1881_v50 }
 0x2a9   :  { %v8710_v13 = vmax.f32 %v2672_v21, 0.0  ;;  %v8712_v46 = vmax.f32 %v2678_v52, 0.0  ;;  %11406 = vst [vmem:[#allocation36_spill] sm:$0xff] %v8736_v60  ;;  %v1884_v15 = vadd.f32 %v11410_v22, %v11409_v28  ;;  %v8748_v52 = vmax.f32 %v2630_v27, 0.0  ;;  %6071 = vmatmul.msk.f32.gmra.mxu1 %vm3268_vm7, %v8631_v18  ;;  %v11412_v59 = vld [vmem:[#allocation96_spill] sm:$0xff] }
 0x2aa   :  { %3543 = vmatpush.msra.mxu3 %v8707_v61  ;;  %v1875_v16 = vadd.f32 %v11412_v59, %v11411_v29  ;;  %v2561_v0 = vadd.f32 %v8655_v45, %v1878_v26  ;;  %v2661_v27 = vadd.f32 %v8416_v7, %v2577_v32  ;;  %v11414_v32 = vld [vmem:[#allocation69_spill] sm:$0xff] }
 0x2ab   :  { %11403 = vst [vmem:[#allocation39_spill] sm:$0xff] %v8712_v46  ;;  %3517 = vmatpush.msra.mxu2 %v8712_v46  ;;  %3379 = vmatpush.msrb.mxu0 %v8710_v13 }
 0x2ac   :  { %2804 = vrot.lane.b32.xlu2 %v8592_v2, %s6331_s2  ;;  %v8725_v57 = vpop.f32.mrf.mxu0  ;;  %v8727_v34 = vpop.f32.mrf.mxu2  ;;  %v2545_v38 = vadd.f32 %v8619_v54, %v1875_v16  ;;  %v2645_v45 = vadd.f32 %v8424_v58, %v2561_v0  ;;  %v8778_v28 = vmax.f32 %v2661_v27, 0.0  ;;  %v11417_v16 = vld [vmem:[#allocation107_spill] sm:$0xff]  ;;  %v11427_v2 = vld [vmem:[#allocation113_spill] sm:$0xff] }
 0x2ad   :  { %3044 = vrot.lane.b32.xlu1 %v8671_v43, %s6330_s0  ;;  %v2527_v36 = vpop.f32.mrf.mxu3  ;;  %3518 = vmatpush.msra.mxu2 %v8719_v55 }
 0x2ae   :  { %2778 = vrot.lane.b32.xlu0 %v8451_v19, %s6331_s2  ;;  %3380 = vmatpush.msrb.mxu0 %v8729_v24 }
 0x2af   :  { %v2359_v21 = vpop.f32.mrf.mxu1  ;;  %3519 = vmatpush.msra.mxu2 %v8736_v60  ;;  %6082 = vmatmul.msk.f32.vlgmr.msra.gmra.mxu3 %vm3268_vm7, %v8523_v30  ;;  %v11433_v60 = vld [vmem:[#allocation118_spill] sm:$0xff] }
 0x2b0   :  { %v2593_v49 = vadd.f32 %v2359_v21, %v1884_v15  ;;  %3381 = vmatpush.msrb.mxu0 %v8745_v10  ;;  %v8783_v15 = vmax.f32 %v2645_v45, 0.0  ;;  %v11415_v21 = vld [vmem:[#allocation111_spill] sm:$0xff]  ;;  %v2029_v46 = vadd.f32 %v11433_v60, %v11432_v41 }
 0x2b1   :  { %3520 = vmatpush.msra.mxu2 %v8748_v52  ;;  %v2055_v29 = vadd.f32 %v11415_v21, %v11414_v32  ;;  %v11420_v21 = vld [vmem:[#allocation61_spill] sm:$0xff] }
 0x2b2   :  { %v2677_v50 = vadd.f32 %v8412_v6, %v2593_v49  ;;  %3382 = vmatpush.msrb.mxu0 %v8671_v43  ;;  %6080 = vmatmul.msk.f32.vlgmr.msra.gmra.mxu2 %vm3268_vm7, %v8523_v30  ;;  %v2629_v43 = vadd.f32 %v8373_v40, %v2545_v38  ;;  %v11418_v49 = vld [vmem:[#allocation73_spill] sm:$0xff]  ;;  %v11419_v38 = vld [vmem:[#allocation115_spill] sm:$0xff] }
 0x2b3   :  { %6068 = vmatmul.msk.f32.vlgmr.msrb.gmra.mxu0 %vm3268_vm7, %v8523_v30  ;;  %v2058_v27 = vadd.f32 %v11419_v38, %v11418_v49 }
 0x2b4   :  { %v8766_v39 = vmax.f32 %v2677_v50, 0.0  ;;  %2816 = vrot.lane.b32.xlu2 %v8537_v11, %s6331_s2  ;;  %v2324_v62 = vpop.f32.mrf.mxu0  ;;  %v2498_v26 = vpop.f32.mrf.mxu2  ;;  %v8790_v59 = vmax.f32 %v2629_v43, 0.0 }
 0x2b5   :  { %3068 = vrot.lane.b32.xlu1 %v8559_v23, %s6330_s0  ;;  %v2530_v54 = vpop.f32.mrf.mxu3 }
 0x2b6   :  { %11413 = vst [vmem:[#allocation86_spill] sm:$0xff] %v8766_v39  ;;  %3494 = vmatpush.msra.mxu1 %v8766_v39  ;;  %3042 = vrot.lane.b32.xlu0 %v8427_v9, %s6330_s0  ;;  %v11416_v9 = vld [vmem:[#allocation65_spill] sm:$0xff]  ;;  %v2583_v50 = vadd.f32 %v2530_v54, %v2055_v29 }
 0x2b7   :  { %v8780_v22 = vpop.f32.mrf.mxu1  ;;  %v2052_v0 = vadd.f32 %v11417_v16, %v11416_v9  ;;  %v11421_v9 = vld [vmem:[#allocation103_spill] sm:$0xff]  ;;  %6083 = vmatmul.msk.f32.gmra.mxu3 %vm3268_vm7, %v8631_v18 }
 0x2b8   :  { %3495 = vmatpush.msra.mxu1 %v8778_v28  ;;  %v2049_v16 = vadd.f32 %v11421_v9, %v11420_v21  ;;  %v2667_v38 = vadd.f32 %v8416_v7, %v2583_v50  ;;  %v11422_v21 = vld [vmem:[#allocation74_spill] sm:$0xff]  ;;  %v11426_v9 = vld [vmem:[#allocation75_spill] sm:$0xff] }
 0x2b9   :  { %v2567_v12 = vadd.f32 %v2527_v36, %v2052_v0  ;;  %v11423_v36 = vld [vmem:[#allocation114_spill] sm:$0xff]  ;;  %v1852_v51 = vadd.f32 %v11427_v2, %v11426_v9 }
 0x2ba   :  { %3496 = vmatpush.msra.mxu1 %v8783_v15  ;;  %6081 = vmatmul.msk.f32.gmra.mxu2 %vm3268_vm7, %v8631_v18  ;;  %v2551_v29 = vadd.f32 %v8691_v63, %v2049_v16  ;;  %v2026_v0 = vadd.f32 %v11423_v36, %v11422_v21  ;;  %v11428_v63 = vld [vmem:[#allocation70_spill] sm:$0xff]  ;;  %v11434_v36 = vld [vmem:[#allocation71_spill] sm:$0xff]  ;;  %v8839_v9 = vmax.f32 %v2667_v38, 0.0 }
 0x2bb   :  { %6069 = vmatmul.msk.f32.gmra.mxu0 %vm3268_vm7, %v8631_v18  ;;  %v2651_v25 = vadd.f32 %v8424_v58, %v2567_v12  ;;  %v11429_v50 = vld [vmem:[#allocation110_spill] sm:$0xff] }
 0x2bc   :  { %3497 = vmatpush.msra.mxu1 %v8790_v59  ;;  %2794 = vrot.lane.b32.xlu2 %v8710_v13, %s6331_s2  ;;  %v2327_v45 = vpop.f32.mrf.mxu0  ;;  %v2501_v32 = vpop.f32.mrf.mxu2  ;;  %v2023_v16 = vadd.f32 %v11429_v50, %v11428_v63 }
 0x2bd   :  { %2798 = vrot.lane.b32.xlu1 %v8624_v33, %s6331_s2  ;;  %v2533_v43 = vpop.f32.mrf.mxu3  ;;  %6078 = vmatmul.msk.f32.vlgmr.msra.gmra.mxu1 %vm3268_vm7, %v8523_v30  ;;  %v2582_v21 = vadd.f32 %v2501_v32, %v2026_v0  ;;  %v2576_v2 = vadd.f32 %v2327_v45, %v1852_v51  ;;  %v11437_v51 = vld [vmem:[#allocation105_spill] sm:$0xff] }
 0x2be   :  { %v2599_v49 = vadd.f32 %v2533_v43, %v2058_v27  ;;  %3034 = vrot.lane.b32.xlu0 %v8451_v19, %s6330_s0  ;;  %v11424_v27 = vld [vmem:[#allocation67_spill] sm:$0xff]  ;;  %v11425_v43 = vld [vmem:[#allocation106_spill] sm:$0xff] }
 0x2bf   :  { %v8811_v54 = vpop.f32.mrf.mxu1  ;;  %v2020_v19 = vadd.f32 %v11425_v43, %v11424_v27  ;;  %v1849_v27 = vadd.f32 %v11435_v1, %v11434_v36  ;;  %v2635_v43 = vadd.f32 %v8373_v40, %v2551_v29  ;;  %v11436_v1 = vld [vmem:[#allocation66_spill] sm:$0xff]  ;;  %v2660_v50 = vadd.f32 %v8416_v7, %v2576_v2  ;;  %v11438_v36 = vld [vmem:[#allocation79_spill] sm:$0xff] }
 0x2c0   :  { %v2683_v33 = vadd.f32 %v8412_v6, %v2599_v49  ;;  %v11430_v49 = vld [vmem:[#allocation78_spill] sm:$0xff]  ;;  %v1846_v45 = vadd.f32 %v11437_v51, %v11436_v1  ;;  %v11441_v1 = vld [vmem:[#allocation116_spill] sm:$0xff] }
 0x2c1   :  { %v1855_v39 = vadd.f32 %v11431_v48, %v11430_v49  ;;  %v2566_v48 = vadd.f32 %v2498_v26, %v2023_v16  ;;  %v2560_v32 = vadd.f32 %v2324_v62, %v1849_v27  ;;  %v8852_v26 = vmax.f32 %v2651_v25, 0.0  ;;  %v11439_v27 = vld [vmem:[#allocation119_spill] sm:$0xff] }
 0x2c2   :  { %v8825_v42 = vmax.f32 %v2683_v33, 0.0  ;;  %v2550_v38 = vadd.f32 %v8727_v34, %v2020_v19  ;;  %v2544_v62 = vadd.f32 %v8725_v57, %v1846_v45  ;;  %v8861_v16 = vmax.f32 %v2635_v43, 0.0  ;;  %v11442_v45 = vld [vmem:[#allocation81_spill] sm:$0xff] }
 0x2c3   :  { %v2650_v25 = vadd.f32 %v8424_v58, %v2566_v48  ;;  %v2644_v19 = vadd.f32 %v8424_v58, %v2560_v32  ;;  %v1997_v43 = vadd.f32 %v11439_v27, %v11438_v36  ;;  %v8886_v48 = vpop.permute.xlu2 %2764  ;;  %v2000_v32 = vadd.f32 %v8378_v4, %v11442_v45 }
 0x2c4   :  { %3632 = vmatpush.msrb.mxu3 %v8825_v42  ;;  %2802 = vrot.lane.b32.xlu2 %v8605_v20, %s6331_s2  ;;  %v2330_v12 = vpop.f32.mrf.mxu0  ;;  %v2504_v33 = vpop.f32.mrf.mxu2  ;;  %v2628_v2 = vadd.f32 %v8373_v40, %v2544_v62  ;;  %v11443_v62 = vld [vmem:[#allocation72_spill] sm:$0xff] }
 0x2c5   :  { %3046 = vrot.lane.b32.xlu1 %v8745_v10, %s6330_s0  ;;  %v2592_v41 = vadd.f32 %v2330_v12, %v1855_v39  ;;  %v2598_v60 = vadd.f32 %v2504_v33, %v2029_v46  ;;  %6079 = vmatmul.msk.f32.gmra.mxu1 %vm3268_vm7, %v8631_v18  ;;  %v8848_v29 = vpop.permute.xlu0 %2772  ;;  %v2666_v46 = vadd.f32 %v8416_v7, %v2582_v21  ;;  %v8882_v33 = vmax.f32 %v2660_v50, 0.0  ;;  %v11444_v50 = vld [vmem:[#allocation112_spill] sm:$0xff] }
 0x2c6   :  { %3633 = vmatpush.msrb.mxu3 %v8839_v9  ;;  %2796 = vrot.lane.b32.xlu0 %v8629_v56, %s6331_s2  ;;  %v2634_v21 = vadd.f32 %v8373_v40, %v2550_v38 }
 0x2c7   :  { %v2676_v39 = vadd.f32 %v8412_v6, %v2592_v41  ;;  %v2682_v0 = vadd.f32 %v8412_v6, %v2598_v60  ;;  %v2472_v63 = vpop.f32.mrf.mxu1  ;;  %v8873_v57 = vmax.f32 %v2666_v46, 0.0  ;;  %v8891_v41 = vmax.f32 %v2650_v25, 0.0  ;;  %v11440_v60 = vld [vmem:[#allocation76_spill] sm:$0xff] }
 0x2c8   :  { %3634 = vmatpush.msrb.mxu3 %v8852_v26  ;;  %v1994_v51 = vadd.f32 %v11441_v1, %v11440_v60  ;;  %v2581_v38 = vadd.f32 %v2472_v63, %v1997_v43  ;;  %v8900_v46 = vmax.f32 %v2644_v19, 0.0  ;;  %v1991_v25 = vadd.f32 %v11444_v50, %v11443_v62  ;;  %v11452_v50 = vld [vmem:[#allocation82_spill] sm:$0xff] }
 0x2c9   :  { %v8864_v49 = vmax.f32 %v2676_v39, 0.0  ;;  %v8866_v34 = vmax.f32 %v2682_v0, 0.0  ;;  %v8903_v0 = vmax.f32 %v2634_v21, 0.0 }
 0x2ca   :  { %3635 = vmatpush.msrb.mxu3 %v8861_v16  ;;  %v2565_v36 = vadd.f32 %v8811_v54, %v1994_v51  ;;  %v2549_v63 = vadd.f32 %v8780_v22, %v1991_v25  ;;  %v2665_v19 = vadd.f32 %v8416_v7, %v2581_v38  ;;  %v1965_v25 = vadd.f32 %v8388_v31, %v11452_v50 }
 0x2cb   :  { %3609 = vmatpush.msrb.mxu2 %v8866_v34  ;;  %3471 = vmatpush.msra.mxu0 %v8864_v49 }
 0x2cc   :  { %2810 = vrot.lane.b32.xlu2 %v8564_v17, %s6331_s2  ;;  %v8880_v12 = vpop.f32.mrf.mxu0  ;;  %6090 = vmatmul.msk.f32.vlgmr.msrb.gmra.mxu3 %vm3268_vm7, %v8523_v30  ;;  %v2649_v54 = vadd.f32 %v8424_v58, %v2565_v36  ;;  %v2633_v60 = vadd.f32 %v8373_v40, %v2549_v63  ;;  %v8934_v1 = vmax.f32 %v2665_v19, 0.0  ;;  %v11453_v36 = vld [vmem:[#allocation84_spill] sm:$0xff] }
 0x2cd   :  { %2814 = vrot.lane.b32.xlu1 %v8552_v35, %s6331_s2  ;;  %3610 = vmatpush.msrb.mxu2 %v8873_v57  ;;  %v8908_v27 = vpop.permute.xlu0 %3036 }
 0x2ce   :  { %2812 = vrot.lane.b32.xlu0 %v8559_v23, %s6331_s2  ;;  %3472 = vmatpush.msra.mxu0 %v8882_v33  ;;  %11445 = vst [vmem:[#allocation38_spill] sm:$0xff] %v8908_v27  ;;  %v2692_v23 = vmax.f32 %v2628_v2, 0.0  ;;  %v8939_v45 = vmax.f32 %v2649_v54, 0.0 }
 0x2cf   :  { %v2475_v39 = vpop.f32.mrf.mxu1  ;;  %3611 = vmatpush.msrb.mxu2 %v8891_v41 }
 0x2d0   :  { %v2597_v4 = vadd.f32 %v2475_v39, %v2000_v32  ;;  %3473 = vmatpush.msra.mxu0 %v8900_v46  ;;  %11447 = vst [vmem:[#allocation27_spill] sm:$0xff] %v8939_v45  ;;  %v11451_v39 = vld [vmem:[#allocation83_spill] sm:$0xff] }
 0x2d1   :  { %3612 = vmatpush.msrb.mxu2 %v8903_v0  ;;  %v1968_v62 = vadd.f32 %v8406_v53, %v11451_v39 }
 0x2d2   :  { %v2681_v21 = vadd.f32 %v8412_v6, %v2597_v4  ;;  %3474 = vmatpush.msra.mxu0 %v2692_v23  ;;  %6088 = vmatmul.msk.f32.vlgmr.msrb.gmra.mxu2 %vm3268_vm7, %v8523_v30  ;;  %v1971_v4 = vadd.f32 %v8435_v14, %v11453_v36 }
 0x2d3   :  { %6076 = vmatmul.msk.f32.vlgmr.msra.gmra.mxu0 %vm3268_vm7, %v8523_v30 }
 0x2d4   :  { %v8920_v43 = vmax.f32 %v2681_v21, 0.0  ;;  %2828 = vrot.lane.b32.xlu2 %v8790_v59, %s6331_s2  ;;  %v2440_v2 = vpop.f32.mrf.mxu0  ;;  %6091 = vmatmul.msk.f32.gmra.mxu3 %vm3268_vm7, %v8631_v18  ;;  %v11454_v21 = vld [vmem:[#allocation80_spill] sm:$0xff] }
 0x2d5   :  { %3070 = vrot.lane.b32.xlu1 %v8552_v35, %s6330_s0  ;;  %v8928_v22 = vpop.permute.xlu2 %2758  ;;  %v8942_v35 = vmax.f32 %v2633_v60, 0.0  ;;  %v1962_v54 = vadd.f32 %v8371_v44, %v11454_v21  ;;  %v2564_v60 = vadd.f32 %v2440_v2, %v1965_v25 }
 0x2d6   :  { %11446 = vst [vmem:[#allocation90_spill] sm:$0xff] %v8928_v22  ;;  %3586 = vmatpush.msrb.mxu1 %v8920_v43  ;;  %2790 = vrot.lane.b32.xlu0 %v8745_v10, %s6331_s2 }
 0x2d7   :  { %11448 = vst [vmem:[#allocation95_spill] sm:$0xff] %v8942_v35  ;;  %v2548_v53 = vadd.f32 %v8880_v12, %v1962_v54 }
 0x2d8   :  { %3587 = vmatpush.msrb.mxu1 %v8934_v1  ;;  %v8937_v51 = vpop.permute.xlu0 %2766 }
 0x2da   :  { %3588 = vmatpush.msrb.mxu1 %v8939_v45  ;;  %6089 = vmatmul.msk.f32.gmra.mxu2 %vm3268_vm7, %v8631_v18 }
 0x2db   :  { %6077 = vmatmul.msk.f32.gmra.mxu0 %vm3268_vm7, %v8631_v18 }
 0x2dc   :  { %3589 = vmatpush.msrb.mxu1 %v8942_v35  ;;  %2820 = vrot.lane.b32.xlu2 %v2692_v23, %s6331_s2  ;;  %v2443_v10 = vpop.f32.mrf.mxu0 }
 0x2dd   :  { %2792 = vrot.lane.b32.xlu1 %v8729_v24, %s6331_s2  ;;  %v8952_v32 = vpop.permute.xlu2 %2782  ;;  %6086 = vmatmul.msk.f32.vlgmr.msrb.gmra.mxu1 %vm3268_vm7, %v8523_v30  ;;  %v2580_v63 = vadd.f32 %v2443_v10, %v1968_v62  ;;  %v2632_v10 = vadd.f32 %v8373_v40, %v2548_v53 }
 0x2de   :  { %11449 = vst [vmem:[#allocation25_spill] sm:$0xff] %v8952_v32  ;;  %2806 = vrot.lane.b32.xlu0 %v8582_v5, %s6331_s2 }
 0x2df   :  { %v2664_v14 = vadd.f32 %v8416_v7, %v2580_v63 }
 0x2e0   :  { %v8958_v38 = vpop.permute.xlu0 %3022 }
 0x2e1   :  { %11450 = vst [vmem:[#allocation92_spill] sm:$0xff] %v8958_v38  ;;  %v8989_v39 = vmax.f32 %v2664_v14, 0.0  ;;  %v2941_v14 = vsel %vm441_vm2, %v8928_v22, %v8937_v51  ;;  %v11468_v22 = vld [vmem:[#allocation39_spill] sm:$0xff] }
 0x2e4   :  { %3076 = vrot.lane.b32.xlu2 %v2692_v23, %s6330_s0  ;;  %v2446_v19 = vpop.f32.mrf.mxu0 }
 0x2e5   :  { %3048 = vrot.lane.b32.xlu1 %v8729_v24, %s6330_s0  ;;  %v2596_v38 = vadd.f32 %v2446_v19, %v1971_v4  ;;  %v8971_v27 = vpop.permute.xlu1 %2756  ;;  %6087 = vmatmul.msk.f32.gmra.mxu1 %vm3268_vm7, %v8631_v18  ;;  %v2648_v24 = vadd.f32 %v8424_v58, %v2564_v60  ;;  %v9003_v58 = vmax.f32 %v2632_v10, 0.0  ;;  %v11461_v4 = vld [vmem:[#allocation20_spill] sm:$0xff] }
 0x2e6   :  { %11455 = vst [vmem:[#allocation19_spill] sm:$0xff] %v8971_v27  ;;  %2800 = vrot.lane.b32.xlu0 %v8617_v37, %s6331_s2  ;;  %v8977_v31 = vpop.permute.xlu2 %3024 }
 0x2e7   :  { %11456 = vst [vmem:[#allocation99_spill] sm:$0xff] %v8977_v31  ;;  %v2680_v44 = vadd.f32 %v8412_v6, %v2596_v38  ;;  %v8998_v6 = vmax.f32 %v2648_v24, 0.0  ;;  %v2940_v24 = vsel %vm441_vm2, %v8971_v27, %v8886_v48 }
 0x2e8   :  { %v8982_v23 = vpop.permute.xlu0 %3038 }
 0x2e9   :  { %v8985_v2 = vmax.f32 %v2680_v44, 0.0 }
 0x2eb   :  { %3563 = vmatpush.msrb.mxu0 %v8985_v2 }
 0x2ec   :  { %2844 = vrot.lane.b32.xlu2 %v8707_v61, %s6331_s2 }
 0x2ed   :  { %2808 = vrot.lane.b32.xlu1 %v8570_v47, %s6331_s2  ;;  %v8995_v7 = vpop.permute.xlu1 %2780  ;;  %3564 = vmatpush.msrb.mxu0 %v8989_v39 }
 0x2ee   :  { %11457 = vst [vmem:[#allocation24_spill] sm:$0xff] %v8995_v7  ;;  %2818 = vrot.lane.b32.xlu0 %v8521_v8, %s6331_s2  ;;  %v2777_v40 = vpop.permute.xlu2 %2776 }
 0x2ef   :  { %3565 = vmatpush.msrb.mxu0 %v8998_v6 }
 0x2f0   :  { %v9005_v12 = vpop.permute.xlu0 %3030 }
 0x2f1   :  { %3566 = vmatpush.msrb.mxu0 %v9003_v58 }
 0x2f2   :  { %6084 = vmatmul.msk.f32.vlgmr.msrb.gmra.mxu0 %vm3268_vm7, %v8523_v30 }
 0x2f4   :  { %2830 = vrot.lane.b32.xlu2 %v8783_v15, %s6331_s2 }
 0x2f5   :  { %3072 = vrot.lane.b32.xlu1 %v8537_v11, %s6330_s0  ;;  %v9014_v38 = vpop.permute.xlu1 %3028 }
 0x2f6   :  { %11458 = vst [vmem:[#allocation88_spill] sm:$0xff] %v9014_v38  ;;  %2832 = vrot.lane.b32.xlu0 %v8778_v28, %s6331_s2  ;;  %v2771_v62 = vpop.permute.xlu2 %2770 }
 0x2f8   :  { %v9018_v50 = vpop.permute.xlu0 %2760 }
 0x2f9   :  { %11459 = vst [vmem:[#allocation26_spill] sm:$0xff] %v9018_v50 }
 0x2fa   :  { %6085 = vmatmul.msk.f32.gmra.mxu0 %vm3268_vm7, %v8631_v18 }
 0x2fc   :  { %3078 = vrot.lane.b32.xlu2 %v8900_v46, %s6330_s0 }
 0x2fd   :  { %3050 = vrot.lane.b32.xlu1 %v8710_v13, %s6330_s0 }
 0x2fe   :  { %2824 = vrot.lane.b32.xlu0 %v8882_v33, %s6331_s2  ;;  %v9028_v30 = vpop.permute.xlu2 %2788  ;;  %v2775_v11 = vpop.permute.xlu1 %2774 }
 0x300   :  { %v9030_v25 = vpop.permute.xlu0 %2784 }
 0x301   :  { %11460 = vst [vmem:[#allocation91_spill] sm:$0xff] %v9030_v25  ;;  %v2934_v31 = vsel %vm441_vm2, %v2777_v40, %v9030_v25  ;;  %v11487_v25 = vld [vmem:[#allocation120_spill] sm:$0xff] }
 0x304   :  { %2846 = vrot.lane.b32.xlu2 %v8699_v3, %s6331_s2 }
 0x305   :  { %3074 = vrot.lane.b32.xlu1 %v8521_v8, %s6330_s0 }
 0x306   :  { %2840 = vrot.lane.b32.xlu0 %v8719_v55, %s6331_s2  ;;  %v9038_v18 = vpop.permute.xlu2 %2804  ;;  %v2769_v13 = vpop.permute.xlu1 %2768 }
 0x307   :  { %v2942_v21 = vsel %vm441_vm2, %v9018_v50, %v2769_v13 }
 0x308   :  { %v9040_v36 = vpop.permute.xlu0 %3040 }
 0x30c   :  { %3080 = vrot.lane.b32.xlu2 %v8882_v33, %s6330_s0  ;;  %v11464_v33 = vld [vmem:[#allocation22_spill] sm:$0xff] }
 0x30d   :  { %2836 = vrot.lane.b32.xlu1 %v8748_v52, %s6331_s2  ;;  %v2981_v44 = vmul.f32 %v11464_v33, %v2942_v21  ;;  %v2965_v10 = vmul.f32 %v11464_v33, %v2941_v14 }
 0x30e   :  { %2850 = vrot.lane.b32.xlu0 %v11461_v4, %s6331_s2  ;;  %v9048_v63 = vpop.permute.xlu2 %2816 }
 0x30f   :  { %v9050_v8 = vpop.permute.xlu1 %2762 }
 0x310   :  { %11462 = vst [vmem:[#allocation42_spill] sm:$0xff] %v9050_v8  ;;  %v2943_v54 = vsel %vm441_vm2, %v9050_v8, %v2771_v62  ;;  %v9058_v60 = vpop.permute.xlu0 %3032 }
 0x311   :  { %v2997_v53 = vmul.f32 %v11464_v33, %v2943_v54 }
 0x313   :  { %3684 = vmatpush.msra.mxu1 %v2997_v53  ;;  %v2949_v53 = vmul.f32 %v11464_v33, %v2940_v24  ;;  %v11471_v24 = vld [vmem:[#allocation49_spill] sm:$0xff] }
 0x314   :  { %3082 = vrot.lane.b32.xlu2 %v8864_v49, %s6330_s0 }
 0x315   :  { %2822 = vrot.lane.b32.xlu1 %v8900_v46, %s6331_s2  ;;  %3685 = vmatpush.msra.mxu1 %v2981_v44  ;;  %v11469_v46 = vld [vmem:[#allocation36_spill] sm:$0xff] }
 0x316   :  { %2860 = vrot.lane.b32.xlu0 %v8942_v35, %s6331_s2  ;;  %v9077_v54 = vpop.permute.xlu2 %2794 }
 0x317   :  { %11465 = vst [vmem:[#allocation94_spill] sm:$0xff] %v9077_v54  ;;  %3686 = vmatpush.msra.mxu1 %v2965_v10  ;;  %v9079_v21 = vpop.permute.xlu1 %2786 }
 0x318   :  { %11466 = vst [vmem:[#allocation60_spill] sm:$0xff] %v9079_v21  ;;  %v9082_v27 = vpop.permute.xlu0 %3026 }
 0x319   :  { %11467 = vst [vmem:[#allocation98_spill] sm:$0xff] %v9082_v27  ;;  %3687 = vmatpush.msra.mxu1 %v2949_v53  ;;  %v2938_v53 = vsel %vm441_vm2, %v2769_v13, %v2777_v40  ;;  %v2937_v13 = vsel %vm441_vm2, %v8937_v51, %v2775_v11  ;;  %v11474_v40 = vld [vmem:[#allocation87_spill] sm:$0xff] }
 0x31c   :  { %2842 = vrot.lane.b32.xlu2 %v11468_v22, %s6331_s2 }
 0x31d   :  { %2838 = vrot.lane.b32.xlu1 %v11469_v46, %s6331_s2 }
 0x31e   :  { %2852 = vrot.lane.b32.xlu0 %v9003_v58, %s6331_s2  ;;  %v2803_v14 = vpop.permute.xlu2 %2802 }
 0x31f   :  { %v2927_v44 = vsel %vm441_vm2, %v9077_v54, %v2803_v14  ;;  %v9093_v10 = vpop.permute.xlu1 %3044  ;;  %v11472_v54 = vld [vmem:[#allocation17_spill] sm:$0xff] }
 0x320   :  { %11470 = vst [vmem:[#allocation58_spill] sm:$0xff] %v9093_v10  ;;  %v3001_v33 = vmul.f32 %v11471_v24, %v2927_v44  ;;  %v2779_v8 = vpop.permute.xlu0 %2778  ;;  %v11473_v10 = vld [vmem:[#allocation14_spill] sm:$0xff]  ;;  %v2933_v44 = vsel %vm441_vm2, %v2775_v11, %v8952_v32  ;;  %v2966_v11 = vmul.f32 %v11472_v54, %v2937_v13 }
 0x321   :  { %v2935_v50 = vsel %vm441_vm2, %v2779_v8, %v9079_v21  ;;  %v2939_v35 = vsel %vm441_vm2, %v2771_v62, %v2779_v8  ;;  %v2982_v62 = vmul.f32 %v11472_v54, %v2938_v53  ;;  %v2983_v51 = vmul.f32 %v11473_v10, %v2934_v31  ;;  %v11476_v8 = vld [vmem:[#allocation28_spill] sm:$0xff] }
 0x322   :  { %v2998_v38 = vmul.f32 %v11472_v54, %v2939_v35  ;;  %v2999_v27 = vmul.f32 %v11473_v10, %v2935_v50  ;;  %3776 = vmatpush.msrb.mxu1 %v3001_v33  ;;  %v2936_v35 = vsel %vm441_vm2, %v8886_v48, %v8848_v29  ;;  %v2932_v50 = vsel %vm441_vm2, %v8848_v29, %v8995_v7  ;;  %v9208_v7 = vld [vmem:[#allocation5 + $0x90] sm:$0xff] }
 0x323   :  { %v2967_v31 = vmul.f32 %v11473_v10, %v2933_v44  ;;  %v2950_v53 = vmul.f32 %v11472_v54, %v2936_v35  ;;  %v11478_v35 = vld [vmem:[#allocation85_spill] sm:$0xff]  ;;  %6094 = vmatmul.msk.f32.vlgmr.msra.gmra.mxu1 %vm3268_vm7, %v9208_v7 }
 0x324   :  { %2862 = vrot.lane.b32.xlu2 %v8939_v45, %s6331_s2  ;;  %3707 = vmatpush.msra.mxu2 %v2998_v38  ;;  %v9236_v45 = vld [vmem:[#allocation5 + $0xa8] sm:$0xff] }
 0x325   :  { %2848 = vrot.lane.b32.xlu1 %v11474_v40, %s6331_s2  ;;  %3730 = vmatpush.msra.mxu3 %v2999_v27 }
 0x326   :  { %2876 = vrot.lane.b32.xlu0 %v8861_v16, %s6331_s2  ;;  %v9130_v38 = vpop.permute.xlu2 %2810  ;;  %3708 = vmatpush.msra.mxu2 %v2982_v62  ;;  %v2951_v62 = vmul.f32 %v11473_v10, %v2932_v50 }
 0x327   :  { %v2923_v48 = vsel %vm441_vm2, %v2803_v14, %v9130_v38  ;;  %3731 = vmatpush.msra.mxu3 %v2983_v51  ;;  %v9136_v27 = vpop.permute.xlu1 %3068  ;;  %v11477_v14 = vld [vmem:[#allocation86_spill] sm:$0xff] }
 0x328   :  { %11475 = vst [vmem:[#allocation97_spill] sm:$0xff] %v9136_v27  ;;  %v3002_v33 = vmul.f32 %v11476_v8, %v2923_v48  ;;  %v9140_v29 = vpop.permute.xlu0 %3042  ;;  %3709 = vmatpush.msra.mxu2 %v2966_v11 }
 0x329   :  { %3732 = vmatpush.msra.mxu3 %v2967_v31 }
 0x32a   :  { %3710 = vmatpush.msra.mxu2 %v2950_v53  ;;  %v11481_v53 = vld [vmem:[#allocation122_spill] sm:$0xff] }
 0x32b   :  { %3733 = vmatpush.msra.mxu3 %v2951_v62  ;;  %6096 = vmatmul.msk.f32.vlgmr.msra.gmra.mxu2 %vm3268_vm7, %v9208_v7 }
 0x32c   :  { %3799 = vmatpush.msrb.mxu2 %v3002_v33  ;;  %2854 = vrot.lane.b32.xlu2 %v8998_v6, %s6331_s2 }
 0x32d   :  { %2834 = vrot.lane.b32.xlu1 %v11477_v14, %s6331_s2  ;;  %6098 = vmatmul.msk.f32.vlgmr.msra.gmra.mxu3 %vm3268_vm7, %v9208_v7 }
 0x32e   :  { %2868 = vrot.lane.b32.xlu0 %v8903_v0, %s6331_s2  ;;  %v9150_v13 = vpop.permute.xlu2 %2828  ;;  %6095 = vmatmul.msk.f32.gmra.mxu1 %vm3268_vm7, %v9236_v45 }
 0x32f   :  { %v2799_v44 = vpop.permute.xlu1 %2798 }
 0x330   :  { %v9152_v51 = vpop.permute.xlu0 %3034 }
 0x333   :  { %6097 = vmatmul.msk.f32.gmra.mxu2 %vm3268_vm7, %v9236_v45 }
 0x334   :  { %2878 = vrot.lane.b32.xlu2 %v8852_v26, %s6331_s2 }
 0x335   :  { %2826 = vrot.lane.b32.xlu1 %v8864_v49, %s6331_s2  ;;  %6099 = vmatmul.msk.f32.gmra.mxu3 %vm3268_vm7, %v9236_v45 }
 0x336   :  { %3016 = vrot.lane.b32.xlu0 %v11478_v35, %s6330_s0  ;;  %v9160_v50 = vpop.permute.xlu2 %2820 }
 0x337   :  { %v9162_v11 = vpop.permute.xlu1 %3046 }
 0x338   :  { %11479 = vst [vmem:[#allocation62_spill] sm:$0xff] %v9162_v11  ;;  %v2797_v48 = vpop.permute.xlu0 %2796 }
 0x339   :  { %v2924_v32 = vsel %vm441_vm2, %v9028_v30, %v2797_v48 }
 0x33c   :  { %2864 = vrot.lane.b32.xlu2 %v8934_v1, %s6331_s2 }
 0x33d   :  { %2870 = vrot.lane.b32.xlu1 %v8891_v41, %s6331_s2 }
 0x33e   :  { %2874 = vrot.lane.b32.xlu0 %v8866_v34, %s6331_s2  ;;  %v9170_v31 = vpop.permute.xlu2 %3076 }
 0x33f   :  { %11480 = vst [vmem:[#allocation101_spill] sm:$0xff] %v9170_v31  ;;  %v9172_v49 = vpop.permute.xlu1 %2814 }
 0x340   :  { %v9174_v33 = vpop.permute.xlu0 %2812 }
 0x344   :  { %2872 = vrot.lane.b32.xlu2 %v8873_v57, %s6331_s2 }
 0x345   :  { %2856 = vrot.lane.b32.xlu1 %v8989_v39, %s6331_s2 }
 0x346   :  { %3014 = vrot.lane.b32.xlu0 %v11481_v53, %s6330_s0  ;;  %v9182_v62 = vpop.permute.xlu2 %2844 }
 0x347   :  { %v9184_v35 = vpop.permute.xlu1 %3070 }
 0x348   :  { %11482 = vst [vmem:[#allocation64_spill] sm:$0xff] %v9184_v35  ;;  %v9186_v10 = vpop.permute.xlu0 %2790 }
 0x349   :  { %11483 = vst [vmem:[#allocation102_spill] sm:$0xff] %v9186_v10  ;;  %v2925_v11 = vsel %vm441_vm2, %v9186_v10, %v2799_v44  ;;  %v11488_v10 = vld [vmem:[#allocation123_spill] sm:$0xff] }
 0x34c   :  { %2866 = vrot.lane.b32.xlu2 %v8920_v43, %s6331_s2 }
 0x34d   :  { %2880 = vrot.lane.b32.xlu1 %v8839_v9, %s6331_s2 }
 0x34e   :  { %3112 = vrot.lane.b32.xlu0 %v8989_v39, %s6330_s0  ;;  %v9194_v54 = vpop.permute.xlu2 %2830 }
 0x34f   :  { %v9196_v27 = vpop.permute.xlu1 %2792 }
 0x350   :  { %11484 = vst [vmem:[#allocation40_spill] sm:$0xff] %v9196_v27  ;;  %v2807_v53 = vpop.permute.xlu0 %2806 }
 0x354   :  { %2858 = vrot.lane.b32.xlu2 %v8985_v2, %s6331_s2 }
 0x355   :  { %2882 = vrot.lane.b32.xlu1 %v8825_v42, %s6331_s2 }
 0x356   :  { %3102 = vrot.lane.b32.xlu0 %v8699_v3, %s6330_s0  ;;  %v9204_v31 = vpop.permute.xlu2 %3078 }
 0x357   :  { %11485 = vst [vmem:[#allocation93_spill] sm:$0xff] %v9204_v31  ;;  %v9206_v35 = vpop.permute.xlu1 %3048 }
 0x358   :  { %11486 = vst [vmem:[#allocation63_spill] sm:$0xff] %v9206_v35  ;;  %v2801_v39 = vpop.permute.xlu0 %2800  ;;  %v2969_v35 = vmul.f32 %v11471_v24, %v2925_v11  ;;  %v2921_v11 = vsel %vm441_vm2, %v2799_v44, %v2807_v53  ;;  %v2920_v44 = vsel %vm441_vm2, %v2797_v48, %v9038_v18  ;;  %v2916_v48 = vsel %vm441_vm2, %v9038_v18, %v9174_v33 }
 0x359   :  { %v2926_v3 = vsel %vm441_vm2, %v9196_v27, %v2801_v39 }
 0x35a   :  { %v2985_v31 = vmul.f32 %v11471_v24, %v2926_v3  ;;  %v2953_v3 = vmul.f32 %v11471_v24, %v2924_v32 }
 0x35c   :  { %3020 = vrot.lane.b32.xlu2 %v11487_v25, %s6330_s0  ;;  %3777 = vmatpush.msrb.mxu1 %v2985_v31 }
 0x35d   :  { %3018 = vrot.lane.b32.xlu1 %v11488_v10, %s6330_s0 }
 0x35e   :  { %3100 = vrot.lane.b32.xlu0 %v8707_v61, %s6330_s0  ;;  %v9233_v27 = vpop.permute.xlu2 %2846  ;;  %3778 = vmatpush.msrb.mxu1 %v2969_v35  ;;  %v11489_v35 = vld [vmem:[#allocation29_spill] sm:$0xff] }
 0x35f   :  { %v2809_v21 = vpop.permute.xlu1 %2808  ;;  %v2955_v18 = vmul.f32 %v11489_v35, %v2916_v48 }
 0x360   :  { %v2922_v25 = vsel %vm441_vm2, %v2801_v39, %v2809_v21  ;;  %v9242_v31 = vpop.permute.xlu0 %2818  ;;  %3779 = vmatpush.msrb.mxu1 %v2953_v3  ;;  %v2918_v61 = vsel %vm441_vm2, %v2809_v21, %v9048_v63  ;;  %v2917_v21 = vsel %vm441_vm2, %v2807_v53, %v9172_v49  ;;  %v2954_v53 = vmul.f32 %v11476_v8, %v2920_v44 }
 0x361   :  { %v2919_v32 = vsel %vm441_vm2, %v9130_v38, %v9242_v31  ;;  %v2986_v10 = vmul.f32 %v11476_v8, %v2922_v25  ;;  %v2970_v38 = vmul.f32 %v11476_v8, %v2921_v11  ;;  %v2987_v3 = vmul.f32 %v11489_v35, %v2918_v61  ;;  %v11490_v25 = vld [vmem:[#allocation37_spill] sm:$0xff]  ;;  %6102 = vmatmul.msk.f32.vlgmr.msrb.gmra.mxu1 %vm3268_vm7, %v9208_v7 }
 0x362   :  { %v3003_v39 = vmul.f32 %v11489_v35, %v2919_v32  ;;  %v2971_v11 = vmul.f32 %v11489_v35, %v2917_v21  ;;  %v9614_v35 = vpop.f32.mrf.mxu3 }
 0x363   :  { %3800 = vmatpush.msrb.mxu2 %v2986_v10 }
 0x364   :  { %3114 = vrot.lane.b32.xlu2 %v8985_v2, %s6330_s0  ;;  %3822 = vmatpush.msrb.mxu3 %v3003_v39 }
 0x365   :  { %3106 = vrot.lane.b32.xlu1 %v11461_v4, %s6330_s0  ;;  %3801 = vmatpush.msrb.mxu2 %v2970_v38 }
 0x366   :  { %3060 = vrot.lane.b32.xlu0 %v11490_v25, %s6330_s0  ;;  %v9279_v2 = vpop.permute.xlu2 %3080  ;;  %3823 = vmatpush.msrb.mxu3 %v2987_v3  ;;  %v11492_v3 = vld [vmem:[#allocation50_spill] sm:$0xff] }
 0x367   :  { %3802 = vmatpush.msrb.mxu2 %v2954_v53  ;;  %v9281_v61 = vpop.permute.xlu1 %3072 }
 0x368   :  { %v9283_v32 = vpop.permute.xlu0 %2832  ;;  %3824 = vmatpush.msrb.mxu3 %v2971_v11  ;;  %6104 = vmatmul.msk.f32.vlgmr.msrb.gmra.mxu2 %vm3268_vm7, %v9208_v7 }
 0x369   :  { %6103 = vmatmul.msk.f32.gmra.mxu1 %vm3268_vm7, %v9236_v45 }
 0x36a   :  { %3825 = vmatpush.msrb.mxu3 %v2955_v18 }
 0x36b   :  { %6106 = vmatmul.msk.f32.vlgmr.msrb.gmra.mxu3 %vm3268_vm7, %v9208_v7 }
 0x36c   :  { %3104 = vrot.lane.b32.xlu2 %v11474_v40, %s6330_s0 }
 0x36d   :  { %3066 = vrot.lane.b32.xlu1 %v8564_v17, %s6330_s0  ;;  %v11491_v17 = vld [vmem:[#allocation121_spill] sm:$0xff] }
 0x36e   :  { %3052 = vrot.lane.b32.xlu0 %v8629_v56, %s6330_s0  ;;  %v9298_v4 = vpop.permute.xlu2 %3082 }
 0x36f   :  { %v9300_v10 = vpop.permute.xlu1 %3050 }
 0x370   :  { %v9302_v44 = vpop.permute.xlu0 %2824  ;;  %6105 = vmatmul.msk.f32.gmra.mxu2 %vm3268_vm7, %v9236_v45 }
 0x373   :  { %6107 = vmatmul.msk.f32.gmra.mxu3 %vm3268_vm7, %v9236_v45 }
 0x374   :  { %3064 = vrot.lane.b32.xlu2 %v8570_v47, %s6330_s0 }
 0x375   :  { %3012 = vrot.lane.b32.xlu1 %v11491_v17, %s6330_s0 }
 0x376   :  { %3136 = vrot.lane.b32.xlu0 %v8839_v9, %s6330_s0  ;;  %v2843_v56 = vpop.permute.xlu2 %2842 }
 0x377   :  { %v9316_v40 = vpop.permute.xlu1 %3074 }
 0x378   :  { %v2841_v39 = vpop.permute.xlu0 %2840 }
 0x37c   :  { %3062 = vrot.lane.b32.xlu2 %v8582_v5, %s6330_s0 }
 0x37d   :  { %3110 = vrot.lane.b32.xlu1 %v8998_v6, %s6330_s0 }
 0x37e   :  { %3094 = vrot.lane.b32.xlu0 %v11469_v46, %s6330_s0  ;;  %v9324_v47 = vpop.permute.xlu2 %2862 }
 0x37f   :  { %v2837_v21 = vpop.permute.xlu1 %2836 }
 0x380   :  { %v9326_v38 = vpop.permute.xlu0 %2850 }
 0x381   :  { %v2903_v9 = vsel %vm441_vm2, %v2843_v56, %v9326_v38 }
 0x382   :  { %v3007_v48 = vmul.f32 %v11492_v3, %v2903_v9 }
 0x384   :  { %3058 = vrot.lane.b32.xlu2 %v8605_v20, %s6330_s0  ;;  %3914 = vmatpush.msra.mxu3 %v3007_v48  ;;  %v11493_v20 = vld [vmem:[#allocation89_spill] sm:$0xff] }
 0x385   :  { %3108 = vrot.lane.b32.xlu1 %v9003_v58, %s6330_s0 }
 0x386   :  { %3092 = vrot.lane.b32.xlu0 %v8748_v52, %s6330_s0  ;;  %v9338_v5 = vpop.permute.xlu2 %2854 }
 0x387   :  { %v9344_v6 = vsel %vm441_vm2, %v9233_v27, %v9338_v5  ;;  %v9346_v46 = vpop.permute.xlu1 %2822 }
 0x388   :  { %v9348_v53 = vpop.permute.xlu0 %2860 }
 0x38c   :  { %3054 = vrot.lane.b32.xlu2 %v11493_v20, %s6330_s0  ;;  %v2906_v20 = vsel %vm441_vm2, %v9283_v32, %v2841_v39 }
 0x38d   :  { %3056 = vrot.lane.b32.xlu1 %v8617_v37, %s6330_s0 }
 0x38e   :  { %3084 = vrot.lane.b32.xlu0 %v8790_v59, %s6330_s0  ;;  %v9356_v52 = vpop.permute.xlu2 %2878 }
 0x38f   :  { %v2839_v58 = vpop.permute.xlu1 %2838 }
 0x390   :  { %v9358_v11 = vpop.permute.xlu0 %2852  ;;  %v2901_v59 = vsel %vm441_vm2, %v2839_v58, %v9233_v27 }
 0x394   :  { %3098 = vrot.lane.b32.xlu2 %v11468_v22, %s6330_s0 }
 0x395   :  { %3096 = vrot.lane.b32.xlu1 %v8719_v55, %s6330_s0  ;;  %v2900_v55 = vsel %vm441_vm2, %v2837_v21, %v9182_v62 }
 0x396   :  { %3126 = vrot.lane.b32.xlu0 %v8891_v41, %s6330_s0  ;;  %v9366_v25 = vpop.permute.xlu2 %2864  ;;  %v2975_v41 = vmul.f32 %v11492_v3, %v2901_v59  ;;  %v2959_v27 = vmul.f32 %v11492_v3, %v2900_v55  ;;  %v2755_v55 = vld [vmem:[#allocation7 + $0x38] sm:$0xff] }
 0x397   :  { %v9368_v37 = vpop.permute.xlu1 %2848 }
 0x398   :  { %v2902_v18 = vsel %vm441_vm2, %v2841_v39, %v9368_v37  ;;  %v9376_v17 = vpop.permute.xlu0 %2876  ;;  %v2904_v39 = vsel %vm441_vm2, %v9150_v13, %v2837_v21  ;;  %v2910_v21 = vsel %vm441_vm2, %v9302_v44, %v9283_v32 }
 0x399   :  { %v2991_v22 = vmul.f32 %v11492_v3, %v2902_v18  ;;  %v11511_v3 = vld [vmem:[#allocation90_spill] sm:$0xff] }
 0x39b   :  { %3915 = vmatpush.msra.mxu3 %v2991_v22 }
 0x39c   :  { %3134 = vrot.lane.b32.xlu2 %v8852_v26, %s6330_s0 }
 0x39d   :  { %3132 = vrot.lane.b32.xlu1 %v8861_v16, %s6330_s0  ;;  %3916 = vmatpush.msra.mxu3 %v2975_v41  ;;  %v11494_v16 = vld [vmem:[#allocation54_spill] sm:$0xff] }
 0x39e   :  { %3120 = vrot.lane.b32.xlu0 %v8934_v1, %s6330_s0  ;;  %v9390_v9 = vpop.permute.xlu2 %2872  ;;  %v2905_v1 = vsel %vm441_vm2, %v9194_v54, %v2839_v58  ;;  %v2990_v22 = vmul.f32 %v11494_v16, %v2906_v20  ;;  %v2958_v58 = vmul.f32 %v11494_v16, %v2904_v39  ;;  %v11496_v39 = vld [vmem:[#allocation15_spill] sm:$0xff] }
 0x39f   :  { %3917 = vmatpush.msra.mxu3 %v2959_v27  ;;  %v2835_v48 = vpop.permute.xlu1 %2834 }
 0x3a0   :  { %v2907_v26 = vsel %vm441_vm2, %v2835_v48, %v2843_v56  ;;  %v9397_v59 = vpop.permute.xlu0 %2868  ;;  %6114 = vmatmul.msk.f32.vlgmr.msra.gmra.mxu3 %vm3268_vm7, %v9208_v7  ;;  %v2974_v56 = vmul.f32 %v11494_v16, %v2905_v1 }
 0x3a1   :  { %v3006_v18 = vmul.f32 %v11494_v16, %v2907_v26 }
 0x3a3   :  { %3891 = vmatpush.msra.mxu2 %v3006_v18  ;;  %v2909_v18 = vsel %vm441_vm2, %v9346_v46, %v9194_v54 }
 0x3a4   :  { %3090 = vrot.lane.b32.xlu2 %v11477_v14, %s6330_s0 }
 0x3a5   :  { %3138 = vrot.lane.b32.xlu1 %v8825_v42, %s6330_s0  ;;  %3892 = vmatpush.msra.mxu2 %v2990_v22  ;;  %v11495_v42 = vld [vmem:[#allocation56_spill] sm:$0xff] }
 0x3a6   :  { %4430 = vperm.xlu0 %6217, %v2755_v55   ;;  %v2867_v41 = vpop.permute.xlu2 %2866  ;;  %v2989_v32 = vmul.f32 %v11495_v42, %v2910_v21  ;;  %v2973_v1 = vmul.f32 %v11495_v42, %v2909_v18  ;;  %v11497_v21 = vld [vmem:[#allocation34_spill] sm:$0xff] }
 0x3a7   :  { %3893 = vmatpush.msra.mxu2 %v2974_v56  ;;  %v9415_v27 = vpop.permute.xlu1 %2826 }
 0x3a8   :  { %v2911_v14 = vsel %vm441_vm2, %v9415_v27, %v2835_v48  ;;  %v9424_v20 = vpop.permute.xlu0 %3016  ;;  %6115 = vmatmul.msk.f32.gmra.mxu3 %vm3268_vm7, %v9236_v45  ;;  %v2908_v48 = vsel %vm441_vm2, %v9160_v50, %v9150_v13 }
 0x3a9   :  { %v3005_v26 = vmul.f32 %v11495_v42, %v2911_v14  ;;  %3894 = vmatpush.msra.mxu2 %v2958_v58  ;;  %v2957_v13 = vmul.f32 %v11495_v42, %v2908_v48 }
 0x3aa   :  { %6112 = vmatmul.msk.f32.vlgmr.msra.gmra.mxu2 %vm3268_vm7, %v9208_v7 }
 0x3ab   :  { %3868 = vmatpush.msra.mxu1 %v3005_v26 }
 0x3ac   :  { %3086 = vrot.lane.b32.xlu2 %v8783_v15, %s6330_s0 }
 0x3ad   :  { %3088 = vrot.lane.b32.xlu1 %v8778_v28, %s6330_s0  ;;  %3869 = vmatpush.msra.mxu1 %v2989_v32  ;;  %v2890_v28 = vsel %vm441_vm2, %v9366_v25, %v9390_v9 }
 0x3ae   :  { %v9445_v54 = vpop.permute.xlu2 %2858  ;;  %v2994_v18 = vmul.f32 %v11497_v21, %v2890_v28 }
 0x3af   :  { %v2895_v22 = vsel %vm441_vm2, %v9445_v54, %v2867_v41  ;;  %3870 = vmatpush.msra.mxu1 %v2973_v1  ;;  %v9450_v55 = vpop.permute.xlu1 %2870  ;;  %v9484_v1 = vpop.f32.mrf.mxu2 }
 0x3b0   :  { %v3009_v56 = vmul.f32 %v11496_v39, %v2895_v22  ;;  %v9454_v15 = vpop.permute.xlu0 %2874  ;;  %v2889_v26 = vsel %vm441_vm2, %v9324_v47, %v9450_v55 }
 0x3b1   :  { %v2891_v58 = vsel %vm441_vm2, %v2867_v41, %v9454_v15  ;;  %3871 = vmatpush.msra.mxu1 %v2957_v13  ;;  %v2888_v41 = vsel %vm441_vm2, %v9348_v53, %v9397_v59  ;;  %v2978_v32 = vmul.f32 %v11497_v21, %v2889_v26  ;;  %v9492_v13 = vpop.f32.mrf.mxu1 }
 0x3b2   :  { %v3010_v14 = vmul.f32 %v11497_v21, %v2891_v58  ;;  %6110 = vmatmul.msk.f32.vlgmr.msra.gmra.mxu1 %vm3268_vm7, %v9208_v7  ;;  %6113 = vmatmul.msk.f32.gmra.mxu2 %vm3268_vm7, %v9236_v45 }
 0x3b3   :  { %3960 = vmatpush.msrb.mxu1 %v3009_v56  ;;  %v2962_v56 = vmul.f32 %v11497_v21, %v2888_v41 }
 0x3b4   :  { %3128 = vrot.lane.b32.xlu2 %v8873_v57, %s6330_s0  ;;  %3983 = vmatpush.msrb.mxu2 %v3010_v14  ;;  %v3191_v57 = vsel %vm319_vm3, %v9152_v51, %v9140_v29  ;;  %v3190_v14 = vsel %vm319_vm3, %v9058_v60, %v9040_v36 }
 0x3b5   :  { %3130 = vrot.lane.b32.xlu1 %v8866_v34, %s6330_s0  ;;  %v2893_v34 = vsel %vm441_vm2, %v9338_v5, %v9324_v47  ;;  %v2892_v47 = vsel %vm441_vm2, %v9358_v11, %v9348_v53  ;;  %v3189_v5 = vsel %vm319_vm3, %v9005_v12, %v8982_v23 }
 0x3b6   :  { %v9482_v48 = vpop.permute.xlu2 %3020  ;;  %3984 = vmatpush.msrb.mxu2 %v2994_v18  ;;  %v11498_v18 = vld [vmem:[#allocation16_spill] sm:$0xff]  ;;  %v2961_v24 = vmul.f32 %v11496_v39, %v2892_v47 }
 0x3b7   :  { %v9490_v22 = vpop.permute.xlu1 %2856  ;;  %v3254_v42 = vmul.f32 %v11498_v18, %v3191_v57  ;;  %v3238_v53 = vmul.f32 %v11498_v18, %v3190_v14  ;;  %v11500_v57 = vld [vmem:[#allocation38_spill] sm:$0xff]  ;;  %v11504_v47 = vld [vmem:[#allocation92_spill] sm:$0xff] }
 0x3b8   :  { %v2894_v28 = vsel %vm441_vm2, %v9490_v22, %v9366_v25  ;;  %v9503_v58 = vpop.permute.xlu0 %3014  ;;  %3985 = vmatpush.msrb.mxu2 %v2978_v32  ;;  %v11499_v25 = vld [vmem:[#allocation98_spill] sm:$0xff]  ;;  %v2977_v32 = vmul.f32 %v11496_v39, %v2893_v34 }
 0x3b9   :  { %v2993_v26 = vmul.f32 %v11496_v39, %v2894_v28  ;;  %v3195_v41 = vsel %vm319_vm3, %v11499_v25, %v9152_v51  ;;  %v11502_v51 = vld [vmem:[#allocation99_spill] sm:$0xff]  ;;  %v11503_v34 = vld [vmem:[#allocation30_spill] sm:$0xff]  ;;  %v9551_v39 = vpop.f32.mrf.mxu2 }
 0x3ba   :  { %6111 = vmatmul.msk.f32.gmra.mxu1 %vm3268_vm7, %v9236_v45  ;;  %3986 = vmatpush.msrb.mxu2 %v2962_v56  ;;  %v11501_v56 = vld [vmem:[#allocation88_spill] sm:$0xff] }
 0x3bb   :  { %3961 = vmatpush.msrb.mxu1 %v2993_v26  ;;  %6120 = vmatmul.msk.f32.vlgmr.msrb.gmra.mxu2 %vm3268_vm7, %v9208_v7  ;;  %v3188_v28 = vsel %vm319_vm3, %v11501_v56, %v11500_v57  ;;  %v3222_v26 = vmul.f32 %v11498_v18, %v3189_v5  ;;  %v11505_v5 = vld [vmem:[#allocation95_spill] sm:$0xff] }
 0x3bc   :  { %4081 = vmatpush.msra.mxu2 %v3254_v42  ;;  %3124 = vrot.lane.b32.xlu2 %v8903_v0, %s6330_s0  ;;  %v3194_v42 = vsel %vm319_vm3, %v11502_v51, %v9058_v60  ;;  %v3253_v0 = vmul.f32 %v11503_v34, %v3195_v41 }
 0x3bd   :  { %3122 = vrot.lane.b32.xlu1 %v8920_v43, %s6330_s0  ;;  %3962 = vmatpush.msrb.mxu1 %v2977_v32  ;;  %v3193_v43 = vsel %vm319_vm3, %v11504_v47, %v9005_v12  ;;  %v3206_v32 = vmul.f32 %v11498_v18, %v3188_v28  ;;  %v3237_v41 = vmul.f32 %v11503_v34, %v3194_v42  ;;  %v11506_v42 = vld [vmem:[#allocation27_spill] sm:$0xff]  ;;  %v9588_v18 = vld [vmem:[#allocation5 + $0xa0] sm:$0xff] }
 0x3be   :  { %4082 = vmatpush.msra.mxu2 %v3238_v53  ;;  %v9543_v14 = vpop.permute.xlu2 %3114  ;;  %v9556_v53 = vpop.f32.mrf.mxu1  ;;  %v3221_v12 = vmul.f32 %v11503_v34, %v3193_v43 }
 0x3bf   :  { %3963 = vmatpush.msrb.mxu1 %v2961_v24  ;;  %v2881_v21 = vpop.permute.xlu1 %2880  ;;  %v3192_v24 = vsel %vm319_vm3, %v9482_v48, %v11501_v56 }
 0x3c0   :  { %4083 = vmatpush.msra.mxu2 %v3222_v26  ;;  %v9553_v60 = vpop.permute.xlu0 %3112  ;;  %v3205_v28 = vmul.f32 %v11503_v34, %v3192_v24  ;;  %v11507_v26 = vld [vmem:[#allocation26_spill] sm:$0xff] }
 0x3c1   :  { %4058 = vmatpush.msra.mxu1 %v3253_v0 }
 0x3c2   :  { %6118 = vmatmul.msk.f32.vlgmr.msrb.gmra.mxu1 %vm3268_vm7, %v9208_v7  ;;  %4084 = vmatpush.msra.mxu2 %v3206_v32  ;;  %v2946_v32 = vsel %vm441_vm2, %v2881_v21, %v11507_v26  ;;  %v2945_v26 = vsel %vm441_vm2, %v9356_v52, %v11511_v3  ;;  %v11514_v3 = vld [vmem:[#allocation19_spill] sm:$0xff] }
 0x3c3   :  { %4059 = vmatpush.msra.mxu1 %v3237_v41  ;;  %6121 = vmatmul.msk.f32.gmra.mxu2 %vm3268_vm7, %v9236_v45  ;;  %v11508_v41 = vld [vmem:[#allocation42_spill] sm:$0xff] }
 0x3c4   :  { %3116 = vrot.lane.b32.xlu2 %v11505_v5, %s6330_s0  ;;  %v11509_v5 = vld [vmem:[#allocation32_spill] sm:$0xff] }
 0x3c5   :  { %4060 = vmatpush.msra.mxu1 %v3221_v12  ;;  %3118 = vrot.lane.b32.xlu1 %v11506_v42, %s6330_s0  ;;  %v2886_v12 = vsel %vm441_vm2, %v9390_v9, %v2881_v21  ;;  %v2885_v9 = vsel %vm441_vm2, %v9450_v55, %v9356_v52  ;;  %v2980_v21 = vmul.f32 %v11509_v5, %v2946_v32  ;;  %v11516_v32 = vld [vmem:[#allocation60_spill] sm:$0xff] }
 0x3c6   :  { %v9572_v56 = vpop.permute.xlu2 %3104  ;;  %v2964_v52 = vmul.f32 %v11509_v5, %v2945_v26  ;;  %v2884_v55 = vsel %vm441_vm2, %v9397_v59, %v9376_v17  ;;  %v3187_v26 = vsel %vm319_vm3, %v9140_v29, %v9300_v10  ;;  %v11517_v59 = vld [vmem:[#allocation40_spill] sm:$0xff] }
 0x3c7   :  { %4061 = vmatpush.msra.mxu1 %v3205_v28  ;;  %v2883_v0 = vpop.permute.xlu1 %2882  ;;  %v11510_v28 = vld [vmem:[#allocation59_spill] sm:$0xff] }
 0x3c8   :  { %v2887_v43 = vsel %vm441_vm2, %v9454_v15, %v2883_v0  ;;  %v2947_v24 = vsel %vm441_vm2, %v2883_v0, %v11508_v41  ;;  %v2754_v15 = vld [vmem:[#allocation7 + $0x30] sm:$0xff]  ;;  %v9596_v0 = vpop.f32.mrf.mxu2  ;;  %v9605_v41 = vpop.f32.mrf.mxu1  ;;  %v2995_v16 = vmul.f32 %v11510_v28, %v2886_v12  ;;  %v2979_v12 = vmul.f32 %v11510_v28, %v2885_v9 }
 0x3c9   :  { %v2996_v42 = vmul.f32 %v11509_v5, %v2947_v24  ;;  %v3011_v34 = vmul.f32 %v11510_v28, %v2887_v43  ;;  %11512 = vst [vmem:[#allocation104_spill] sm:$0xff] %v9596_v0  ;;  %v9603_v43 = vpop.permute.xlu0 %3102  ;;  %v2944_v24 = vsel %vm441_vm2, %v9376_v17, %v11514_v3  ;;  %v2963_v9 = vmul.f32 %v11510_v28, %v2884_v55  ;;  %v9652_v55 = vld [vmem:[#allocation5 + $0xb8] sm:$0xff] }
 0x3ca   :  { %6119 = vmatmul.msk.f32.gmra.mxu1 %vm3268_vm7, %v9236_v45  ;;  %11513 = vst [vmem:[#allocation57_spill] sm:$0xff] %v9605_v41  ;;  %v2948_v8 = vmul.f32 %v11509_v5, %v2944_v24  ;;  %v11521_v24 = vld [vmem:[#allocation102_spill] sm:$0xff]  ;;  %v11522_v5 = vld [vmem:[#allocation25_spill] sm:$0xff] }
 0x3cb   :  { %3661 = vmatpush.msra.mxu0 %v2996_v42  ;;  %4006 = vmatpush.msrb.mxu3 %v3011_v34  ;;  %v11515_v34 = vld [vmem:[#allocation94_spill] sm:$0xff]  ;;  %v11523_v41 = vld [vmem:[#allocation13_spill] sm:$0xff] }
 0x3cc   :  { %6128 = vmatmul.msk.f32.vlgmr.msra.gmra.mxu2 %vm3268_vm7, %v9588_v18  ;;  %v2931_v42 = vsel %vm441_vm2, %v11516_v32, %v11515_v34  ;;  %v11520_v32 = vld [vmem:[#allocation63_spill] sm:$0xff]  ;;  %v3255_v0 = vmul.f32 %v11523_v41, %v3187_v26 }
 0x3cd   :  { %4425 = vperm.xlu1 %6218, %v2754_v15   ;;  %3662 = vmatpush.msra.mxu0 %v2980_v21  ;;  %v11518_v15 = vld [vmem:[#allocation91_spill] sm:$0xff]  ;;  %v3186_v29 = vsel %vm319_vm3, %v9040_v36, %v11520_v32 }
 0x3ce   :  { %4007 = vmatpush.msrb.mxu3 %v2995_v16  ;;  %v9626_v3 = vpop.permute.xlu2 %3064  ;;  %v2930_v21 = vsel %vm441_vm2, %v11518_v15, %v11517_v59  ;;  %v11519_v16 = vld [vmem:[#allocation48_spill] sm:$0xff]  ;;  %v3239_v26 = vmul.f32 %v11523_v41, %v3186_v29 }
 0x3cf   :  { %v9633_v17 = vpop.permute.xlu1 %3018  ;;  %3663 = vmatpush.msra.mxu0 %v2964_v52  ;;  %v3000_v34 = vmul.f32 %v11519_v16, %v2931_v42  ;;  %v2929_v52 = vsel %vm441_vm2, %v11522_v5, %v11521_v24  ;;  %v11524_v42 = vld [vmem:[#allocation62_spill] sm:$0xff]  ;;  %v2984_v36 = vmul.f32 %v11519_v16, %v2930_v21  ;;  %v9692_v24 = vpop.f32.mrf.mxu3 }
 0x3d0   :  { %4008 = vmatpush.msrb.mxu3 %v2979_v12  ;;  %v3185_v12 = vsel %vm319_vm3, %v8982_v23, %v11524_v42  ;;  %v9668_v59 = vpop.f32.mrf.mxu2  ;;  %v11527_v23 = vld [vmem:[#allocation58_spill] sm:$0xff]  ;;  %v2968_v21 = vmul.f32 %v11519_v16, %v2929_v52  ;;  %v3170_v52 = vsel %vm319_vm3, %v9281_v61, %v9279_v2 }
 0x3d1   :  { %3664 = vmatpush.msra.mxu0 %v2948_v8  ;;  %v11525_v8 = vld [vmem:[#allocation24_spill] sm:$0xff]  ;;  %11526 = vst [vmem:[#allocation100_spill] sm:$0xff] %v9668_v59  ;;  %v3184_v15 = vsel %vm319_vm3, %v11500_v57, %v11527_v23  ;;  %v3171_v57 = vsel %vm319_vm3, %v9316_v40, %v9298_v4  ;;  %v2913_v59 = vsel %vm441_vm2, %v9172_v49, %v9346_v46 }
 0x3d2   :  { %4009 = vmatpush.msrb.mxu3 %v2963_v9  ;;  %6092 = vmatmul.msk.f32.vlgmr.msra.gmra.mxu0 %vm3268_vm7, %v9208_v7  ;;  %v2928_v5 = vsel %vm441_vm2, %v11525_v8, %v9028_v30  ;;  %v2915_v30 = vsel %vm441_vm2, %v9242_v31, %v9415_v27  ;;  %v9679_v9 = vpop.permute.xlu0 %3100  ;;  %v2912_v49 = vsel %vm441_vm2, %v9174_v33, %v9160_v50 }
 0x3d3   :  { %3753 = vmatpush.msrb.mxu0 %v3000_v34  ;;  %6122 = vmatmul.msk.f32.vlgmr.msrb.gmra.mxu3 %vm3268_vm7, %v9208_v7  ;;  %v3223_v34 = vmul.f32 %v11523_v41, %v3185_v12  ;;  %v2952_v27 = vmul.f32 %v11519_v16, %v2928_v5  ;;  %v11529_v12 = vld [vmem:[#allocation55_spill] sm:$0xff]  ;;  %v11532_v5 = vld [vmem:[#allocation64_spill] sm:$0xff]  ;;  %v2899_v50 = vsel %vm441_vm2, %v9326_v38, %v9445_v54 }
 0x3d4   :  { %6126 = vmatmul.msk.f32.vlgmr.msra.gmra.mxu1 %vm3268_vm7, %v9588_v18  ;;  %4104 = vmatpush.msra.mxu3 %v3255_v0  ;;  %v9683_v0 = vpop.f32.mrf.mxu1  ;;  %v3004_v8 = vmul.f32 %v11529_v12, %v2915_v30  ;;  %v11534_v30 = vld [vmem:[#allocation97_spill] sm:$0xff] }
 0x3d5   :  { %3754 = vmatpush.msrb.mxu0 %v2984_v36  ;;  %6129 = vmatmul.msk.f32.gmra.mxu2 %vm3268_vm7, %v9652_v55  ;;  %11528 = vst [vmem:[#allocation68_spill] sm:$0xff] %v9683_v0  ;;  %v2914_v36 = vsel %vm441_vm2, %v9048_v63, %v9302_v44  ;;  %v11531_v0 = vld [vmem:[#allocation93_spill] sm:$0xff] }
 0x3d6   :  { %4105 = vmatpush.msra.mxu3 %v3239_v26  ;;  %v9690_v29 = vpop.permute.xlu2 %3062  ;;  %v3207_v26 = vmul.f32 %v11523_v41, %v3184_v15  ;;  %v3169_v16 = vsel %vm319_vm3, %v11532_v5, %v11531_v0  ;;  %v2988_v44 = vmul.f32 %v11529_v12, %v2914_v36  ;;  %v11533_v15 = vld [vmem:[#allocation101_spill] sm:$0xff] }
 0x3d7   :  { %3755 = vmatpush.msrb.mxu0 %v2968_v21  ;;  %v9694_v31 = vpop.permute.xlu1 %3106  ;;  %v11530_v21 = vld [vmem:[#allocation31_spill] sm:$0xff]  ;;  %v11538_v41 = vld [vmem:[#allocation53_spill] sm:$0xff] }
 0x3d8   :  { %4106 = vmatpush.msra.mxu3 %v3223_v34  ;;  %v3259_v28 = vmul.f32 %v11530_v21, %v3171_v57  ;;  %v3243_v63 = vmul.f32 %v11530_v21, %v3170_v52  ;;  %v3168_v57 = vsel %vm319_vm3, %v11534_v30, %v11533_v15  ;;  %v3227_v46 = vmul.f32 %v11530_v21, %v3169_v16 }
 0x3d9   :  { %3756 = vmatpush.msrb.mxu0 %v2952_v27  ;;  %v9736_v27 = vpop.f32.mrf.mxu2  ;;  %v3211_v52 = vmul.f32 %v11530_v21, %v3168_v57  ;;  %v3155_v36 = vsel %vm319_vm3, %v9694_v31, %v9543_v14  ;;  %v3174_v21 = vsel %vm319_vm3, %v9626_v3, %v9281_v61  ;;  %v2896_v61 = vsel %vm441_vm2, %v9182_v62, %v9358_v11 }
 0x3da   :  { %4107 = vmatpush.msra.mxu3 %v3207_v26  ;;  %6093 = vmatmul.msk.f32.gmra.mxu0 %vm3268_vm7, %v9236_v45  ;;  %v9742_v33 = vpop.permute.xlu0 %3060  ;;  %v9758_v26 = vpop.f32.mrf.mxu3 }
 0x3db   :  { %3845 = vmatpush.msra.mxu0 %v3004_v8  ;;  %6123 = vmatmul.msk.f32.gmra.mxu3 %vm3268_vm7, %v9236_v45 }
 0x3dc   :  { %4196 = vmatpush.msrb.mxu3 %v3259_v28  ;;  %6127 = vmatmul.msk.f32.gmra.mxu1 %vm3268_vm7, %v9652_v55  ;;  %v2972_v28 = vmul.f32 %v11529_v12, %v2913_v59  ;;  %v2956_v59 = vmul.f32 %v11529_v12, %v2912_v49  ;;  %v9756_v54 = vpop.f32.mrf.mxu1  ;;  %v11536_v49 = vld [vmem:[#allocation45_spill] sm:$0xff] }
 0x3dd   :  { %3846 = vmatpush.msra.mxu0 %v2988_v44  ;;  %v11535_v44 = vld [vmem:[#allocation52_spill] sm:$0xff] }
 0x3de   :  { %4197 = vmatpush.msrb.mxu3 %v3243_v63  ;;  %v9734_v34 = vpop.permute.xlu2 %3058  ;;  %v2898_v63 = vsel %vm441_vm2, %v9368_v37, %v9490_v22  ;;  %v3263_v37 = vmul.f32 %v11538_v41, %v3155_v36 }
 0x3df   :  { %3847 = vmatpush.msra.mxu0 %v2972_v28  ;;  %v3067_v16 = vpop.permute.xlu1 %3066 }
 0x3e0   :  { %4198 = vmatpush.msrb.mxu3 %v3227_v46  ;;  %v3175_v8 = vsel %vm319_vm3, %v3067_v16, %v9316_v40  ;;  %v3179_v38 = vsel %vm319_vm3, %v9734_v34, %v3067_v16  ;;  %v11537_v40 = vld [vmem:[#allocation35_spill] sm:$0xff]  ;;  %v3154_v16 = vsel %vm319_vm3, %v9572_v56, %v9553_v60 }
 0x3e1   :  { %v3257_v57 = vmul.f32 %v11535_v44, %v3179_v38  ;;  %v3258_v46 = vmul.f32 %v11536_v49, %v3175_v8  ;;  %3848 = vmatpush.msra.mxu0 %v2956_v59  ;;  %v3008_v28 = vmul.f32 %v11537_v40, %v2899_v50  ;;  %v2992_v22 = vmul.f32 %v11537_v40, %v2898_v63 }
 0x3e2   :  { %4199 = vmatpush.msrb.mxu3 %v3211_v52  ;;  %6100 = vmatmul.msk.f32.vlgmr.msrb.gmra.mxu0 %vm3268_vm7, %v9208_v7  ;;  %v3173_v50 = vsel %vm319_vm3, %v9690_v29, %v11532_v5  ;;  %v3247_v52 = vmul.f32 %v11538_v41, %v3154_v16  ;;  %v3242_v59 = vmul.f32 %v11536_v49, %v3174_v21  ;;  %v9803_v21 = vpop.f32.mrf.mxu2  ;;  %v9806_v63 = vpop.permute.xlu0 %3052 }
 0x3e3   :  { %4150 = vmatpush.msrb.mxu1 %v3257_v57  ;;  %3937 = vmatpush.msrb.mxu0 %v3008_v28  ;;  %v2976_v36 = vmul.f32 %v11537_v40, %v9344_v6  ;;  %v3172_v5 = vsel %vm319_vm3, %v9742_v33, %v11534_v30  ;;  %v3226_v38 = vmul.f32 %v11536_v49, %v3173_v50  ;;  %v9810_v57 = vpop.f32.mrf.mxu3 }
 0x3e4   :  { %6130 = vmatmul.msk.f32.vlgmr.msra.gmra.mxu3 %vm3268_vm7, %v9588_v18  ;;  %4173 = vmatpush.msrb.mxu2 %v3258_v46  ;;  %v2960_v11 = vmul.f32 %v11537_v40, %v2896_v61  ;;  %v3210_v6 = vmul.f32 %v11536_v49, %v3172_v5  ;;  %v9808_v30 = vpop.f32.mrf.mxu1  ;;  %v3199_v28 = vsel %vm319_vm3, %v9633_v17, %v11499_v25 }
 0x3e5   :  { %4288 = vmatpush.msra.mxu3 %v3263_v37  ;;  %3938 = vmatpush.msrb.mxu0 %v2992_v22  ;;  %v11539_v22 = vld [vmem:[#allocation43_spill] sm:$0xff]  ;;  %v3197_v5 = vsel %vm319_vm3, %v9503_v58, %v11504_v47  ;;  %v3176_v12 = vsel %vm319_vm3, %v9806_v63, %v9742_v33 }
 0x3e6   :  { %v9797_v8 = vpop.permute.xlu2 %3054  ;;  %4174 = vmatpush.msrb.mxu2 %v3242_v59  ;;  %v11540_v59 = vld [vmem:[#allocation44_spill] sm:$0xff]  ;;  %v3209_v33 = vmul.f32 %v11535_v44, %v3176_v12 }
 0x3e7   :  { %4289 = vmatpush.msra.mxu3 %v3247_v52  ;;  %v9800_v62 = vpop.permute.xlu1 %3012  ;;  %3939 = vmatpush.msrb.mxu0 %v2976_v36  ;;  %v3198_v52 = vsel %vm319_vm3, %v9424_v20, %v11502_v51  ;;  %v3252_v36 = vmul.f32 %v11540_v59, %v3199_v28  ;;  %v3220_v28 = vmul.f32 %v11540_v59, %v3197_v5 }
 0x3e8   :  { %4175 = vmatpush.msrb.mxu2 %v3226_v38  ;;  %v3236_v51 = vmul.f32 %v11540_v59, %v3198_v52  ;;  %v3196_v47 = vsel %vm319_vm3, %v9800_v62, %v9482_v48 }
 0x3e9   :  { %3940 = vmatpush.msrb.mxu0 %v2960_v11 }
 0x3ea   :  { %4176 = vmatpush.msrb.mxu2 %v3210_v6  ;;  %6101 = vmatmul.msk.f32.gmra.mxu0 %vm3268_vm7, %v9236_v45  ;;  %v9844_v38 = vpop.permute.xlu0 %3136 }
 0x3eb   :  { %6136 = vmatmul.msk.f32.vlgmr.msrb.gmra.mxu2 %vm3268_vm7, %v9588_v18  ;;  %v9853_v6 = vpop.f32.mrf.mxu3 }
 0x3ec   :  { %6131 = vmatmul.msk.f32.gmra.mxu3 %vm3268_vm7, %v9652_v55  ;;  %v9849_v11 = vpop.f32.mrf.mxu1 }
 0x3ee   :  { %v3099_v46 = vpop.permute.xlu2 %3098 }
 0x3ef   :  { %v3159_v16 = vsel %vm319_vm3, %v3099_v46, %v9694_v31  ;;  %v9825_v37 = vpop.permute.xlu1 %3110  ;;  %v9838_v31 = vpop.f32.mrf.mxu2 }
 0x3f0   :  { %v3262_v50 = vmul.f32 %v11539_v22, %v3159_v16  ;;  %v3153_v61 = vsel %vm319_vm3, %v9603_v43, %v9825_v37 }
 0x3f1   :  { %v3231_v25 = vmul.f32 %v11538_v41, %v3153_v61  ;;  %v3204_v61 = vmul.f32 %v11540_v59, %v3196_v47  ;;  %v3183_v47 = vsel %vm319_vm3, %v9300_v10, %v9734_v34  ;;  %v11541_v10 = vld [vmem:[#allocation51_spill] sm:$0xff] }
 0x3f2   :  { %4265 = vmatpush.msra.mxu2 %v3262_v50  ;;  %6108 = vmatmul.msk.f32.vlgmr.msra.gmra.mxu0 %vm3268_vm7, %v9208_v7  ;;  %v3256_v34 = vmul.f32 %v11541_v10, %v3183_v47 }
 0x3f3   :  { %4290 = vmatpush.msra.mxu3 %v3231_v25  ;;  %4035 = vmatpush.msra.mxu0 %v3252_v36  ;;  %v9876_v36 = vpop.permute.xlu0 %3094 }
 0x3f4   :  { %6137 = vmatmul.msk.f32.gmra.mxu2 %vm3268_vm7, %v9652_v55  ;;  %6138 = vmatmul.msk.f32.vlgmr.msrb.gmra.mxu3 %vm3268_vm7, %v9588_v18  ;;  %v9880_v5 = vpop.f32.mrf.mxu1 }
 0x3f5   :  { %4036 = vmatpush.msra.mxu0 %v3236_v51  ;;  %v9882_v51 = vpop.f32.mrf.mxu3 }
 0x3f6   :  { %v9862_v16 = vpop.permute.xlu2 %3134 }
 0x3f7   :  { %v9864_v50 = vpop.permute.xlu1 %3108  ;;  %4037 = vmatpush.msra.mxu0 %v3220_v28  ;;  %v9874_v25 = vpop.f32.mrf.mxu2 }
 0x3f8   :  { %v3152_v52 = vsel %vm319_vm3, %v9679_v9, %v9864_v50 }
 0x3f9   :  { %v3215_v48 = vmul.f32 %v11538_v41, %v3152_v52  ;;  %4038 = vmatpush.msra.mxu0 %v3204_v61  ;;  %v9888_v61 = vpop.f32.mrf.mxu0  ;;  %v3177_v52 = vsel %vm319_vm3, %v9797_v8, %v9690_v29 }
 0x3fa   :  { %6109 = vmatmul.msk.f32.gmra.mxu0 %vm3268_vm7, %v9236_v45  ;;  %v3225_v49 = vmul.f32 %v11535_v44, %v3177_v52 }
 0x3fb   :  { %4291 = vmatpush.msra.mxu3 %v3215_v48 }
 0x3fc   :  { %6139 = vmatmul.msk.f32.gmra.mxu3 %vm3268_vm7, %v9652_v55  ;;  %v9934_v12 = vpop.f32.mrf.mxu1 }
 0x3fe   :  { %v3091_v59 = vpop.permute.xlu2 %3090 }
 0x3ff   :  { %v3057_v28 = vpop.permute.xlu1 %3056 }
 0x400   :  { %v3178_v48 = vsel %vm319_vm3, %v3057_v28, %v9626_v3  ;;  %v3182_v41 = vsel %vm319_vm3, %v11520_v32, %v3057_v28  ;;  %v3181_v3 = vsel %vm319_vm3, %v11524_v42, %v9797_v8  ;;  %v3163_v32 = vsel %vm319_vm3, %v3091_v59, %v3099_v46  ;;  %v11542_v8 = vld [vmem:[#allocation47_spill] sm:$0xff] }
 0x401   :  { %v3241_v40 = vmul.f32 %v11535_v44, %v3178_v48  ;;  %v3240_v29 = vmul.f32 %v11541_v10, %v3182_v41  ;;  %v3180_v41 = vsel %vm319_vm3, %v11527_v23, %v9806_v63  ;;  %v3224_v42 = vmul.f32 %v11541_v10, %v3181_v3  ;;  %v9944_v48 = vpop.f32.mrf.mxu0 }
 0x402   :  { %6116 = vmatmul.msk.f32.vlgmr.msrb.gmra.mxu0 %vm3268_vm7, %v9208_v7  ;;  %v9924_v7 = vpop.f32.mrf.mxu2  ;;  %v3261_v46 = vmul.f32 %v11542_v8, %v3163_v32  ;;  %v3208_v28 = vmul.f32 %v11541_v10, %v3180_v41  ;;  %v3157_v23 = vsel %vm319_vm3, %v9876_v36, %v9603_v43 }
 0x403   :  { %4151 = vmatpush.msrb.mxu1 %v3241_v40  ;;  %4127 = vmatpush.msrb.mxu0 %v3256_v34  ;;  %v9926_v40 = vpop.permute.xlu0 %3092  ;;  %v3230_v34 = vmul.f32 %v11539_v22, %v3157_v23 }
 0x404   :  { %6146 = vmatmul.msk.f32.vlgmr.msra.gmra.mxu3 %vm3268_vm7, %v9588_v18  ;;  %v3156_v43 = vsel %vm319_vm3, %v9926_v40, %v9679_v9  ;;  %v11543_v9 = vld [vmem:[#allocation46_spill] sm:$0xff]  ;;  %v9968_v41 = vpop.f32.mrf.mxu1 }
 0x405   :  { %4152 = vmatpush.msrb.mxu1 %v3225_v49  ;;  %4128 = vmatpush.msrb.mxu0 %v3240_v29  ;;  %v9936_v49 = vpop.f32.mrf.mxu3  ;;  %v3167_v29 = vsel %vm319_vm3, %v9298_v4, %v3091_v59 }
 0x406   :  { %v3260_v32 = vmul.f32 %v11543_v9, %v3167_v29  ;;  %v3087_v59 = vpop.permute.xlu2 %3086 }
 0x407   :  { %4153 = vmatpush.msrb.mxu1 %v3209_v33  ;;  %v3097_v47 = vpop.permute.xlu1 %3096  ;;  %4129 = vmatpush.msrb.mxu0 %v3224_v42 }
 0x408   :  { %v3158_v63 = vsel %vm319_vm3, %v3097_v47, %v9572_v56  ;;  %6134 = vmatmul.msk.f32.vlgmr.msrb.gmra.mxu1 %vm3268_vm7, %v9588_v18  ;;  %v3214_v56 = vmul.f32 %v11539_v22, %v3156_v43  ;;  %v3201_v43 = vsel %vm319_vm3, %v9862_v16, %v9503_v58 }
 0x409   :  { %v3246_v52 = vmul.f32 %v11539_v22, %v3158_v63  ;;  %4242 = vmatpush.msra.mxu1 %v3261_v46  ;;  %4130 = vmatpush.msrb.mxu0 %v3208_v28  ;;  %v9974_v4 = vpop.f32.mrf.mxu0  ;;  %v3202_v46 = vsel %vm319_vm3, %v9844_v38, %v9424_v20  ;;  %v11544_v63 = vld [vmem:[#allocation33_spill] sm:$0xff] }
 0x40a   :  { %6117 = vmatmul.msk.f32.gmra.mxu0 %vm3268_vm7, %v9236_v45  ;;  %v9965_v45 = vpop.f32.mrf.mxu2 }
 0x40b   :  { %4266 = vmatpush.msra.mxu2 %v3246_v52  ;;  %v3085_v23 = vpop.permute.xlu0 %3084 }
 0x40c   :  { %6147 = vmatmul.msk.f32.gmra.mxu3 %vm3268_vm7, %v9652_v55 }
 0x40d   :  { %4267 = vmatpush.msra.mxu2 %v3230_v34  ;;  %v9970_v33 = vpop.f32.mrf.mxu3  ;;  %v3251_v34 = vmul.f32 %v11544_v63, %v3202_v46 }
 0x40e   :  { %v3129_v46 = vpop.permute.xlu2 %3128 }
 0x40f   :  { %4268 = vmatpush.msra.mxu2 %v3214_v56  ;;  %v9959_v3 = vpop.permute.xlu1 %3132 }
 0x410   :  { %6135 = vmatmul.msk.f32.gmra.mxu1 %vm3268_vm7, %v9652_v55  ;;  %6144 = vmatmul.msk.f32.vlgmr.msra.gmra.mxu2 %vm3268_vm7, %v9588_v18  ;;  %v3200_v20 = vsel %vm319_vm3, %v9959_v3, %v9800_v62 }
 0x411   :  { %v10004_v58 = vpop.f32.mrf.mxu0 }
 0x412   :  { %6124 = vmatmul.msk.f32.vlgmr.msra.gmra.mxu0 %vm3268_vm7, %v9588_v18  ;;  %v9991_v56 = vpop.f32.mrf.mxu2 }
 0x413   :  { %4219 = vmatpush.msra.mxu0 %v3260_v32  ;;  %v3235_v32 = vmul.f32 %v11544_v63, %v3201_v43  ;;  %v3165_v43 = vsel %vm319_vm3, %v11531_v0, %v3087_v59 }
 0x414   :  { %v3228_v0 = vmul.f32 %v11543_v9, %v3165_v43 }
 0x415   :  { %v10001_v29 = vpop.f32.mrf.mxu3 }
 0x416   :  { %v3125_v43 = vpop.permute.xlu2 %3124 }
 0x417   :  { %v3139_v42 = vpop.permute.xlu1 %3138 }
 0x418   :  { %v3203_v28 = vsel %vm319_vm3, %v3139_v42, %v9633_v17  ;;  %6145 = vmatmul.msk.f32.gmra.mxu2 %vm3268_vm7, %v9652_v55  ;;  %v9999_v17 = vpop.f32.mrf.mxu1 }
 0x419   :  { %v3267_v52 = vmul.f32 %v11544_v63, %v3203_v28  ;;  %v3219_v28 = vmul.f32 %v11544_v63, %v3200_v20 }
 0x41a   :  { %6125 = vmatmul.msk.f32.gmra.mxu0 %vm3268_vm7, %v9652_v55 }
 0x41b   :  { %4380 = vmatpush.msrb.mxu3 %v3267_v52  ;;  %v3161_v52 = vsel %vm319_vm3, %v3087_v59, %v9876_v36  ;;  %v3160_v36 = vsel %vm319_vm3, %v3085_v23, %v9926_v40  ;;  %v10033_v40 = vpop.f32.mrf.mxu2 }
 0x41d   :  { %4381 = vmatpush.msrb.mxu3 %v3251_v34 }
 0x41f   :  { %4382 = vmatpush.msrb.mxu3 %v3235_v32  ;;  %v3089_v10 = vpop.permute.xlu1 %3088 }
 0x420   :  { %v3162_v62 = vsel %vm319_vm3, %v3089_v10, %v3097_v47  ;;  %v3166_v44 = vsel %vm319_vm3, %v9279_v2, %v3089_v10  ;;  %v3164_v2 = vsel %vm319_vm3, %v11533_v15, %v3085_v23  ;;  %v3229_v10 = vmul.f32 %v11542_v8, %v3161_v52  ;;  %v3127_v47 = vpop.permute.xlu0 %3126  ;;  %v10036_v32 = vpop.f32.mrf.mxu1 }
 0x421   :  { %v3244_v34 = vmul.f32 %v11543_v9, %v3166_v44  ;;  %v3245_v20 = vmul.f32 %v11542_v8, %v3162_v62  ;;  %4383 = vmatpush.msrb.mxu3 %v3219_v28  ;;  %v3213_v44 = vmul.f32 %v11542_v8, %v3160_v36  ;;  %v3212_v59 = vmul.f32 %v11543_v9, %v3164_v2  ;;  %v10038_v15 = vpop.f32.mrf.mxu3  ;;  %v10040_v28 = vpop.f32.mrf.mxu0 }
 0x422   :  { %6154 = vmatmul.msk.f32.vlgmr.msrb.gmra.mxu3 %vm3268_vm7, %v9588_v18  ;;  %6132 = vmatmul.msk.f32.vlgmr.msrb.gmra.mxu0 %vm3268_vm7, %v9588_v18  ;;  %v3142_v52 = vsel %vm319_vm3, %v3129_v46, %v9844_v38  ;;  %v3141_v36 = vsel %vm319_vm3, %v3127_v47, %v9862_v16  ;;  %v3140_v38 = vsel %vm319_vm3, %v3125_v43, %v9959_v3 }
 0x423   :  { %4243 = vmatpush.msra.mxu1 %v3245_v20  ;;  %4220 = vmatpush.msra.mxu0 %v3244_v34  ;;  %v11545_v34 = vld [vmem:[#allocation23_spill] sm:$0xff] }
 0x424   :  { %v3250_v2 = vmul.f32 %v11545_v34, %v3142_v52  ;;  %v3218_v16 = vmul.f32 %v11545_v34, %v3140_v38 }
 0x425   :  { %4244 = vmatpush.msra.mxu1 %v3229_v10  ;;  %4221 = vmatpush.msra.mxu0 %v3228_v0 }
 0x427   :  { %4245 = vmatpush.msra.mxu1 %v3213_v44  ;;  %v3131_v23 = vpop.permute.xlu1 %3130  ;;  %4222 = vmatpush.msra.mxu0 %v3212_v59 }
 0x428   :  { %v3143_v62 = vsel %vm319_vm3, %v3131_v23, %v3139_v42  ;;  %6142 = vmatmul.msk.f32.vlgmr.msra.gmra.mxu1 %vm3268_vm7, %v9588_v18  ;;  %v3234_v42 = vmul.f32 %v11545_v34, %v3141_v36  ;;  %v3121_v10 = vpop.permute.xlu0 %3120 }
 0x429   :  { %v3266_v20 = vmul.f32 %v11545_v34, %v3143_v62  ;;  %v3146_v52 = vsel %vm319_vm3, %v3121_v10, %v3129_v46  ;;  %v10069_v62 = vpop.f32.mrf.mxu3  ;;  %v3150_v36 = vsel %vm319_vm3, %v9553_v60, %v3121_v10  ;;  %v10083_v34 = vpop.f32.mrf.mxu0 }
 0x42a   :  { %6155 = vmatmul.msk.f32.gmra.mxu3 %vm3268_vm7, %v9652_v55  ;;  %6133 = vmatmul.msk.f32.gmra.mxu0 %vm3268_vm7, %v9652_v55  ;;  %v3117_v60 = vpop.permute.xlu2 %3116 }
 0x42b   :  { %4357 = vmatpush.msrb.mxu2 %v3266_v20 }
 0x42d   :  { %v10062_v0 = vpop.f32.mrf.mxu2  ;;  %4358 = vmatpush.msrb.mxu2 %v3250_v2  ;;  %v11546_v2 = vld [vmem:[#allocation18_spill] sm:$0xff] }
 0x42f   :  { %v10065_v44 = vpop.f32.mrf.mxu1  ;;  %4359 = vmatpush.msrb.mxu2 %v3234_v42  ;;  %v3123_v59 = vpop.permute.xlu1 %3122  ;;  %v11547_v42 = vld [vmem:[#allocation21_spill] sm:$0xff] }
 0x430   :  { %v3147_v3 = vsel %vm319_vm3, %v3123_v59, %v3131_v23  ;;  %v3151_v20 = vsel %vm319_vm3, %v9543_v14, %v3123_v59  ;;  %6143 = vmatmul.msk.f32.gmra.mxu1 %vm3268_vm7, %v9652_v55  ;;  %v3249_v23 = vmul.f32 %v11547_v42, %v3146_v52  ;;  %v3248_v14 = vmul.f32 %v11546_v2, %v3150_v36 }
 0x431   :  { %v3264_v38 = vmul.f32 %v11546_v2, %v3151_v20  ;;  %v3265_v46 = vmul.f32 %v11547_v42, %v3147_v3  ;;  %4360 = vmatpush.msrb.mxu2 %v3218_v16  ;;  %v3144_v3 = vsel %vm319_vm3, %v3117_v60, %v3125_v43  ;;  %v3148_v36 = vsel %vm319_vm3, %v9864_v50, %v3117_v60 }
 0x432   :  { %6152 = vmatmul.msk.f32.vlgmr.msrb.gmra.mxu2 %vm3268_vm7, %v9588_v18  ;;  %6140 = vmatmul.msk.f32.vlgmr.msra.gmra.mxu0 %vm3268_vm7, %v9588_v18  ;;  %v3217_v43 = vmul.f32 %v11547_v42, %v3144_v3 }
 0x433   :  { %4334 = vmatpush.msrb.mxu1 %v3265_v46  ;;  %4311 = vmatpush.msrb.mxu0 %v3264_v38 }
 0x435   :  { %4335 = vmatpush.msrb.mxu1 %v3249_v23  ;;  %v10091_v10 = vpop.f32.mrf.mxu2  ;;  %4312 = vmatpush.msrb.mxu0 %v3248_v14  ;;  %v10107_v23 = vpop.f32.mrf.mxu3 }
 0x437   :  { %v10093_v16 = vpop.f32.mrf.mxu1  ;;  %v3119_v59 = vpop.permute.xlu1 %3118 }
 0x438   :  { %v3145_v52 = vsel %vm319_vm3, %v3119_v59, %v3127_v47  ;;  %v3149_v20 = vsel %vm319_vm3, %v9825_v37, %v3119_v59  ;;  %v10114_v37 = vpop.f32.mrf.mxu0  ;;  %v3216_v47 = vmul.f32 %v11546_v2, %v3148_v36 }
 0x439   :  { %v3232_v38 = vmul.f32 %v11546_v2, %v3149_v20  ;;  %v3233_v46 = vmul.f32 %v11547_v42, %v3145_v52  ;;  %v3713_v20 = vadd.f32 %v9924_v7, %v9484_v1  ;;  %v3716_v7 = vadd.f32 %v9965_v45, %v9551_v39 }
 0x43a   :  { %6153 = vmatmul.msk.f32.gmra.mxu2 %vm3268_vm7, %v9652_v55  ;;  %6141 = vmatmul.msk.f32.gmra.mxu0 %vm3268_vm7, %v9652_v55 }
 0x43b   :  { %4336 = vmatpush.msrb.mxu1 %v3233_v46  ;;  %4313 = vmatpush.msrb.mxu0 %v3232_v38  ;;  %v3690_v46 = vadd.f32 %v9934_v12, %v9492_v13  ;;  %v3693_v13 = vadd.f32 %v9968_v41, %v9556_v53 }
 0x43d   :  { %4337 = vmatpush.msrb.mxu1 %v3217_v43  ;;  %4314 = vmatpush.msrb.mxu0 %v3216_v47  ;;  %v10125_v60 = vpop.f32.mrf.mxu3 }
 0x43e   :  { %6150 = vmatmul.msk.f32.vlgmr.msrb.gmra.mxu1 %vm3268_vm7, %v9588_v18  ;;  %v10119_v50 = vpop.f32.mrf.mxu2 }
 0x43f   :  { %v10121_v14 = vpop.f32.mrf.mxu1  ;;  %v10145_v47 = vpop.permute.xlu1 %4425 }
 0x440   :  { %v10127_v59 = vpop.f32.mrf.mxu0 }
 0x442   :  { %6148 = vmatmul.msk.f32.vlgmr.msrb.gmra.mxu0 %vm3268_vm7, %v9588_v18 }
 0x445   :  { %v10139_v36 = vpop.f32.mrf.mxu3 }
 0x446   :  { %6151 = vmatmul.msk.f32.gmra.mxu1 %vm3268_vm7, %v9652_v55  ;;  %v10131_v3 = vpop.f32.mrf.mxu2 }
 0x447   :  { %v10133_v52 = vpop.f32.mrf.mxu1 }
 0x44a   :  { %6149 = vmatmul.msk.f32.gmra.mxu0 %vm3268_vm7, %v9652_v55 }
 0x44f   :  { %v10141_v18 = vpop.f32.mrf.mxu0  ;;  %v4086_v38 = vpop.f32.mrf.mxu2 }
 0x450   :  { %v4393_v43 = vadd.f32 %v4086_v38, %v3713_v20  ;;  %v10160_v20 = vpop.permute.xlu0 %4430 }
 0x451   :  { %v4063_v42 = vpop.f32.mrf.mxu1 }
 0x452   :  { %v4392_v63 = vadd.f32 %v4063_v42, %v3690_v46  ;;  %v4435_v2 = vadd.f32 %v10145_v47, %v4393_v43 }
 0x454   :  { %v4434_v55 = vadd.f32 %v10145_v47, %v4392_v63  ;;  %v4467_v8 = vmax.f32 %v4435_v2, 0.0 }
 0x456   :  { %v4466_v9 = vmax.f32 %v4434_v55, 0.0  ;;  %v10149_v1 = vpop.f32.mrf.mxu3  ;;  %4509 = vrot.lane.b32.xlu0 %v4467_v8, %s6331_s2  ;;  %v3736_v55 = vadd.f32 %v10001_v29, %v9614_v35 }
 0x457   :  { %v10158_v12 = vpop.f32.mrf.mxu0 }
 0x458   :  { %4633 = vrot.lane.b32.xlu1 %v4466_v9, %s6330_s0  ;;  %4505 = vrot.lane.b32.xlu2 %v4466_v9, %s6331_s2  ;;  %v4089_v42 = vpop.f32.mrf.mxu2 }
 0x459   :  { %v4066_v63 = vpop.f32.mrf.mxu1  ;;  %v4409_v2 = vadd.f32 %v4089_v42, %v3716_v7 }
 0x45a   :  { %v4408_v38 = vadd.f32 %v4066_v63, %v3693_v13 }
 0x45b   :  { %v4451_v46 = vadd.f32 %v10160_v20, %v4409_v2 }
 0x45c   :  { %v4450_v43 = vadd.f32 %v10160_v20, %v4408_v38  ;;  %v3739_v38 = vadd.f32 %v10038_v15, %v9692_v24  ;;  %v10190_v24 = vld [vmem:[#allocation5 + $0xc8] ss:$0 sm:$0xff] }
 0x45d   :  { %v10164_v39 = vmax.f32 %v4451_v46, 0.0 }
 0x45e   :  { %v4482_v45 = vmax.f32 %v4450_v43, 0.0  ;;  %v10166_v53 = vpop.f32.mrf.mxu3 }
 0x45f   :  { %4814 = vmatpush.msra.mxu2 %v10164_v39  ;;  %v10170_v41 = vpop.f32.mrf.mxu0 }
 0x460   :  { %4794 = vmatpush.msra.mxu1 %v4482_v45  ;;  %4507 = vrot.lane.b32.xlu2 %v4482_v45, %s6331_s2 }
 0x461   :  { %4815 = vmatpush.msra.mxu2 %v4467_v8 }
 0x462   :  { %4795 = vmatpush.msra.mxu1 %v4466_v9  ;;  %6158 = vmatmul.msk.f32.vlgmr.msra.gmra.mxu2 %vm1107_vm11, %v10190_v24 }
 0x463   :  { %6157 = vmatmul.msk.f32.vlgmr.msra.gmra.mxu1 %vm1107_vm11, %v10190_v24 }
 0x467   :  { %v4109_v7 = vpop.f32.mrf.mxu3  ;;  %v10175_v42 = vpop.f32.mrf.mxu0 }
 0x468   :  { %v4394_v13 = vadd.f32 %v4109_v7, %v3736_v55  ;;  %4635 = vrot.lane.b32.xlu2 %v4482_v45, %s6330_s0  ;;  %v11548_v45 = vld [vmem:[#allocation104_spill] sm:$0xff] }
 0x469   :  { %v3805_v55 = vadd.f32 %v9991_v56, %v11548_v45 }
 0x46a   :  { %v4436_v63 = vadd.f32 %v10145_v47, %v4394_v13  ;;  %v11549_v13 = vld [vmem:[#allocation100_spill] sm:$0xff] }
 0x46c   :  { %v4468_v2 = vmax.f32 %v4436_v63, 0.0  ;;  %v3808_v63 = vadd.f32 %v10033_v40, %v11549_v13 }
 0x46e   :  { %4513 = vrot.lane.b32.xlu1 %v4468_v2, %s6331_s2  ;;  %v4178_v43 = vpop.f32.mrf.mxu2 }
 0x46f   :  { %v4112_v46 = vpop.f32.mrf.mxu3  ;;  %v10182_v35 = vpop.f32.mrf.mxu0  ;;  %v4397_v22 = vadd.f32 %v4178_v43, %v3805_v55 }
 0x470   :  { %v4410_v9 = vadd.f32 %v4112_v46, %v3739_v38  ;;  %4641 = vrot.lane.b32.xlu2 %v4468_v2, %s6330_s0 }
 0x472   :  { %v4452_v29 = vadd.f32 %v10160_v20, %v4410_v9  ;;  %v3828_v9 = vadd.f32 %v10069_v62, %v9758_v26 }
 0x474   :  { %v4484_v7 = vmax.f32 %v4452_v29, 0.0 }
 0x476   :  { %4834 = vmatpush.msra.mxu3 %v4484_v7  ;;  %4637 = vrot.lane.b32.xlu1 %v4467_v8, %s6330_s0  ;;  %v4439_v8 = vadd.f32 %v10145_v47, %v4397_v22 }
 0x477   :  { %v4181_v15 = vpop.f32.mrf.mxu2  ;;  %v4201_v46 = vpop.f32.mrf.mxu3 }
 0x478   :  { %v4413_v38 = vadd.f32 %v4181_v15, %v3808_v63  ;;  %4835 = vmatpush.msra.mxu3 %v4468_v2  ;;  %4643 = vrot.lane.b32.xlu2 %v4484_v7, %s6330_s0  ;;  %v10197_v56 = vpop.f32.mrf.mxu0  ;;  %v10207_v29 = vmax.f32 %v4439_v8, 0.0  ;;  %v3831_v2 = vadd.f32 %v10107_v23, %v9810_v57  ;;  %v4398_v45 = vadd.f32 %v4201_v46, %v3828_v9  ;;  %v11550_v63 = vld [vmem:[#allocation57_spill] sm:$0xff] }
 0x479   :  { %6159 = vmatmul.msk.f32.vlgmr.msra.gmra.mxu3 %vm1107_vm11, %v10190_v24 }
 0x47a   :  { %v4455_v40 = vadd.f32 %v10160_v20, %v4413_v38  ;;  %v4440_v26 = vadd.f32 %v10145_v47, %v4398_v45  ;;  %v3920_v45 = vadd.f32 %v10125_v60, %v9853_v6  ;;  %v3667_v60 = vadd.f32 %v10141_v18, %v9888_v61 }
 0x47b   :  { %v3900_v18 = vadd.f32 %v10091_v10, %v9803_v21 }
 0x47c   :  { %v10203_v43 = vmax.f32 %v4455_v40, 0.0  ;;  %v10226_v38 = vmax.f32 %v4440_v26, 0.0  ;;  %v3923_v26 = vadd.f32 %v10139_v36, %v9882_v51  ;;  %v3670_v36 = vadd.f32 %v10158_v12, %v9944_v48 }
 0x47e   :  { %4894 = vmatpush.msrb.mxu2 %v10203_v43  ;;  %4515 = vrot.lane.b32.xlu1 %v4484_v7, %s6331_s2  ;;  %v3782_v7 = vadd.f32 %v9999_v17, %v11550_v63  ;;  %v11551_v17 = vld [vmem:[#allocation68_spill] sm:$0xff] }
 0x47f   :  { %v4204_v55 = vpop.f32.mrf.mxu3 }
 0x480   :  { %4895 = vmatpush.msrb.mxu2 %v10207_v29  ;;  %v10214_v22 = vpop.f32.mrf.mxu0  ;;  %v4414_v13 = vadd.f32 %v4204_v55, %v3831_v2  ;;  %v3785_v2 = vadd.f32 %v10036_v32, %v11551_v17 }
 0x481   :  { %6162 = vmatmul.msk.f32.vlgmr.msrb.gmra.mxu2 %vm1107_vm11, %v10190_v24 }
 0x482   :  { %v4456_v62 = vadd.f32 %v10160_v20, %v4414_v13 }
 0x484   :  { %v10222_v15 = vmax.f32 %v4456_v62, 0.0 }
 0x485   :  { %v4155_v57 = vpop.f32.mrf.mxu1 }
 0x486   :  { %4639 = vrot.lane.b32.xlu1 %v10164_v39, %s6330_s0  ;;  %v4396_v23 = vadd.f32 %v4155_v57, %v3782_v7  ;;  %4914 = vmatpush.msrb.mxu3 %v10222_v15 }
 0x487   :  { %v4293_v8 = vpop.f32.mrf.mxu3 }
 0x488   :  { %v4438_v46 = vadd.f32 %v10145_v47, %v4396_v23  ;;  %v10230_v40 = vpop.f32.mrf.mxu0  ;;  %4915 = vmatpush.msrb.mxu3 %v10226_v38  ;;  %v4402_v62 = vadd.f32 %v4293_v8, %v3920_v45  ;;  %v3897_v45 = vadd.f32 %v10062_v0, %v9736_v27 }
 0x489   :  { %6163 = vmatmul.msk.f32.vlgmr.msrb.gmra.mxu3 %vm1107_vm11, %v10190_v24 }
 0x48a   :  { %v4470_v9 = vmax.f32 %v4438_v46, 0.0  ;;  %v4444_v46 = vadd.f32 %v10145_v47, %v4402_v62 }
 0x48c   :  { %4521 = vrot.lane.b32.xlu0 %v4470_v9, %s6331_s2  ;;  %v10257_v8 = vmax.f32 %v4444_v46, 0.0 }
 0x48d   :  { %v4158_v55 = vpop.f32.mrf.mxu1 }
 0x48e   :  { %4525 = vrot.lane.b32.xlu1 %v10207_v29, %s6331_s2  ;;  %v4412_v13 = vadd.f32 %v4158_v55, %v3785_v2 }
 0x48f   :  { %v4296_v7 = vpop.f32.mrf.mxu3 }
 0x490   :  { %v4454_v63 = vadd.f32 %v10160_v20, %v4412_v13  ;;  %v4040_v57 = vpop.f32.mrf.mxu0  ;;  %v4418_v23 = vadd.f32 %v4296_v7, %v3923_v26  ;;  %v3759_v7 = vadd.f32 %v10170_v41, %v9974_v4  ;;  %v4012_v41 = vadd.f32 %v10149_v1, %v9936_v49 }
 0x491   :  { %v4391_v2 = vadd.f32 %v4040_v57, %v3667_v60 }
 0x492   :  { %v4486_v32 = vmax.f32 %v4454_v63, 0.0  ;;  %v4460_v17 = vadd.f32 %v10160_v20, %v4418_v23 }
 0x493   :  { %v4270_v6 = vpop.f32.mrf.mxu2  ;;  %v4433_v12 = vadd.f32 %v10145_v47, %v4391_v2  ;;  %v3877_v2 = vadd.f32 %v10093_v16, %v9808_v30 }
 0x494   :  { %4649 = vrot.lane.b32.xlu0 %v4470_v9, %s6330_s0  ;;  %4523 = vrot.lane.b32.xlu2 %v4486_v32, %s6331_s2  ;;  %v10251_v51 = vmax.f32 %v4460_v17, 0.0  ;;  %v4401_v48 = vadd.f32 %v4270_v6, %v3897_v45  ;;  %v3874_v6 = vadd.f32 %v10065_v44, %v9756_v54 }
 0x495   :  { %4874 = vmatpush.msrb.mxu1 %v4486_v32  ;;  %v10280_v10 = vmax.f32 %v4433_v12, 0.0 }
 0x496   :  { %4531 = vrot.lane.b32.xlu1 %v10222_v15, %s6331_s2  ;;  %4994 = vmatpush.msra.mxu3 %v10251_v51  ;;  %v4443_v26 = vadd.f32 %v10145_v47, %v4401_v48 }
 0x497   :  { %4875 = vmatpush.msrb.mxu1 %v4470_v9 }
 0x498   :  { %v4043_v55 = vpop.f32.mrf.mxu0  ;;  %6161 = vmatmul.msk.f32.vlgmr.msrb.gmra.mxu1 %vm1107_vm11, %v10190_v24  ;;  %4995 = vmatpush.msra.mxu3 %v10257_v8 }
 0x499   :  { %v4407_v61 = vadd.f32 %v4043_v55, %v3670_v36  ;;  %6167 = vmatmul.msk.f32.vlgmr.msra.gmra.mxu3 %vm1107_vm11, %v10190_v24 }
 0x49b   :  { %v4449_v9 = vadd.f32 %v10160_v20, %v4407_v61  ;;  %v4273_v13 = vpop.f32.mrf.mxu2 }
 0x49c   :  { %v4417_v27 = vadd.f32 %v4273_v13, %v3900_v18  ;;  %4511 = vrot.lane.b32.xlu0 %v10164_v39, %s6331_s2  ;;  %4651 = vrot.lane.b32.xlu2 %v4486_v32, %s6330_s0  ;;  %v10286_v39 = vmax.f32 %v4443_v26, 0.0  ;;  %v3762_v32 = vadd.f32 %v10175_v42, %v10004_v58  ;;  %v4015_v58 = vadd.f32 %v10166_v53, %v9970_v33 }
 0x49d   :  { %v10274_v0 = vmax.f32 %v4449_v9, 0.0  ;;  %v3851_v9 = vadd.f32 %v10182_v35, %v10040_v28 }
 0x49e   :  { %v4459_v21 = vadd.f32 %v10160_v20, %v4417_v27  ;;  %4545 = vrot.lane.b32.xlu1 %v10257_v8, %s6331_s2  ;;  %v3854_v27 = vadd.f32 %v10197_v56, %v10083_v34 }
 0x49f   :  { %4774 = vmatpush.msra.mxu0 %v10274_v0 }
 0x4a0   :  { %v10283_v62 = vmax.f32 %v4459_v21, 0.0  ;;  %v4132_v63 = vpop.f32.mrf.mxu0  ;;  %v3989_v21 = vadd.f32 %v10119_v50, %v9838_v31 }
 0x4a1   :  { %4775 = vmatpush.msra.mxu0 %v10280_v10  ;;  %v4395_v46 = vadd.f32 %v4132_v63, %v3759_v7  ;;  %v3992_v7 = vadd.f32 %v10131_v3, %v9874_v25 }
 0x4a2   :  { %4974 = vmatpush.msra.mxu2 %v10283_v62  ;;  %6156 = vmatmul.msk.f32.vlgmr.msra.gmra.mxu0 %vm1107_vm11, %v10190_v24 }
 0x4a4   :  { %4657 = vrot.lane.b32.xlu0 %v10226_v38, %s6330_s0  ;;  %4975 = vmatpush.msra.mxu2 %v10286_v39 }
 0x4a5   :  { %4529 = vrot.lane.b32.xlu2 %v10226_v38, %s6331_s2  ;;  %v4247_v57 = vpop.f32.mrf.mxu1  ;;  %v4385_v23 = vpop.f32.mrf.mxu3  ;;  %6166 = vmatmul.msk.f32.vlgmr.msra.gmra.mxu2 %vm1107_vm11, %v10190_v24  ;;  %v4437_v38 = vadd.f32 %v10145_v47, %v4395_v46 }
 0x4a6   :  { %4547 = vrot.lane.b32.xlu1 %v10251_v51, %s6331_s2  ;;  %v4400_v60 = vadd.f32 %v4247_v57, %v3874_v6  ;;  %v4406_v42 = vadd.f32 %v4385_v23, %v4012_v41 }
 0x4a7   :  { %v10322_v30 = vmax.f32 %v4437_v38, 0.0 }
 0x4a8   :  { %v4135_v17 = vpop.f32.mrf.mxu0  ;;  %v4442_v33 = vadd.f32 %v10145_v47, %v4400_v60  ;;  %v4448_v16 = vadd.f32 %v10145_v47, %v4406_v42 }
 0x4a9   :  { %v4411_v4 = vadd.f32 %v4135_v17, %v3762_v32 }
 0x4aa   :  { %v10336_v48 = vmax.f32 %v4442_v33, 0.0  ;;  %v10338_v12 = vmax.f32 %v4448_v16, 0.0 }
 0x4ab   :  { %v4453_v36 = vadd.f32 %v10160_v20, %v4411_v4 }
 0x4ac   :  { %4527 = vrot.lane.b32.xlu0 %v10203_v43, %s6331_s2 }
 0x4ad   :  { %v10316_v54 = vmax.f32 %v4453_v36, 0.0  ;;  %4653 = vrot.lane.b32.xlu2 %v10207_v29, %s6330_s0  ;;  %v4250_v49 = vpop.f32.mrf.mxu1  ;;  %v4388_v44 = vpop.f32.mrf.mxu3  ;;  %v3943_v36 = vadd.f32 %v10214_v22, %v10114_v37 }
 0x4ae   :  { %4671 = vrot.lane.b32.xlu1 %v10283_v62, %s6330_s0  ;;  %v4416_v1 = vadd.f32 %v4250_v49, %v3877_v2  ;;  %v4422_v45 = vadd.f32 %v4388_v44, %v4015_v58 }
 0x4af   :  { %4854 = vmatpush.msrb.mxu0 %v10316_v54 }
 0x4b0   :  { %v4458_v53 = vadd.f32 %v10160_v20, %v4416_v1  ;;  %v4464_v55 = vadd.f32 %v10160_v20, %v4422_v45  ;;  %v4224_v29 = vpop.f32.mrf.mxu0 }
 0x4b1   :  { %4855 = vmatpush.msrb.mxu0 %v10322_v30  ;;  %v4399_v26 = vadd.f32 %v4224_v29, %v3851_v9 }
 0x4b2   :  { %v10330_v61 = vmax.f32 %v4458_v53, 0.0  ;;  %v10332_v18 = vmax.f32 %v4464_v55, 0.0  ;;  %6160 = vmatmul.msk.f32.vlgmr.msrb.gmra.mxu0 %vm1107_vm11, %v10190_v24  ;;  %v10372_v31 = vpop.permute.xlu2 %4505 }
 0x4b3   :  { %v4441_v63 = vadd.f32 %v10145_v47, %v4399_v26 }
 0x4b4   :  { %5074 = vmatpush.msrb.mxu3 %v10332_v18  ;;  %4659 = vrot.lane.b32.xlu0 %v10222_v15, %s6330_s0  ;;  %v3966_v15 = vadd.f32 %v10121_v14, %v9849_v11 }
 0x4b5   :  { %4537 = vrot.lane.b32.xlu2 %v10336_v48, %s6331_s2  ;;  %4954 = vmatpush.msra.mxu1 %v10330_v61  ;;  %v4362_v13 = vpop.f32.mrf.mxu2  ;;  %v10375_v46 = vmax.f32 %v4441_v63, 0.0 }
 0x4b6   :  { %4501 = vrot.lane.b32.xlu1 %v10280_v10, %s6331_s2  ;;  %5075 = vmatpush.msrb.mxu3 %v10338_v12  ;;  %v4405_v57 = vadd.f32 %v4362_v13, %v3989_v21 }
 0x4b7   :  { %4955 = vmatpush.msra.mxu1 %v10336_v48  ;;  %6171 = vmatmul.msk.f32.vlgmr.msrb.gmra.mxu3 %vm1107_vm11, %v10190_v24 }
 0x4b8   :  { %v4227_v28 = vpop.f32.mrf.mxu0  ;;  %6165 = vmatmul.msk.f32.vlgmr.msra.gmra.mxu1 %vm1107_vm11, %v10190_v24  ;;  %v4447_v25 = vadd.f32 %v10145_v47, %v4405_v57 }
 0x4b9   :  { %v4415_v35 = vadd.f32 %v4227_v28, %v3854_v27  ;;  %v11552_v27 = vld [vmem:[#allocation17_spill] sm:$0xff]  ;;  %v11553_v28 = vld [vmem:[#allocation14_spill] sm:$0xff] }
 0x4ba   :  { %v10389_v38 = vmax.f32 %v4447_v25, 0.0  ;;  %v10404_v58 = vpop.permute.xlu2 %4507  ;;  %v11554_v25 = vld [vmem:[#allocation28_spill] sm:$0xff] }
 0x4bb   :  { %v4457_v34 = vadd.f32 %v10160_v20, %v4415_v35  ;;  %v4339_v56 = vpop.f32.mrf.mxu1 }
 0x4bc   :  { %v4404_v23 = vadd.f32 %v4339_v56, %v3966_v15  ;;  %4541 = vrot.lane.b32.xlu0 %v10286_v39, %s6331_s2 }
 0x4bd   :  { %v10368_v32 = vmax.f32 %v4457_v34, 0.0  ;;  %4655 = vrot.lane.b32.xlu2 %v10203_v43, %s6330_s0  ;;  %v4365_v11 = vpop.f32.mrf.mxu2  ;;  %v3969_v43 = vadd.f32 %v10133_v52, %v9880_v5  ;;  %v3946_v52 = vadd.f32 %v10230_v40, %v10127_v59  ;;  %v10527_v34 = vld [vmem:[#allocation5 + $0xc0] ss:$0 sm:$0xff] }
 0x4be   :  { %v4446_v50 = vadd.f32 %v10145_v47, %v4404_v23  ;;  %v4421_v14 = vadd.f32 %v4365_v11, %v3992_v7 }
 0x4bf   :  { %4934 = vmatpush.msra.mxu0 %v10368_v32 }
 0x4c0   :  { %v4463_v3 = vadd.f32 %v10160_v20, %v4421_v14  ;;  %v4316_v17 = vpop.f32.mrf.mxu0  ;;  %v10383_v6 = vmax.f32 %v4446_v50, 0.0 }
 0x4c1   :  { %4935 = vmatpush.msra.mxu0 %v10375_v46  ;;  %v4403_v2 = vadd.f32 %v4316_v17, %v3943_v36  ;;  %v11555_v17 = vld [vmem:[#allocation29_spill] sm:$0xff] }
 0x4c2   :  { %v10385_v4 = vmax.f32 %v4463_v3, 0.0  ;;  %6164 = vmatmul.msk.f32.vlgmr.msra.gmra.mxu0 %vm1107_vm11, %v10190_v24  ;;  %v4500_v36 = vld [vmem:[#allocation7 + $0x40] sm:$0x1] }
 0x4c3   :  { %v4342_v41 = vpop.f32.mrf.mxu1  ;;  %v4445_v22 = vadd.f32 %v10145_v47, %v4403_v2  ;;  %v10423_v47 = vpop.permute.xlu2 %4635 }
 0x4c4   :  { %v4420_v60 = vadd.f32 %v4342_v41, %v3969_v43  ;;  %4553 = vrot.lane.b32.xlu0 %v10383_v6, %s6331_s2  ;;  %5054 = vmatpush.msrb.mxu2 %v10385_v4 }
 0x4c5   :  { %4539 = vrot.lane.b32.xlu2 %v10330_v61, %s6331_s2  ;;  %v4477_v40 = vmax.f32 %v4445_v22, 0.0 }
 0x4c6   :  { %v4462_v5 = vadd.f32 %v10160_v20, %v4420_v60  ;;  %5055 = vmatpush.msrb.mxu2 %v10389_v38 }
 0x4c7   :  { %6170 = vmatmul.msk.f32.vlgmr.msrb.gmra.mxu2 %vm1107_vm11, %v10190_v24 }
 0x4c8   :  { %v10406_v42 = vmax.f32 %v4462_v5, 0.0  ;;  %v4319_v49 = vpop.f32.mrf.mxu0 }
 0x4c9   :  { %v4419_v37 = vadd.f32 %v4319_v49, %v3946_v52  ;;  %v11556_v49 = vld [vmem:[#allocation22_spill] sm:$0xff] }
 0x4ca   :  { %5034 = vmatpush.msrb.mxu1 %v10406_v42  ;;  %4555 = vrot.lane.b32.xlu1 %v10406_v42, %s6331_s2 }
 0x4cb   :  { %v4461_v44 = vadd.f32 %v10160_v20, %v4419_v37  ;;  %v10433_v20 = vpop.permute.xlu1 %4633 }
 0x4cc   :  { %4543 = vrot.lane.b32.xlu0 %v10283_v62, %s6331_s2  ;;  %5035 = vmatpush.msrb.mxu1 %v10383_v6  ;;  %v10437_v62 = vpop.permute.xlu2 %4641 }
 0x4cd   :  { %v10416_v59 = vmax.f32 %v4461_v44, 0.0  ;;  %4561 = vrot.lane.b32.xlu2 %v10338_v12, %s6331_s2  ;;  %6169 = vmatmul.msk.f32.vlgmr.msrb.gmra.mxu1 %vm1107_vm11, %v10190_v24 }
 0x4cf   :  { %5014 = vmatpush.msrb.mxu0 %v10416_v59 }
 0x4d1   :  { %5015 = vmatpush.msrb.mxu0 %v4477_v40 }
 0x4d2   :  { %4557 = vrot.lane.b32.xlu1 %v10389_v38, %s6331_s2  ;;  %6168 = vmatmul.msk.f32.vlgmr.msrb.gmra.mxu0 %vm1107_vm11, %v10190_v24 }
 0x4d4   :  { %4629 = vrot.lane.b32.xlu0 %v10280_v10, %s6330_s0 }
 0x4d5   :  { %4503 = vrot.lane.b32.xlu2 %v10274_v0, %s6331_s2 }
 0x4da   :  { %4631 = vrot.lane.b32.xlu1 %v10274_v0, %s6330_s0  ;;  %v10451_v0 = vpop.permute.xlu2 %4643 }
 0x4dc   :  { %4563 = vrot.lane.b32.xlu0 %v10332_v18, %s6331_s2 }
 0x4dd   :  { %4559 = vrot.lane.b32.xlu2 %v10385_v4, %s6331_s2 }
 0x4e0   :  { %v10443_v24 = vpop.permute.xlu1 %4513 }
 0x4e2   :  { %4517 = vrot.lane.b32.xlu1 %v10322_v30, %s6331_s2 }
 0x4e4   :  { %4645 = vrot.lane.b32.xlu0 %v10322_v30, %s6330_s0  ;;  %v4510_v30 = vpop.permute.xlu0 %4509 }
 0x4e5   :  { %4535 = vrot.lane.b32.xlu2 %v10368_v32, %s6331_s2 }
 0x4e8   :  { %v10453_v10 = vpop.permute.xlu1 %4637 }
 0x4ea   :  { %4661 = vrot.lane.b32.xlu1 %v10375_v46, %s6330_s0 }
 0x4ec   :  { %4519 = vrot.lane.b32.xlu0 %v10316_v54, %s6331_s2 }
 0x4ed   :  { %4551 = vrot.lane.b32.xlu2 %v10416_v59, %s6331_s2 }
 0x4ee   :  { %v10461_v1 = vpop.permute.xlu2 %4523 }
 0x4f0   :  { %v10463_v45 = vpop.permute.xlu1 %4515 }
 0x4f2   :  { %4663 = vrot.lane.b32.xlu1 %v10368_v32, %s6330_s0 }
 0x4f4   :  { %4647 = vrot.lane.b32.xlu0 %v10316_v54, %s6330_s0 }
 0x4f5   :  { %4675 = vrot.lane.b32.xlu2 %v10251_v51, %s6330_s0 }
 0x4f6   :  { %v10471_v33 = vpop.permute.xlu2 %4651 }
 0x4f8   :  { %v10473_v16 = vpop.permute.xlu1 %4639 }
 0x4fa   :  { %4669 = vrot.lane.b32.xlu1 %v10286_v39, %s6330_s0 }
 0x4fc   :  { %4533 = vrot.lane.b32.xlu0 %v10375_v46, %s6331_s2  ;;  %v4837_v19 = vpop.f32.mrf.mxu3 }
 0x4fd   :  { %4673 = vrot.lane.b32.xlu2 %v10257_v8, %s6330_s0 }
 0x4fe   :  { %v10481_v53 = vpop.permute.xlu0 %4521 }
 0x4ff   :  { %v10483_v54 = vpop.permute.xlu2 %4529 }
 0x500   :  { %v4526_v55 = vpop.permute.xlu1 %4525 }
 0x501   :  { %v4583_v32 = vsel %vm441_vm2, %v10481_v53, %v4526_v55  ;;  %v4581_v11 = vsel %vm441_vm2, %v4526_v55, %v10483_v54 }
 0x502   :  { %4667 = vrot.lane.b32.xlu1 %v10330_v61, %s6330_s0  ;;  %v4591_v61 = vsel %vm441_vm2, %v10372_v31, %v4510_v30 }
 0x503   :  { %v4599_v21 = vmul.f32 %v11552_v27, %v4591_v61 }
 0x504   :  { %4549 = vrot.lane.b32.xlu0 %v4477_v40, %s6331_s2 }
 0x505   :  { %4665 = vrot.lane.b32.xlu2 %v10336_v48, %s6330_s0  ;;  %v4589_v48 = vsel %vm441_vm2, %v4510_v30, %v10443_v24 }
 0x506   :  { %v10490_v51 = vpop.permute.xlu0 %4649  ;;  %v4600_v63 = vmul.f32 %v11553_v28, %v4589_v48  ;;  %v11557_v48 = vld [vmem:[#allocation54_spill] sm:$0xff] }
 0x507   :  { %v10492_v39 = vpop.permute.xlu2 %4653 }
 0x508   :  { %v10494_v29 = vpop.permute.xlu1 %4531 }
 0x50a   :  { %4691 = vrot.lane.b32.xlu1 %v10332_v18, %s6330_s0 }
 0x50c   :  { %4677 = vrot.lane.b32.xlu0 %v4477_v40, %s6330_s0 }
 0x50d   :  { %4685 = vrot.lane.b32.xlu2 %v10389_v38, %s6330_s0 }
 0x50e   :  { %v4512_v8 = vpop.permute.xlu0 %4511 }
 0x50f   :  { %v4590_v9 = vsel %vm441_vm2, %v4512_v8, %v10463_v45  ;;  %v4592_v18 = vsel %vm441_vm2, %v10404_v58, %v4512_v8  ;;  %v10513_v13 = vpop.permute.xlu2 %4537 }
 0x510   :  { %v4615_v26 = vmul.f32 %v11552_v27, %v4592_v18  ;;  %v4616_v35 = vmul.f32 %v11553_v28, %v4590_v9  ;;  %v10517_v15 = vpop.permute.xlu1 %4545  ;;  %v11558_v18 = vld [vmem:[#allocation50_spill] sm:$0xff] }
 0x512   :  { %5137 = vmatpush.msra.mxu2 %v4615_v26  ;;  %5157 = vmatpush.msra.mxu3 %v4616_v35 }
 0x513   :  { %4683 = vrot.lane.b32.xlu1 %v10406_v42, %s6330_s0 }
 0x514   :  { %5138 = vmatpush.msra.mxu2 %v4599_v21  ;;  %5158 = vmatpush.msra.mxu3 %v4600_v63  ;;  %v4718_v21 = vsel %vm319_vm3, %v10473_v16, %v10451_v0  ;;  %v11559_v63 = vld [vmem:[#allocation34_spill] sm:$0xff] }
 0x515   :  { %4681 = vrot.lane.b32.xlu2 %v10383_v6, %s6330_s0  ;;  %4679 = vrot.lane.b32.xlu0 %v10416_v59, %s6330_s0  ;;  %v4603_v6 = vmul.f32 %v11554_v25, %v4583_v32 }
 0x516   :  { %v10529_v56 = vpop.permute.xlu0 %4657  ;;  %6174 = vmatmul.msk.f32.vlgmr.msra.gmra.mxu2 %vm1107_vm11, %v10527_v34  ;;  %6175 = vmatmul.msk.f32.vlgmr.msra.gmra.mxu3 %vm1107_vm11, %v10527_v34 }
 0x517   :  { %v10535_v7 = vpop.permute.xlu2 %4655 }
 0x518   :  { %v10537_v57 = vpop.permute.xlu1 %4547 }
 0x51d   :  { %4687 = vrot.lane.b32.xlu0 %v10385_v4, %s6330_s0  ;;  %v4604_v4 = vmul.f32 %v11555_v17, %v4581_v11 }
 0x51e   :  { %v4528_v23 = vpop.permute.xlu0 %4527 }
 0x51f   :  { %v4582_v50 = vsel %vm441_vm2, %v4528_v23, %v10494_v29  ;;  %v4584_v14 = vsel %vm441_vm2, %v10461_v1, %v4528_v23  ;;  %v10553_v46 = vpop.permute.xlu2 %4539 }
 0x520   :  { %v4619_v3 = vmul.f32 %v11554_v25, %v4584_v14  ;;  %v4620_v43 = vmul.f32 %v11555_v17, %v4582_v50  ;;  %v10559_v41 = vpop.permute.xlu1 %4671  ;;  %v4717_v50 = vsel %vm319_vm3, %v10453_v10, %v10437_v62 }
 0x522   :  { %5217 = vmatpush.msrb.mxu2 %v4619_v3  ;;  %5237 = vmatpush.msrb.mxu3 %v4620_v43  ;;  %v11560_v3 = vld [vmem:[#allocation16_spill] sm:$0xff] }
 0x523   :  { %v4743_v17 = vmul.f32 %v11560_v3, %v4718_v21 }
 0x524   :  { %5218 = vmatpush.msrb.mxu2 %v4603_v6  ;;  %5238 = vmatpush.msrb.mxu3 %v4604_v4  ;;  %v4727_v6 = vmul.f32 %v11560_v3, %v4717_v50 }
 0x525   :  { %4689 = vrot.lane.b32.xlu0 %v10338_v12, %s6330_s0  ;;  %6178 = vmatmul.msk.f32.vlgmr.msrb.gmra.mxu2 %vm1107_vm11, %v10527_v34 }
 0x526   :  { %v10565_v38 = vpop.permute.xlu0 %4659  ;;  %6179 = vmatmul.msk.f32.vlgmr.msrb.gmra.mxu3 %vm1107_vm11, %v10527_v34 }
 0x527   :  { %v4562_v60 = vpop.permute.xlu2 %4561  ;;  %v4710_v4 = vsel %vm319_vm3, %v10535_v7, %v10565_v38 }
 0x528   :  { %v4502_v5 = vpop.permute.xlu1 %4501 }
 0x529   :  { %v4593_v42 = vsel %vm441_vm2, %v4502_v5, %v10372_v31 }
 0x52a   :  { %v4598_v22 = vmul.f32 %v11556_v49, %v4593_v42 }
 0x52d   :  { %5744 = vperm.xlu0 %6217, %v4500_v36   ;;  %v4709_v36 = vsel %vm319_vm3, %v10492_v39, %v10529_v56 }
 0x52e   :  { %v4542_v52 = vpop.permute.xlu0 %4541 }
 0x52f   :  { %v4504_v2 = vpop.permute.xlu2 %4503  ;;  %v4573_v31 = vsel %vm441_vm2, %v4542_v52, %v10517_v15 }
 0x530   :  { %v4594_v12 = vsel %vm441_vm2, %v4504_v2, %v10404_v58  ;;  %v4575_v58 = vsel %vm441_vm2, %v10513_v13, %v4542_v52  ;;  %v4608_v35 = vmul.f32 %v11558_v18, %v4573_v31  ;;  %v11561_v52 = vld [vmem:[#allocation45_spill] sm:$0xff] }
 0x531   :  { %v4614_v37 = vmul.f32 %v11556_v49, %v4594_v12  ;;  %v4607_v28 = vmul.f32 %v11557_v48, %v4575_v58  ;;  %v4747_v42 = vmul.f32 %v11561_v52, %v4710_v4  ;;  %v4731_v49 = vmul.f32 %v11561_v52, %v4709_v36  ;;  %v11568_v52 = vld [vmem:[#allocation56_spill] sm:$0xff] }
 0x533   :  { %5117 = vmatpush.msra.mxu1 %v4614_v37 }
 0x535   :  { %5118 = vmatpush.msra.mxu1 %v4598_v22  ;;  %v4595_v22 = vsel %vm441_vm2, %v4562_v60, %v4502_v5 }
 0x536   :  { %v10577_v44 = vpop.permute.xlu0 %4553  ;;  %6173 = vmatmul.msk.f32.vlgmr.msra.gmra.mxu1 %vm1107_vm11, %v10527_v34 }
 0x537   :  { %v4560_v59 = vpop.permute.xlu2 %4559 }
 0x53c   :  { %v10581_v40 = vpop.permute.xlu1 %4555 }
 0x53d   :  { %v4568_v26 = vsel %vm441_vm2, %v10581_v40, %v4560_v59 }
 0x53e   :  { %v4544_v30 = vpop.permute.xlu0 %4543  ;;  %v4627_v23 = vmul.f32 %v11559_v63, %v4568_v26  ;;  %v11564_v26 = vld [vmem:[#allocation43_spill] sm:$0xff] }
 0x53f   :  { %v4574_v55 = vsel %vm441_vm2, %v4544_v30, %v10537_v57  ;;  %v4576_v8 = vsel %vm441_vm2, %v10553_v46, %v4544_v30  ;;  %v10595_v61 = vpop.permute.xlu2 %4535 }
 0x540   :  { %v4623_v9 = vmul.f32 %v11557_v48, %v4576_v8  ;;  %v4624_v27 = vmul.f32 %v11558_v18, %v4574_v55  ;;  %v11562_v8 = vld [vmem:[#allocation32_spill] sm:$0xff] }
 0x542   :  { %5297 = vmatpush.msra.mxu2 %v4623_v9  ;;  %5317 = vmatpush.msra.mxu3 %v4624_v27  ;;  %v11563_v9 = vld [vmem:[#allocation59_spill] sm:$0xff] }
 0x544   :  { %5298 = vmatpush.msra.mxu2 %v4607_v28  ;;  %5318 = vmatpush.msra.mxu3 %v4608_v35  ;;  %v4558_v32 = vpop.permute.xlu1 %4557 }
 0x545   :  { %v4567_v11 = vsel %vm441_vm2, %v10577_v44, %v4558_v32  ;;  %6182 = vmatmul.msk.f32.vlgmr.msra.gmra.mxu2 %vm1107_vm11, %v10527_v34  ;;  %6183 = vmatmul.msk.f32.vlgmr.msra.gmra.mxu3 %vm1107_vm11, %v10527_v34  ;;  %v4565_v30 = vsel %vm441_vm2, %v4558_v32, %v4562_v60  ;;  %v4597_v60 = vmul.f32 %v11562_v8, %v4595_v22 }
 0x546   :  { %v4611_v14 = vmul.f32 %v11559_v63, %v4567_v11  ;;  %5377 = vmatpush.msrb.mxu2 %v4627_v23  ;;  %v10621_v25 = vpop.permute.xlu0 %4629  ;;  %v4612_v27 = vmul.f32 %v11563_v9, %v4565_v30 }
 0x547   :  { %v10624_v43 = vpop.permute.xlu2 %4551 }
 0x548   :  { %5378 = vmatpush.msrb.mxu2 %v4611_v14  ;;  %v11565_v14 = vld [vmem:[#allocation48_spill] sm:$0xff] }
 0x54a   :  { %5460 = vmatpush.msra.mxu2 %v4743_v17  ;;  %v11566_v17 = vld [vmem:[#allocation49_spill] sm:$0xff] }
 0x54c   :  { %5461 = vmatpush.msra.mxu2 %v4727_v6  ;;  %v10636_v12 = vpop.permute.xlu1 %4631 }
 0x54d   :  { %6186 = vmatmul.msk.f32.vlgmr.msrb.gmra.mxu2 %vm1107_vm11, %v10527_v34 }
 0x54e   :  { %5540 = vmatpush.msrb.mxu2 %v4747_v42  ;;  %v4564_v37 = vpop.permute.xlu0 %4563 }
 0x54f   :  { %v10645_v31 = vpop.permute.xlu2 %4675  ;;  %v4566_v58 = vsel %vm441_vm2, %v4560_v59, %v4564_v37  ;;  %v4596_v55 = vsel %vm441_vm2, %v4564_v37, %v4504_v2  ;;  %v10659_v59 = vld [vmem:[#allocation5 + $0xd0] ss:$0 sm:$0xff]  ;;  %v11569_v37 = vld [vmem:[#allocation13_spill] sm:$0xff] }
 0x550   :  { %v4613_v48 = vmul.f32 %v11562_v8, %v4596_v55  ;;  %v4628_v18 = vmul.f32 %v11563_v9, %v4566_v58  ;;  %5541 = vmatpush.msrb.mxu2 %v4731_v49  ;;  %v4702_v5 = vsel %vm319_vm3, %v10559_v41, %v10645_v31  ;;  %v11570_v8 = vld [vmem:[#allocation31_spill] sm:$0xff] }
 0x551   :  { %v4751_v2 = vmul.f32 %v11564_v26, %v4702_v5 }
 0x552   :  { %5097 = vmatpush.msra.mxu0 %v4613_v48  ;;  %5397 = vmatpush.msrb.mxu3 %v4628_v18 }
 0x554   :  { %5398 = vmatpush.msrb.mxu3 %v4612_v27  ;;  %v4518_v28 = vpop.permute.xlu1 %4517  ;;  %5098 = vmatpush.msra.mxu0 %v4597_v60  ;;  %v4572_v60 = vsel %vm441_vm2, %v10537_v57, %v10624_v43  ;;  %v11572_v57 = vld [vmem:[#allocation15_spill] sm:$0xff] }
 0x555   :  { %6190 = vmatmul.msk.f32.vlgmr.msra.gmra.mxu2 %vm1107_vm11, %v10659_v59  ;;  %6172 = vmatmul.msk.f32.vlgmr.msra.gmra.mxu0 %vm1107_vm11, %v10527_v34  ;;  %v4585_v23 = vsel %vm441_vm2, %v4518_v28, %v10481_v53  ;;  %v4587_v32 = vsel %vm441_vm2, %v10443_v24, %v4518_v28  ;;  %v4578_v53 = vsel %vm441_vm2, %v10595_v61, %v10553_v46 }
 0x556   :  { %5620 = vmatpush.msra.mxu2 %v4751_v2  ;;  %v10666_v35 = vpop.permute.xlu0 %4645  ;;  %6187 = vmatmul.msk.f32.vlgmr.msrb.gmra.mxu3 %vm1107_vm11, %v10527_v34  ;;  %v4580_v24 = vsel %vm441_vm2, %v10494_v29, %v10595_v61  ;;  %v4602_v4 = vmul.f32 %v11566_v17, %v4585_v23  ;;  %v4622_v42 = vmul.f32 %v11568_v52, %v4578_v53 }
 0x557   :  { %v4715_v46 = vsel %vm319_vm3, %v10437_v62, %v10666_v35  ;;  %v10718_v58 = vpop.permute.xlu2 %4673  ;;  %v4720_v23 = vsel %vm319_vm3, %v10423_v47, %v10473_v16  ;;  %v4719_v16 = vsel %vm319_vm3, %v10433_v20, %v10453_v10  ;;  %v4711_v10 = vsel %vm319_vm3, %v10490_v51, %v10492_v39  ;;  %v11576_v39 = vld [vmem:[#allocation51_spill] sm:$0xff] }
 0x558   :  { %v4728_v55 = vmul.f32 %v11569_v37, %v4715_v46 }
 0x55c   :  { %v10670_v21 = vpop.permute.xlu1 %4661 }
 0x55d   :  { %6194 = vmatmul.msk.f32.vlgmr.msrb.gmra.mxu2 %vm1107_vm11, %v10659_v59  ;;  %v4707_v62 = vsel %vm319_vm3, %v10529_v56, %v10670_v21  ;;  %v4570_v56 = vsel %vm441_vm2, %v10624_v43, %v10581_v40  ;;  %v11571_v40 = vld [vmem:[#allocation35_spill] sm:$0xff] }
 0x55e   :  { %v4520_v63 = vpop.permute.xlu0 %4519  ;;  %v4732_v9 = vmul.f32 %v11570_v8, %v4707_v62  ;;  %v4626_v43 = vmul.f32 %v11572_v57, %v4570_v56 }
 0x55f   :  { %v4586_v11 = vsel %vm441_vm2, %v4520_v63, %v10461_v1  ;;  %v4588_v50 = vsel %vm441_vm2, %v10463_v45, %v4520_v63  ;;  %v4601_v1 = vmul.f32 %v11565_v14, %v4587_v32  ;;  %v11567_v45 = vld [vmem:[#allocation55_spill] sm:$0xff]  ;;  %v4625_v63 = vmul.f32 %v11571_v40, %v4572_v60  ;;  %v11580_v60 = vld [vmem:[#allocation18_spill] sm:$0xff] }
 0x560   :  { %v4617_v3 = vmul.f32 %v11565_v14, %v4588_v50  ;;  %v4618_v6 = vmul.f32 %v11566_v17, %v4586_v11  ;;  %v4621_v36 = vmul.f32 %v11567_v45, %v4580_v24  ;;  %v4722_v11 = vsel %vm319_vm3, %v10636_v12, %v10423_v47 }
 0x561   :  { %v4721_v47 = vsel %vm319_vm3, %v10621_v25, %v10433_v20 }
 0x562   :  { %5177 = vmatpush.msrb.mxu0 %v4617_v3  ;;  %5197 = vmatpush.msrb.mxu1 %v4618_v6  ;;  %v11573_v6 = vld [vmem:[#allocation30_spill] sm:$0xff] }
 0x563   :  { %v4742_v53 = vmul.f32 %v11573_v6, %v4720_v23  ;;  %v4726_v20 = vmul.f32 %v11573_v6, %v4719_v16  ;;  %v4817_v16 = vpop.f32.mrf.mxu2  ;;  %v4917_v6 = vpop.f32.mrf.mxu3 }
 0x564   :  { %5198 = vmatpush.msrb.mxu1 %v4602_v4  ;;  %v10700_v49 = vpop.permute.xlu1 %4663  ;;  %5178 = vmatpush.msrb.mxu0 %v4601_v1  ;;  %v11575_v4 = vld [vmem:[#allocation52_spill] sm:$0xff] }
 0x565   :  { %6176 = vmatmul.msk.f32.vlgmr.msrb.gmra.mxu0 %vm1107_vm11, %v10527_v34  ;;  %6177 = vmatmul.msk.f32.vlgmr.msrb.gmra.mxu1 %vm1107_vm11, %v10527_v34  ;;  %v4708_v30 = vsel %vm319_vm3, %v10565_v38, %v10700_v49 }
 0x566   :  { %5257 = vmatpush.msra.mxu0 %v4621_v36  ;;  %5277 = vmatpush.msra.mxu1 %v4622_v42  ;;  %v4648_v29 = vpop.permute.xlu0 %4647  ;;  %v4748_v48 = vmul.f32 %v11570_v8, %v4708_v30  ;;  %v4730_v42 = vmul.f32 %v11575_v4, %v4711_v10 }
 0x567   :  { %v4716_v61 = vsel %vm319_vm3, %v10451_v0, %v4648_v29  ;;  %v4714_v1 = vsel %vm319_vm3, %v4648_v29, %v10471_v33 }
 0x568   :  { %v4744_v22 = vmul.f32 %v11569_v37, %v4716_v61  ;;  %v4745_v36 = vmul.f32 %v11576_v39, %v4714_v1 }
 0x56a   :  { %5480 = vmatpush.msra.mxu3 %v4744_v22  ;;  %v11577_v22 = vld [vmem:[#allocation46_spill] sm:$0xff] }
 0x56c   :  { %5481 = vmatpush.msra.mxu3 %v4728_v55  ;;  %v10726_v0 = vpop.permute.xlu1 %4669  ;;  %v11578_v55 = vld [vmem:[#allocation47_spill] sm:$0xff] }
 0x56d   :  { %v4701_v38 = vsel %vm319_vm3, %v10726_v0, %v10718_v58  ;;  %6191 = vmatmul.msk.f32.vlgmr.msra.gmra.mxu3 %vm1107_vm11, %v10659_v59 }
 0x56e   :  { %v4735_v18 = vmul.f32 %v11564_v26, %v4701_v38  ;;  %5560 = vmatpush.msrb.mxu3 %v4748_v48  ;;  %v4534_v5 = vpop.permute.xlu0 %4533 }
 0x56f   :  { %v4577_v27 = vsel %vm441_vm2, %v4534_v5, %v10513_v13  ;;  %v4579_v26 = vsel %vm441_vm2, %v10483_v54, %v4534_v5  ;;  %v4666_v54 = vpop.permute.xlu2 %4665  ;;  %v11579_v5 = vld [vmem:[#allocation53_spill] sm:$0xff] }
 0x570   :  { %v4605_v2 = vmul.f32 %v11567_v45, %v4579_v26  ;;  %v4606_v28 = vmul.f32 %v11568_v52, %v4577_v27  ;;  %5561 = vmatpush.msrb.mxu3 %v4732_v9  ;;  %5621 = vmatpush.msra.mxu2 %v4735_v18  ;;  %v4703_v37 = vsel %vm319_vm3, %v4666_v54, %v10726_v0 }
 0x571   :  { %6198 = vmatmul.msk.f32.vlgmr.msra.gmra.mxu2 %vm1107_vm11, %v10659_v59 }
 0x572   :  { %5258 = vmatpush.msra.mxu0 %v4605_v2  ;;  %5278 = vmatpush.msra.mxu1 %v4606_v28 }
 0x573   :  { %6180 = vmatmul.msk.f32.vlgmr.msra.gmra.mxu0 %vm1107_vm11, %v10527_v34  ;;  %6181 = vmatmul.msk.f32.vlgmr.msra.gmra.mxu1 %vm1107_vm11, %v10527_v34 }
 0x574   :  { %5337 = vmatpush.msrb.mxu0 %v4625_v63  ;;  %5357 = vmatpush.msrb.mxu1 %v4626_v43  ;;  %v4668_v13 = vpop.permute.xlu1 %4667  ;;  %v11582_v43 = vld [vmem:[#allocation21_spill] sm:$0xff] }
 0x575   :  { %6195 = vmatmul.msk.f32.vlgmr.msrb.gmra.mxu3 %vm1107_vm11, %v10659_v59  ;;  %v4704_v61 = vsel %vm319_vm3, %v4668_v13, %v10559_v41 }
 0x576   :  { %v4550_v32 = vpop.permute.xlu0 %4549  ;;  %v4750_v41 = vmul.f32 %v11578_v55, %v4704_v61 }
 0x577   :  { %v4569_v50 = vsel %vm441_vm2, %v4550_v32, %v10577_v44  ;;  %v4571_v14 = vsel %vm441_vm2, %v10517_v15, %v4550_v32  ;;  %v4712_v15 = vsel %vm319_vm3, %v10471_v33, %v10535_v7  ;;  %v11574_v44 = vld [vmem:[#allocation44_spill] sm:$0xff]  ;;  %v4713_v33 = vsel %vm319_vm3, %v10666_v35, %v10490_v51  ;;  %v4686_v29 = vpop.permute.xlu2 %4685 }
 0x578   :  { %v4609_v3 = vmul.f32 %v11571_v40, %v4571_v14  ;;  %v4610_v17 = vmul.f32 %v11572_v57, %v4569_v50  ;;  %v4741_v24 = vmul.f32 %v11574_v44, %v4722_v11  ;;  %v4725_v7 = vmul.f32 %v11574_v44, %v4721_v47  ;;  %v10887_v47 = vpop.f32.mrf.mxu3  ;;  %v4797_v44 = vpop.f32.mrf.mxu1 }
 0x579   :  { %v4746_v45 = vmul.f32 %v11575_v4, %v4712_v15  ;;  %v4729_v46 = vmul.f32 %v11576_v39, %v4713_v33  ;;  %v4706_v51 = vsel %vm319_vm3, %v10700_v49, %v4668_v13  ;;  %v4705_v35 = vsel %vm319_vm3, %v10670_v21, %v4666_v54  ;;  %v11583_v13 = vld [vmem:[#allocation23_spill] sm:$0xff]  ;;  %v4777_v15 = vpop.f32.mrf.mxu0 }
 0x57a   :  { %5338 = vmatpush.msrb.mxu0 %v4609_v3  ;;  %5358 = vmatpush.msrb.mxu1 %v4610_v17  ;;  %v4749_v30 = vmul.f32 %v11577_v22, %v4706_v51  ;;  %v4733_v49 = vmul.f32 %v11577_v22, %v4705_v35  ;;  %v4734_v21 = vmul.f32 %v11578_v55, %v4703_v37  ;;  %vm5795_vm2 = vcmask 1042434  }
 0x57b   :  { %6184 = vmatmul.msk.f32.vlgmr.msrb.gmra.mxu0 %vm1107_vm11, %v10527_v34  ;;  %6185 = vmatmul.msk.f32.vlgmr.msrb.gmra.mxu1 %vm1107_vm11, %v10527_v34 }
 0x57c   :  { %5420 = vmatpush.msra.mxu0 %v4741_v24  ;;  %5440 = vmatpush.msra.mxu1 %v4742_v53  ;;  %v4692_v52 = vpop.permute.xlu1 %4691 }
 0x57d   :  { %v4724_v26 = vsel %vm319_vm3, %v4692_v52, %v10636_v12 }
 0x57e   :  { %5421 = vmatpush.msra.mxu0 %v4725_v7  ;;  %5441 = vmatpush.msra.mxu1 %v4726_v20  ;;  %v4678_v34 = vpop.permute.xlu0 %4677 }
 0x57f   :  { %v4682_v48 = vpop.permute.xlu2 %4681  ;;  %v4699_v0 = vsel %vm319_vm3, %v10718_v58, %v4678_v34 }
 0x580   :  { %5500 = vmatpush.msrb.mxu0 %v4745_v36  ;;  %5520 = vmatpush.msrb.mxu1 %v4746_v45  ;;  %v4697_v18 = vsel %vm319_vm3, %v4678_v34, %v4682_v48  ;;  %v4736_v58 = vmul.f32 %v11579_v5, %v4699_v0  ;;  %v4695_v40 = vsel %vm319_vm3, %v4682_v48, %v4686_v29  ;;  %v10891_v1 = vpop.f32.mrf.mxu3  ;;  %v4877_v20 = vpop.f32.mrf.mxu1 }
 0x581   :  { %v4737_v2 = vmul.f32 %v11580_v60, %v4697_v18  ;;  %v4738_v32 = vmul.f32 %v11582_v43, %v4695_v40  ;;  %v4857_v10 = vpop.f32.mrf.mxu0 }
 0x582   :  { %5501 = vmatpush.msrb.mxu0 %v4729_v46  ;;  %5521 = vmatpush.msrb.mxu1 %v4730_v42 }
 0x583   :  { %6188 = vmatmul.msk.f32.vlgmr.msra.gmra.mxu0 %vm1107_vm11, %v10659_v59  ;;  %6189 = vmatmul.msk.f32.vlgmr.msra.gmra.mxu1 %vm1107_vm11, %v10659_v59 }
 0x584   :  { %5580 = vmatpush.msra.mxu0 %v4749_v30  ;;  %5600 = vmatpush.msra.mxu1 %v4750_v41 }
 0x585   :  { %v4684_v62 = vpop.permute.xlu1 %4683 }
 0x586   :  { %5581 = vmatpush.msra.mxu0 %v4733_v49  ;;  %5601 = vmatpush.msra.mxu1 %v4734_v21 }
 0x587   :  { %v4680_v8 = vpop.permute.xlu0 %4679 }
 0x588   :  { %v4698_v38 = vsel %vm319_vm3, %v4680_v8, %v4684_v62  ;;  %v4700_v9 = vsel %vm319_vm3, %v10645_v31, %v4680_v8  ;;  %v11581_v31 = vld [vmem:[#allocation33_spill] sm:$0xff] }
 0x589   :  { %v4752_v56 = vmul.f32 %v11579_v5, %v4700_v9  ;;  %v4753_v27 = vmul.f32 %v11580_v60, %v4698_v38  ;;  %v4756_v28 = vmul.f32 %v11581_v31, %v4724_v26  ;;  %v10893_v4 = vpop.f32.mrf.mxu0 }
 0x58b   :  { %5640 = vmatpush.msra.mxu3 %v4752_v56  ;;  %6192 = vmatmul.msk.f32.vlgmr.msrb.gmra.mxu0 %vm1107_vm11, %v10659_v59 }
 0x58c   :  { %6193 = vmatmul.msk.f32.vlgmr.msrb.gmra.mxu1 %vm1107_vm11, %v10659_v59  ;;  %5660 = vmatpush.msrb.mxu0 %v4753_v27 }
 0x58d   :  { %5641 = vmatpush.msra.mxu3 %v4736_v58 }
 0x58e   :  { %6199 = vmatmul.msk.f32.vlgmr.msra.gmra.mxu3 %vm1107_vm11, %v10659_v59  ;;  %5661 = vmatpush.msrb.mxu0 %v4737_v2 }
 0x58f   :  { %5720 = vmatpush.msrb.mxu3 %v4756_v28  ;;  %v4688_v12 = vpop.permute.xlu0 %4687 }
 0x590   :  { %v4694_v63 = vsel %vm319_vm3, %v4688_v12, %v4692_v52  ;;  %v4696_v57 = vsel %vm319_vm3, %v4684_v62, %v4688_v12 }
 0x591   :  { %v4754_v54 = vmul.f32 %v11582_v43, %v4696_v57  ;;  %v4755_v23 = vmul.f32 %v11583_v13, %v4694_v63  ;;  %v10897_v36 = vpop.f32.mrf.mxu0 }
 0x593   :  { %5680 = vmatpush.msrb.mxu1 %v4754_v54  ;;  %5700 = vmatpush.msrb.mxu2 %v4755_v23 }
 0x594   :  { %6196 = vmatmul.msk.f32.vlgmr.msra.gmra.mxu0 %vm1107_vm11, %v10659_v59  ;;  %6197 = vmatmul.msk.f32.vlgmr.msra.gmra.mxu1 %vm1107_vm11, %v10659_v59 }
 0x595   :  { %5681 = vmatpush.msrb.mxu1 %v4738_v32 }
 0x597   :  { %v4690_v11 = vpop.permute.xlu0 %4689 }
 0x598   :  { %v4693_v50 = vsel %vm319_vm3, %v4686_v29, %v4690_v11  ;;  %v4723_v14 = vsel %vm319_vm3, %v4690_v11, %v10621_v25  ;;  %v4897_v25 = vpop.f32.mrf.mxu2  ;;  %vm5793_vm3 = vcmask 1040384  }
 0x599   :  { %v4739_v3 = vmul.f32 %v11583_v13, %v4693_v50  ;;  %v4740_v17 = vmul.f32 %v11581_v31, %v4723_v14  ;;  %v5160_v33 = vpop.f32.mrf.mxu3 }
 0x59a   :  { %v5161_v41 = vadd.f32 %v5160_v33, %v4837_v19 }
 0x59b   :  { %5701 = vmatpush.msrb.mxu2 %v4739_v3  ;;  %5721 = vmatpush.msrb.mxu3 %v4740_v17 }
 0x59c   :  { %6200 = vmatmul.msk.f32.vlgmr.msrb.gmra.mxu0 %vm1107_vm11, %v10659_v59  ;;  %6201 = vmatmul.msk.f32.vlgmr.msrb.gmra.mxu1 %vm1107_vm11, %v10659_v59 }
 0x59d   :  { %6202 = vmatmul.msk.f32.vlgmr.msrb.gmra.mxu2 %vm1107_vm11, %v10659_v59  ;;  %6203 = vmatmul.msk.f32.vlgmr.msrb.gmra.mxu3 %vm1107_vm11, %v10659_v59  ;;  %v10895_v59 = vpop.f32.mrf.mxu1  ;;  %vm5797_vm11 = vcmask 1041408  }
 0x59f   :  { %v10911_v62 = vpop.permute.xlu0 %5744 }
 0x5a0   :  { %v10885_v53 = vpop.f32.mrf.mxu2 }
 0x5a5   :  { %v10899_v52 = vpop.f32.mrf.mxu1 }
 0x5a8   :  { %v10889_v24 = vpop.f32.mrf.mxu2 }
 0x5a9   :  { %v5240_v39 = vpop.f32.mrf.mxu3 }
 0x5aa   :  { %v5241_v40 = vadd.f32 %v5240_v39, %v4917_v6 }
 0x5b0   :  { %v5140_v7 = vpop.f32.mrf.mxu2 }
 0x5b1   :  { %v5141_v30 = vadd.f32 %v5140_v7, %v4817_v16 }
 0x5b3   :  { %v5120_v46 = vpop.f32.mrf.mxu1 }
 0x5b4   :  { %v5121_v26 = vadd.f32 %v5120_v46, %v4797_v44 }
 0x5b8   :  { %v5220_v45 = vpop.f32.mrf.mxu2 }
 0x5b9   :  { %v5221_v43 = vadd.f32 %v5220_v45, %v4897_v25 }
 0x5c8   :  { %v5300_v42 = vpop.f32.mrf.mxu2  ;;  %v10901_v29 = vpop.f32.mrf.mxu3 }
 0x5d0   :  { %v10903_v61 = vpop.f32.mrf.mxu2 }
 0x5d2   :  { %v5100_v34 = vpop.f32.mrf.mxu0 }
 0x5d3   :  { %v5101_v27 = vadd.f32 %v5100_v34, %v4777_v15 }
 0x5d8   :  { %v5463_v22 = vpop.f32.mrf.mxu2 }
 0x5d9   :  { %v10905_v37 = vpop.f32.mrf.mxu3  ;;  %v5728_v55 = vadd.f32 %v5463_v22, %v5141_v30  ;;  %v5321_v22 = vadd.f32 %v10901_v29, %v10887_v47 }
 0x5db   :  { %v5749_v48 = vadd.f32 %v10911_v62, %v5728_v55 }
 0x5dd   :  { %v5780_v9 = vrot.slane %v5749_v48, 6 }
 0x5e0   :  { %v5543_v63 = vpop.f32.mrf.mxu2 }
 0x5e1   :  { %v5732_v32 = vadd.f32 %v5543_v63, %v5221_v43 }
 0x5e2   :  { %v5180_v51 = vpop.f32.mrf.mxu0  ;;  %v5200_v35 = vpop.f32.mrf.mxu1 }
 0x5e3   :  { %v5181_v11 = vadd.f32 %v5180_v51, %v4857_v10  ;;  %v5201_v14 = vadd.f32 %v5200_v35, %v4877_v20  ;;  %v5753_v25 = vadd.f32 %v10911_v62, %v5732_v32  ;;  %v5301_v10 = vadd.f32 %v5300_v42, %v10885_v53 }
 0x5e5   :  { %v5784_v39 = vrot.slane %v5753_v25, 2 }
 0x5f0   :  { %v10907_v49 = vpop.f32.mrf.mxu0  ;;  %v10909_v21 = vpop.f32.mrf.mxu1 }
 0x5f1   :  { %v5483_v8 = vpop.f32.mrf.mxu3 }
 0x5f2   :  { %v5729_v0 = vadd.f32 %v5483_v8, %v5161_v41 }
 0x5f4   :  { %v5750_v38 = vadd.f32 %v10911_v62, %v5729_v0  ;;  %v5623_v7 = vpop.f32.mrf.mxu2 }
 0x5f5   :  { %v5736_v46 = vadd.f32 %v5623_v7, %v5301_v10 }
 0x5f6   :  { %v5781_v18 = vrot.slane %v5750_v38, 5  ;;  %v5281_v38 = vadd.f32 %v10909_v21, %v10895_v59  ;;  %v5261_v59 = vadd.f32 %v10907_v49, %v10893_v4 }
 0x5f7   :  { %v5757_v8 = vadd.f32 %v10911_v62, %v5736_v46 }
 0x5f8   :  { %v5796_v5 = vsel %vm5795_vm2, %v5780_v9, %v5781_v18  ;;  %v5340_v56 = vpop.f32.mrf.mxu0  ;;  %v5360_v60 = vpop.f32.mrf.mxu1 }
 0x5f9   :  { %v5563_v31 = vpop.f32.mrf.mxu3  ;;  %v5787_v9 = vrot.slane %v5757_v8, 6  ;;  %v5341_v47 = vadd.f32 %v5340_v56, %v10897_v36  ;;  %v5361_v29 = vadd.f32 %v5360_v60, %v10899_v52  ;;  %v5381_v52 = vadd.f32 %v10903_v61, %v10889_v24 }
 0x5fa   :  { %v5733_v54 = vadd.f32 %v5563_v31, %v5241_v40  ;;  %v5401_v56 = vadd.f32 %v10905_v37, %v10891_v1 }
 0x5fc   :  { %v5754_v3 = vadd.f32 %v10911_v62, %v5733_v54 }
 0x5fe   :  { %v5785_v33 = vrot.slane %v5754_v3, 1 }
 0x600   :  { %v5423_v58 = vpop.f32.mrf.mxu0  ;;  %v5443_v2 = vpop.f32.mrf.mxu1  ;;  %v5802_v51 = vsel %vm5801_vm8, %v5784_v39, %v5785_v33 }
 0x601   :  { %v5726_v28 = vadd.f32 %v5423_v58, %v5101_v27  ;;  %v5727_v12 = vadd.f32 %v5443_v2, %v5121_v26 }
 0x603   :  { %v5748_v57 = vadd.f32 %v10911_v62, %v5727_v12  ;;  %v5747_v13 = vadd.f32 %v10911_v62, %v5726_v28 }
 0x605   :  { %v5779_v23 = vrot.slane %v5748_v57, 7 }
 0x607   :  { %v5794_v50 = vsel %vm5793_vm3, %v5747_v13, %v5779_v23 }
 0x608   :  { %v5503_v17 = vpop.f32.mrf.mxu0  ;;  %v5798_v16 = vsel %vm5797_vm11, %v5794_v50, %v5796_v5 }
 0x609   :  { %v5730_v19 = vadd.f32 %v5503_v17, %v5181_v11  ;;  %v5523_v6 = vpop.f32.mrf.mxu1 }
 0x60a   :  { %v5731_v15 = vadd.f32 %v5523_v6, %v5201_v14 }
 0x60b   :  { %v5751_v44 = vadd.f32 %v10911_v62, %v5730_v19 }
 0x60c   :  { %v5752_v45 = vadd.f32 %v10911_v62, %v5731_v15 }
 0x60d   :  { %v5782_v20 = vrot.slane %v5751_v44, 4 }
 0x60e   :  { %v5783_v34 = vrot.slane %v5752_v45, 3 }
 0x610   :  { %v5800_v35 = vsel %vm5799_vm9, %v5782_v20, %v5783_v34 }
 0x611   :  { %v5583_v30 = vpop.f32.mrf.mxu0  ;;  %v5603_v55 = vpop.f32.mrf.mxu1  ;;  %v5804_v41 = vsel %vm5803_vm10, %v5800_v35, %v5802_v51 }
 0x612   :  { %v5643_v53 = vpop.f32.mrf.mxu3  ;;  %v5806_v42 = vsel %vm5805_vm12, %v5798_v16, %v5804_v41  ;;  %v5735_v5 = vadd.f32 %v5603_v55, %v5281_v38  ;;  %v5734_v60 = vadd.f32 %v5583_v30, %v5261_v59 }
 0x613   :  { %v5737_v48 = vadd.f32 %v5643_v53, %v5321_v22  ;;  %5816 = vst [vmem:[#allocation8] sm:$0xff] %v5806_v42 }
 0x614   :  { %v5756_v21 = vadd.f32 %v10911_v62, %v5735_v5  ;;  %v5755_v4 = vadd.f32 %v10911_v62, %v5734_v60 }
 0x615   :  { %v5758_v0 = vadd.f32 %v10911_v62, %v5737_v48 }
 0x616   :  { %v5786_v54 = vrot.slane %v5756_v21, 7 }
 0x617   :  { %v5788_v18 = vrot.slane %v5758_v0, 5 }
 0x618   :  { %v5807_v11 = vsel %vm5793_vm3, %v5755_v4, %v5786_v54 }
 0x619   :  { %v5808_v27 = vsel %vm5795_vm2, %v5787_v9, %v5788_v18  ;;  %v5663_v26 = vpop.f32.mrf.mxu0  ;;  %v5683_v58 = vpop.f32.mrf.mxu1 }
 0x61a   :  { %v5738_v2 = vadd.f32 %v5663_v26, %v5341_v47  ;;  %v5739_v31 = vadd.f32 %v5683_v58, %v5361_v29  ;;  %v5809_v37 = vsel %vm5797_vm11, %v5807_v11, %v5808_v27 }
 0x61c   :  { %v5759_v28 = vadd.f32 %v10911_v62, %v5738_v2  ;;  %v5760_v12 = vadd.f32 %v10911_v62, %v5739_v31 }
 0x61e   :  { %v5789_v40 = vrot.slane %v5759_v28, 4  ;;  %v5790_v36 = vrot.slane %v5760_v12, 3 }
 0x620   :  { %v5810_v63 = vsel %vm5799_vm9, %v5789_v40, %v5790_v36  ;;  %v5703_v57 = vpop.f32.mrf.mxu2  ;;  %v5723_v43 = vpop.f32.mrf.mxu3 }
 0x621   :  { %v5740_v13 = vadd.f32 %v5703_v57, %v5381_v52  ;;  %v5741_v23 = vadd.f32 %v5723_v43, %v5401_v56 }
 0x623   :  { %v5761_v49 = vadd.f32 %v10911_v62, %v5740_v13  ;;  %v5762_v32 = vadd.f32 %v10911_v62, %v5741_v23 }
 0x625   :  { %v5791_v24 = vrot.slane %v5761_v49, 2  ;;  %v5792_v61 = vrot.slane %v5762_v32, 1 }
 0x627   :  { %v5811_v1 = vsel %vm5801_vm8, %v5791_v24, %v5792_v61 }
 0x628   :  { %v5812_v50 = vsel %vm5803_vm10, %v5810_v63, %v5811_v1 }
 0x629   :  { %v5813_v62 = vsel %vm5805_vm12, %v5809_v37, %v5812_v50 }
 0x62a   :  { %5817 = vst [vmem:[#allocation8 + $0x8] sm:$0xff] %v5813_v62 }
 0x62b   :  { %5828 = dma.vmem_to_hbm [thread:$0]  %s5824_s4, 256, %s5826_s7, [#allocation4]  }
 0x62c   :  { %6320 = dma.done.wait [#allocation4], 256  }
 0x62d   :  { %6321 = vsyncadd [#allocation4], 4294967040 }
 0x62e   :  { %5833 = vsyncpa [#allocation3], 1 }
 0x62f   :  { %5834 = vsyncpa [#allocation6], 1 }
 0x630   :  { %5835 = vsyncpa [#allocation4], 1 }

</bundles_post_ra>
